<compile_context>
chip_gen: v5e
topology: v5e:2x2
jax: 0.10.0
libtpu: 0.0.40
codegen_flags: <defaults>
</compile_context>

<pallas_src>
import functools

import jax
import jax.numpy as jnp
from jax.experimental import pallas as pl
from jax.experimental.pallas import tpu as pltpu


# ---------------------------------------------------------------------------
# Helpers
# ---------------------------------------------------------------------------
def _round_up(x, m):
    return ((x + m - 1) // m) * m


def _layer_norm(x, gamma, beta, eps=1e-5):
    # One-pass statistics: E[x] and E[x^2] are independent cross-lane reductions
    # (they can overlap on the XLU) and we save one TMxH subtract pass.
    m = jnp.mean(x, axis=-1, keepdims=True)
    m2 = jnp.mean(x * x, axis=-1, keepdims=True)
    var = jnp.maximum(m2 - m * m, 0.0)
    return (x - m) * jax.lax.rsqrt(var + eps) * gamma + beta


def _leaky_relu(x, slope=0.2):
    return jnp.where(x > 0, x, slope * x)


def _default_vmem_limit_bytes():
    """Generation-aware scoped-VMEM limit with headroom for compiler scratch."""
    cap = 128 * 1024 * 1024
    try:
        cap = pltpu.get_tpu_info().vmem_capacity_bytes
    except Exception:
        pass
    # v7x (64 MiB physical) -> 48 MiB; v5e/v6e (128 MiB physical) -> 64 MiB.
    return max(16 * 1024 * 1024, min(64 * 1024 * 1024, cap - 16 * 1024 * 1024))


# ---------------------------------------------------------------------------
# Pallas kernel: whole Supervisor forward on one row-tile of the input.
# Matmuls take bf16 operands and accumulate in f32 on the MXU; LayerNorm,
# bias adds and activations stay in f32.
# ---------------------------------------------------------------------------
def supervisor_kernel(num_blocks,
                      x_ref,
                      fc1_w_ref, fc1_b_ref,
                      ln0_g_ref, ln0_b_ref,
                      ff_w1_ref, ff_b1_ref,
                      ff_w2_ref, ff_b2_ref,
                      ln1_g_ref, ln1_b_ref,
                      fc2_w_ref, fc2_b_ref,
                      out_ref):
    x = x_ref[...]                                              # (TM, Z) bf16

    # fc1 -> LeakyReLU(0.2) -> LayerNorm0
    h = jnp.dot(x, fc1_w_ref[...], preferred_element_type=jnp.float32)
    h = _leaky_relu(h + fc1_b_ref[...])
    out = _layer_norm(h, ln0_g_ref[...], ln0_b_ref[...])        # (TM, H) f32

    # Residual feed-forward blocks.
    def block(i, out):
        res = out
        t = jnp.dot(out.astype(jnp.bfloat16), ff_w1_ref[i],
                    preferred_element_type=jnp.float32)
        t = jnp.maximum(t + ff_b1_ref[i], 0.0)                  # ReLU (dropout = identity)
        t = jnp.dot(t.astype(jnp.bfloat16), ff_w2_ref[i],
                    preferred_element_type=jnp.float32)
        t = jnp.maximum(t + ff_b2_ref[i], 0.0)                  # ReLU (dropout = identity)
        return _layer_norm(t + res, ln1_g_ref[i], ln1_b_ref[i])

    if num_blocks <= 4:
        # Small trip count: fully unrolled for LLO scheduling visibility.
        for i in range(num_blocks):
            out = block(i, out)
    else:
        # Deep configs: bound per-iteration live ranges (vreg / spill pressure).
        out = jax.lax.fori_loop(0, num_blocks, block, out)

    # fc2 -> tanh
    y = jnp.dot(out.astype(jnp.bfloat16), fc2_w_ref[...],
                preferred_element_type=jnp.float32)
    out_ref[...] = jnp.tanh(y + fc2_b_ref[...]).astype(out_ref.dtype)


# ---------------------------------------------------------------------------
# One-time parameter preprocessing: kernel layout (bf16 matmul weights, f32
# biases / LN params).  Call once at load time, NOT per forward call, so XLA
# never re-materializes weight copies on the per-call path.
# ---------------------------------------------------------------------------
def prepare_params(params):
    p = {}
    for k in ("fc1_w", "fc2_w", "ff_w1", "ff_w2"):
        p[k] = jnp.asarray(params[k], jnp.bfloat16)
    for k in ("fc1_b", "fc2_b", "ln0_g", "ln0_b",
              "ff_b1", "ff_b2", "ln1_g", "ln1_b"):
        p[k] = jnp.asarray(params[k], jnp.float32)
    return p


# ---------------------------------------------------------------------------
# Wrapper
# ---------------------------------------------------------------------------
@functools.partial(jax.jit, static_argnames=("num_blocks", "tile_m",
                                             "vmem_limit_bytes", "out_dtype"))
def supervisor_forward(x, kparams, *, num_blocks, tile_m=None,
                       vmem_limit_bytes=None, out_dtype=jnp.float32):
    """x: (N, z_dim).  kparams: output of prepare_params().  Returns (N, data_dim)."""
    N, Z = x.shape
    H = kparams["fc1_w"].shape[1]
    D = kparams["fc2_w"].shape[1]
    # For best MXU/lane utilization pick h_dim as a multiple of 128 (256 on
    # v6e/v7x).  A non-multiple is still correct (full-extent block, masked
    # lanes) — just slower.

    if tile_m is None:
        # Up to 512 rows per step, but keep >= 4 grid steps so both v7x
        # TensorCores see multiple steps.  Sweep 512-1024 on v5e/v6e.
        tile_m = max(8, min(512, _round_up((N + 3) // 4, 8)))
    assert tile_m % 8 == 0
    if vmem_limit_bytes is None:
        vmem_limit_bytes = _default_vmem_limit_bytes()

    Np = _round_up(N, tile_m)
    x_p = x.astype(jnp.bfloat16)                 # halve the per-step x DMA
    if Np != N:
        x_p = jnp.pad(x_p, ((0, Np - N), (0, 0)))

    full = lambda i: (0, 0)
    full3 = lambda i: (0, 0, 0)

    kernel = functools.partial(supervisor_kernel, num_blocks)

    flops = 2 * Np * (Z * H + 2 * num_blocks * H * H + H * D)
    transcendentals = Np * D + Np * (1 + num_blocks)            # tanh + LN rsqrt
    weight_bytes = (Z * H + 2 * num_blocks * H * H + H * D) * 2 \
        + (3 * H + 4 * num_blocks * H + D) * 4
    out_itemsize = jnp.dtype(out_dtype).itemsize
    bytes_accessed = Np * Z * 2 + Np * D * out_itemsize + weight_bytes

    out_p = pl.pallas_call(
        kernel,
        out_shape=jax.ShapeDtypeStruct((Np, D), out_dtype),
        grid_spec=pltpu.PrefetchScalarGridSpec(
            num_scalar_prefetch=0,
            grid=(Np // tile_m,),
            in_specs=[
                pl.BlockSpec((tile_m, Z), lambda i: (i, 0)),          # x tile (bf16)
                pl.BlockSpec((Z, H), full),                           # fc1_w (bf16)
                pl.BlockSpec((1, H), full),                           # fc1_b
                pl.BlockSpec((1, H), full),                           # ln0 gamma
                pl.BlockSpec((1, H), full),                           # ln0 beta
                pl.BlockSpec((num_blocks, H, H), full3),              # ff_w1 (bf16)
                pl.BlockSpec((num_blocks, 1, H), full3),              # ff_b1
                pl.BlockSpec((num_blocks, H, H), full3),              # ff_w2 (bf16)
                pl.BlockSpec((num_blocks, 1, H), full3),              # ff_b2
                pl.BlockSpec((num_blocks, 1, H), full3),              # ln1 gamma
                pl.BlockSpec((num_blocks, 1, H), full3),              # ln1 beta
                pl.BlockSpec((H, D), full),                           # fc2_w (bf16)
                pl.BlockSpec((1, D), full),                           # fc2_b
            ],
            out_specs=pl.BlockSpec((tile_m, D), lambda i: (i, 0)),
        ),
        compiler_params=pltpu.CompilerParams(
            dimension_semantics=("parallel",),
            vmem_limit_bytes=vmem_limit_bytes),
        cost_estimate=pl.CostEstimate(flops=flops,
                                      transcendentals=transcendentals,
                                      bytes_accessed=bytes_accessed),
    )(
        x_p,
        kparams["fc1_w"], kparams["fc1_b"],
        kparams["ln0_g"], kparams["ln0_b"],
        kparams["ff_w1"], kparams["ff_b1"],
        kparams["ff_w2"], kparams["ff_b2"],
        kparams["ln1_g"], kparams["ln1_b"],
        kparams["fc2_w"], kparams["fc2_b"],
    )
    return out_p if Np == N else out_p[:N]


# ---------------------------------------------------------------------------
# Deterministic parameter construction (mirrors Supervisor.__init__ shapes).
# Only the layers used in forward() are materialized.
# ---------------------------------------------------------------------------
def make_params(key, z_dim, data_dim, h_dim, num_blocks):
    ks = jax.random.split(key, 8)
    return {
        # fc1 / fc2 follow init_weights(): N(0, 0.02)
        "fc1_w": 0.02 * jax.random.normal(ks[0], (z_dim, h_dim), jnp.float32),
        "fc1_b": jnp.zeros((1, h_dim), jnp.float32),
        "fc2_w": 0.02 * jax.random.normal(ks[1], (h_dim, data_dim), jnp.float32),
        "fc2_b": jnp.zeros((1, data_dim), jnp.float32),
        # layernorm0
        "ln0_g": jnp.ones((1, h_dim), jnp.float32),
        "ln0_b": jnp.zeros((1, h_dim), jnp.float32),
        # feed_forward_generator_layers2: two Linear(h,h) per block
        "ff_w1": 0.05 * jax.random.normal(ks[2], (num_blocks, h_dim, h_dim), jnp.float32),
        "ff_b1": 0.01 * jax.random.normal(ks[3], (num_blocks, 1, h_dim), jnp.float32),
        "ff_w2": 0.05 * jax.random.normal(ks[4], (num_blocks, h_dim, h_dim), jnp.float32),
        "ff_b2": 0.01 * jax.random.normal(ks[5], (num_blocks, 1, h_dim), jnp.float32),
        # layernorm_layers_1
        "ln1_g": jnp.ones((num_blocks, 1, h_dim), jnp.float32),
        "ln1_b": jnp.zeros((num_blocks, 1, h_dim), jnp.float32),
    }


# Pure-JAX f32 reference for a correctness sanity check.
def reference_forward(x, p, num_blocks):
    def ln(v, g, b):
        mu = v.mean(-1, keepdims=True)
        var = ((v - mu) ** 2).mean(-1, keepdims=True)
        return (v - mu) / jnp.sqrt(var + 1e-5) * g + b

    h = x @ p["fc1_w"] + p["fc1_b"]
    h = jnp.where(h > 0, h, 0.2 * h)
    out = ln(h, p["ln0_g"], p["ln0_b"])
    for i in range(num_blocks):
        res = out
        t = jnp.maximum(out @ p["ff_w1"][i] + p["ff_b1"][i], 0.0)
        t = jnp.maximum(t @ p["ff_w2"][i] + p["ff_b2"][i], 0.0)
        out = ln(t + res, p["ln1_g"][i], p["ln1_b"][i])
    return jnp.tanh(out @ p["fc2_w"] + p["fc2_b"])


if __name__ == "__main__":
    # Small shapes consistent with the module: x of shape (batch*seq, z_dim).
    # h_dim=128 keeps the hidden dim lane-dense; N=512 gives a 4-step row grid
    # with the default adaptive tile_m (128 rows/step).
    batch, seq = 4, 128
    z_dim, data_dim, h_dim, num_blocks = 16, 16, 128, 2
    N = batch * seq

    key = jax.random.PRNGKey(0)
    kx, kp = jax.random.split(key)
    x = jax.random.normal(kx, (N, z_dim), jnp.float32)
    params = make_params(kp, z_dim, data_dim, h_dim, num_blocks)
    kparams = prepare_params(params)        # one-time, outside the call path

    y = supervisor_forward(x, kparams, num_blocks=num_blocks)
    y = jax.block_until_ready(y)

    y_ref = reference_forward(x, params, num_blocks)
    assert y.shape == (N, data_dim)
    # bf16 matmul inputs (f32 accumulation) loosen the tolerance vs f32 reference.
    assert jnp.allclose(y, y_ref, atol=3e-2, rtol=3e-2), "mismatch vs reference"

    print("KERNEL_OK")
</pallas_src>

<mosaic_0001>
module attributes {stable_mosaic.version = 11 : i64} {
  func.func @supervisor_kernel(%arg0: i32, %arg1: memref<128x16xbf16, #tpu.memory_space<vmem>>, %arg2: memref<16x128xbf16, #tpu.memory_space<vmem>>, %arg3: memref<1x128xf32, #tpu.memory_space<vmem>>, %arg4: memref<1x128xf32, #tpu.memory_space<vmem>>, %arg5: memref<1x128xf32, #tpu.memory_space<vmem>>, %arg6: memref<2x128x128xbf16, #tpu.memory_space<vmem>>, %arg7: memref<2x1x128xf32, #tpu.memory_space<vmem>>, %arg8: memref<2x128x128xbf16, #tpu.memory_space<vmem>>, %arg9: memref<2x1x128xf32, #tpu.memory_space<vmem>>, %arg10: memref<2x1x128xf32, #tpu.memory_space<vmem>>, %arg11: memref<2x1x128xf32, #tpu.memory_space<vmem>>, %arg12: memref<128x16xbf16, #tpu.memory_space<vmem>>, %arg13: memref<1x16xf32, #tpu.memory_space<vmem>>, %arg14: memref<128x16xf32, #tpu.memory_space<vmem>>) attributes {dimension_semantics = [#tpu.dimension_semantics<parallel>], iteration_bounds = array<i64: 4>, scalar_prefetch = 0 : i64, scratch_operands = 0 : i64, tpu.core_type = #tpu.core_type<tc>, window_params = [{transform_indices = @transform_0, window_bounds = array<i64: 128, 16>}, {pipeline_mode = #tpu.pipeline_mode<synchronous>, transform_indices = @transform_1, window_bounds = array<i64: 16, 128>}, {pipeline_mode = #tpu.pipeline_mode<synchronous>, transform_indices = @transform_2, window_bounds = array<i64: 1, 128>}, {pipeline_mode = #tpu.pipeline_mode<synchronous>, transform_indices = @transform_3, window_bounds = array<i64: 1, 128>}, {pipeline_mode = #tpu.pipeline_mode<synchronous>, transform_indices = @transform_4, window_bounds = array<i64: 1, 128>}, {pipeline_mode = #tpu.pipeline_mode<synchronous>, transform_indices = @transform_5, window_bounds = array<i64: 2, 128, 128>}, {pipeline_mode = #tpu.pipeline_mode<synchronous>, transform_indices = @transform_6, window_bounds = array<i64: 2, 1, 128>}, {pipeline_mode = #tpu.pipeline_mode<synchronous>, transform_indices = @transform_7, window_bounds = array<i64: 2, 128, 128>}, {pipeline_mode = #tpu.pipeline_mode<synchronous>, transform_indices = @transform_8, window_bounds = array<i64: 2, 1, 128>}, {pipeline_mode = #tpu.pipeline_mode<synchronous>, transform_indices = @transform_9, window_bounds = array<i64: 2, 1, 128>}, {pipeline_mode = #tpu.pipeline_mode<synchronous>, transform_indices = @transform_10, window_bounds = array<i64: 2, 1, 128>}, {pipeline_mode = #tpu.pipeline_mode<synchronous>, transform_indices = @transform_11, window_bounds = array<i64: 128, 16>}, {pipeline_mode = #tpu.pipeline_mode<synchronous>, transform_indices = @transform_12, window_bounds = array<i64: 1, 16>}, {transform_indices = @transform_13, window_bounds = array<i64: 128, 16>}]} {
    %c0 = arith.constant 0 : index
    %c0_0 = arith.constant 0 : index
    %0 = vector.load %arg1[%c0, %c0_0] : memref<128x16xbf16, #tpu.memory_space<vmem>>, vector<128x16xbf16>
    %c0_1 = arith.constant 0 : index
    %c0_2 = arith.constant 0 : index
    %1 = vector.load %arg2[%c0_1, %c0_2] : memref<16x128xbf16, #tpu.memory_space<vmem>>, vector<16x128xbf16>
    %cst = arith.constant dense<0.000000e+00> : vector<128x128xf32>
    %2 = tpu.matmul %0, %1, %cst {dimension_numbers = #tpu.dot_dimension_numbers<[1], [0], [0], [1], [0, 0, 1, 1], [], []>} : vector<128x16xbf16>, vector<16x128xbf16>, vector<128x128xf32> -> vector<128x128xf32>
    %c0_3 = arith.constant 0 : index
    %c0_4 = arith.constant 0 : index
    %3 = vector.load %arg3[%c0_3, %c0_4] : memref<1x128xf32, #tpu.memory_space<vmem>>, vector<1x128xf32>
    %4 = vector.broadcast %3 : vector<1x128xf32> to vector<128x128xf32>
    %5 = arith.addf %2, %4 : vector<128x128xf32>
    %cst_5 = arith.constant 0.000000e+00 : f32
    %6 = vector.broadcast %cst_5 : f32 to vector<128x128xf32>
    %7 = arith.cmpf ogt, %5, %6 : vector<128x128xf32>
    %cst_6 = arith.constant 2.000000e-01 : f32
    %8 = vector.broadcast %cst_6 : f32 to vector<128x128xf32>
    %9 = arith.mulf %8, %5 : vector<128x128xf32>
    %10 = arith.select %7, %5, %9 : vector<128x128xi1>, vector<128x128xf32>
    %c0_7 = arith.constant 0 : index
    %c0_8 = arith.constant 0 : index
    %11 = vector.load %arg4[%c0_7, %c0_8] : memref<1x128xf32, #tpu.memory_space<vmem>>, vector<1x128xf32>
    %c0_9 = arith.constant 0 : index
    %c0_10 = arith.constant 0 : index
    %12 = vector.load %arg5[%c0_9, %c0_10] : memref<1x128xf32, #tpu.memory_space<vmem>>, vector<1x128xf32>
    %cst_11 = arith.constant dense<0.000000e+00> : vector<128xf32>
    %13 = vector.multi_reduction <add>, %10, %cst_11 [1] : vector<128x128xf32> to vector<128xf32>
    %14 = vector.shape_cast %13 : vector<128xf32> to vector<128x1xf32>
    %cst_12 = arith.constant 1.280000e+02 : f32
    %15 = vector.broadcast %cst_12 : f32 to vector<128x1xf32>
    %16 = arith.divf %14, %15 : vector<128x1xf32>
    %17 = arith.mulf %10, %10 : vector<128x128xf32>
    %cst_13 = arith.constant dense<0.000000e+00> : vector<128xf32>
    %18 = vector.multi_reduction <add>, %17, %cst_13 [1] : vector<128x128xf32> to vector<128xf32>
    %19 = vector.shape_cast %18 : vector<128xf32> to vector<128x1xf32>
    %cst_14 = arith.constant 1.280000e+02 : f32
    %20 = vector.broadcast %cst_14 : f32 to vector<128x1xf32>
    %21 = arith.divf %19, %20 : vector<128x1xf32>
    %22 = arith.mulf %16, %16 : vector<128x1xf32>
    %23 = arith.subf %21, %22 : vector<128x1xf32>
    %cst_15 = arith.constant 0.000000e+00 : f32
    %24 = vector.broadcast %cst_15 : f32 to vector<128x1xf32>
    %25 = arith.maximumf %23, %24 : vector<128x1xf32>
    %26 = vector.broadcast %16 : vector<128x1xf32> to vector<128x128xf32>
    %27 = arith.subf %10, %26 : vector<128x128xf32>
    %cst_16 = arith.constant 9.99999974E-6 : f32
    %28 = vector.broadcast %cst_16 : f32 to vector<128x1xf32>
    %29 = arith.addf %25, %28 : vector<128x1xf32>
    %30 = math.rsqrt %29 : vector<128x1xf32>
    %31 = vector.broadcast %30 : vector<128x1xf32> to vector<128x128xf32>
    %32 = arith.mulf %27, %31 : vector<128x128xf32>
    %33 = vector.broadcast %11 : vector<1x128xf32> to vector<128x128xf32>
    %34 = arith.mulf %32, %33 : vector<128x128xf32>
    %35 = vector.broadcast %12 : vector<1x128xf32> to vector<128x128xf32>
    %36 = arith.addf %34, %35 : vector<128x128xf32>
    %37 = arith.truncf %36 : vector<128x128xf32> to vector<128x128xbf16>
    %c0_17 = arith.constant 0 : index
    %c0_18 = arith.constant 0 : index
    %c0_19 = arith.constant 0 : index
    %38 = vector.load %arg6[%c0_17, %c0_18, %c0_19] : memref<2x128x128xbf16, #tpu.memory_space<vmem>>, vector<1x128x128xbf16>
    %39 = vector.shape_cast %38 : vector<1x128x128xbf16> to vector<128x128xbf16>
    %cst_20 = arith.constant dense<0.000000e+00> : vector<128x128xf32>
    %40 = tpu.matmul %37, %39, %cst_20 {dimension_numbers = #tpu.dot_dimension_numbers<[1], [0], [0], [1], [0, 0, 1, 1], [], []>} : vector<128x128xbf16>, vector<128x128xbf16>, vector<128x128xf32> -> vector<128x128xf32>
    %c0_21 = arith.constant 0 : index
    %c0_22 = arith.constant 0 : index
    %c0_23 = arith.constant 0 : index
    %41 = vector.load %arg7[%c0_21, %c0_22, %c0_23] : memref<2x1x128xf32, #tpu.memory_space<vmem>>, vector<1x1x128xf32>
    %42 = vector.shape_cast %41 : vector<1x1x128xf32> to vector<1x128xf32>
    %43 = vector.broadcast %42 : vector<1x128xf32> to vector<128x128xf32>
    %44 = arith.addf %40, %43 : vector<128x128xf32>
    %cst_24 = arith.constant 0.000000e+00 : f32
    %45 = vector.broadcast %cst_24 : f32 to vector<128x128xf32>
    %46 = arith.maximumf %44, %45 : vector<128x128xf32>
    %47 = arith.truncf %46 : vector<128x128xf32> to vector<128x128xbf16>
    %c0_25 = arith.constant 0 : index
    %c0_26 = arith.constant 0 : index
    %c0_27 = arith.constant 0 : index
    %48 = vector.load %arg8[%c0_25, %c0_26, %c0_27] : memref<2x128x128xbf16, #tpu.memory_space<vmem>>, vector<1x128x128xbf16>
    %49 = vector.shape_cast %48 : vector<1x128x128xbf16> to vector<128x128xbf16>
    %cst_28 = arith.constant dense<0.000000e+00> : vector<128x128xf32>
    %50 = tpu.matmul %47, %49, %cst_28 {dimension_numbers = #tpu.dot_dimension_numbers<[1], [0], [0], [1], [0, 0, 1, 1], [], []>} : vector<128x128xbf16>, vector<128x128xbf16>, vector<128x128xf32> -> vector<128x128xf32>
    %c0_29 = arith.constant 0 : index
    %c0_30 = arith.constant 0 : index
    %c0_31 = arith.constant 0 : index
    %51 = vector.load %arg9[%c0_29, %c0_30, %c0_31] : memref<2x1x128xf32, #tpu.memory_space<vmem>>, vector<1x1x128xf32>
    %52 = vector.shape_cast %51 : vector<1x1x128xf32> to vector<1x128xf32>
    %53 = vector.broadcast %52 : vector<1x128xf32> to vector<128x128xf32>
    %54 = arith.addf %50, %53 : vector<128x128xf32>
    %cst_32 = arith.constant 0.000000e+00 : f32
    %55 = vector.broadcast %cst_32 : f32 to vector<128x128xf32>
    %56 = arith.maximumf %54, %55 : vector<128x128xf32>
    %57 = arith.addf %56, %36 : vector<128x128xf32>
    %c0_33 = arith.constant 0 : index
    %c0_34 = arith.constant 0 : index
    %c0_35 = arith.constant 0 : index
    %58 = vector.load %arg10[%c0_33, %c0_34, %c0_35] : memref<2x1x128xf32, #tpu.memory_space<vmem>>, vector<1x1x128xf32>
    %59 = vector.shape_cast %58 : vector<1x1x128xf32> to vector<1x128xf32>
    %c0_36 = arith.constant 0 : index
    %c0_37 = arith.constant 0 : index
    %c0_38 = arith.constant 0 : index
    %60 = vector.load %arg11[%c0_36, %c0_37, %c0_38] : memref<2x1x128xf32, #tpu.memory_space<vmem>>, vector<1x1x128xf32>
    %61 = vector.shape_cast %60 : vector<1x1x128xf32> to vector<1x128xf32>
    %cst_39 = arith.constant dense<0.000000e+00> : vector<128xf32>
    %62 = vector.multi_reduction <add>, %57, %cst_39 [1] : vector<128x128xf32> to vector<128xf32>
    %63 = vector.shape_cast %62 : vector<128xf32> to vector<128x1xf32>
    %cst_40 = arith.constant 1.280000e+02 : f32
    %64 = vector.broadcast %cst_40 : f32 to vector<128x1xf32>
    %65 = arith.divf %63, %64 : vector<128x1xf32>
    %66 = arith.mulf %57, %57 : vector<128x128xf32>
    %cst_41 = arith.constant dense<0.000000e+00> : vector<128xf32>
    %67 = vector.multi_reduction <add>, %66, %cst_41 [1] : vector<128x128xf32> to vector<128xf32>
    %68 = vector.shape_cast %67 : vector<128xf32> to vector<128x1xf32>
    %cst_42 = arith.constant 1.280000e+02 : f32
    %69 = vector.broadcast %cst_42 : f32 to vector<128x1xf32>
    %70 = arith.divf %68, %69 : vector<128x1xf32>
    %71 = arith.mulf %65, %65 : vector<128x1xf32>
    %72 = arith.subf %70, %71 : vector<128x1xf32>
    %cst_43 = arith.constant 0.000000e+00 : f32
    %73 = vector.broadcast %cst_43 : f32 to vector<128x1xf32>
    %74 = arith.maximumf %72, %73 : vector<128x1xf32>
    %75 = vector.broadcast %65 : vector<128x1xf32> to vector<128x128xf32>
    %76 = arith.subf %57, %75 : vector<128x128xf32>
    %cst_44 = arith.constant 9.99999974E-6 : f32
    %77 = vector.broadcast %cst_44 : f32 to vector<128x1xf32>
    %78 = arith.addf %74, %77 : vector<128x1xf32>
    %79 = math.rsqrt %78 : vector<128x1xf32>
    %80 = vector.broadcast %79 : vector<128x1xf32> to vector<128x128xf32>
    %81 = arith.mulf %76, %80 : vector<128x128xf32>
    %82 = vector.broadcast %59 : vector<1x128xf32> to vector<128x128xf32>
    %83 = arith.mulf %81, %82 : vector<128x128xf32>
    %84 = vector.broadcast %61 : vector<1x128xf32> to vector<128x128xf32>
    %85 = arith.addf %83, %84 : vector<128x128xf32>
    %86 = arith.truncf %85 : vector<128x128xf32> to vector<128x128xbf16>
    %c1 = arith.constant 1 : index
    %c0_45 = arith.constant 0 : index
    %c0_46 = arith.constant 0 : index
    %87 = vector.load %arg6[%c1, %c0_45, %c0_46] : memref<2x128x128xbf16, #tpu.memory_space<vmem>>, vector<1x128x128xbf16>
    %88 = vector.shape_cast %87 : vector<1x128x128xbf16> to vector<128x128xbf16>
    %cst_47 = arith.constant dense<0.000000e+00> : vector<128x128xf32>
    %89 = tpu.matmul %86, %88, %cst_47 {dimension_numbers = #tpu.dot_dimension_numbers<[1], [0], [0], [1], [0, 0, 1, 1], [], []>} : vector<128x128xbf16>, vector<128x128xbf16>, vector<128x128xf32> -> vector<128x128xf32>
    %c1_48 = arith.constant 1 : index
    %c0_49 = arith.constant 0 : index
    %c0_50 = arith.constant 0 : index
    %90 = vector.load %arg7[%c1_48, %c0_49, %c0_50] : memref<2x1x128xf32, #tpu.memory_space<vmem>>, vector<1x1x128xf32>
    %91 = vector.shape_cast %90 : vector<1x1x128xf32> to vector<1x128xf32>
    %92 = vector.broadcast %91 : vector<1x128xf32> to vector<128x128xf32>
    %93 = arith.addf %89, %92 : vector<128x128xf32>
    %cst_51 = arith.constant 0.000000e+00 : f32
    %94 = vector.broadcast %cst_51 : f32 to vector<128x128xf32>
    %95 = arith.maximumf %93, %94 : vector<128x128xf32>
    %96 = arith.truncf %95 : vector<128x128xf32> to vector<128x128xbf16>
    %c1_52 = arith.constant 1 : index
    %c0_53 = arith.constant 0 : index
    %c0_54 = arith.constant 0 : index
    %97 = vector.load %arg8[%c1_52, %c0_53, %c0_54] : memref<2x128x128xbf16, #tpu.memory_space<vmem>>, vector<1x128x128xbf16>
    %98 = vector.shape_cast %97 : vector<1x128x128xbf16> to vector<128x128xbf16>
    %cst_55 = arith.constant dense<0.000000e+00> : vector<128x128xf32>
    %99 = tpu.matmul %96, %98, %cst_55 {dimension_numbers = #tpu.dot_dimension_numbers<[1], [0], [0], [1], [0, 0, 1, 1], [], []>} : vector<128x128xbf16>, vector<128x128xbf16>, vector<128x128xf32> -> vector<128x128xf32>
    %c1_56 = arith.constant 1 : index
    %c0_57 = arith.constant 0 : index
    %c0_58 = arith.constant 0 : index
    %100 = vector.load %arg9[%c1_56, %c0_57, %c0_58] : memref<2x1x128xf32, #tpu.memory_space<vmem>>, vector<1x1x128xf32>
    %101 = vector.shape_cast %100 : vector<1x1x128xf32> to vector<1x128xf32>
    %102 = vector.broadcast %101 : vector<1x128xf32> to vector<128x128xf32>
    %103 = arith.addf %99, %102 : vector<128x128xf32>
    %cst_59 = arith.constant 0.000000e+00 : f32
    %104 = vector.broadcast %cst_59 : f32 to vector<128x128xf32>
    %105 = arith.maximumf %103, %104 : vector<128x128xf32>
    %106 = arith.addf %105, %85 : vector<128x128xf32>
    %c1_60 = arith.constant 1 : index
    %c0_61 = arith.constant 0 : index
    %c0_62 = arith.constant 0 : index
    %107 = vector.load %arg10[%c1_60, %c0_61, %c0_62] : memref<2x1x128xf32, #tpu.memory_space<vmem>>, vector<1x1x128xf32>
    %108 = vector.shape_cast %107 : vector<1x1x128xf32> to vector<1x128xf32>
    %c1_63 = arith.constant 1 : index
    %c0_64 = arith.constant 0 : index
    %c0_65 = arith.constant 0 : index
    %109 = vector.load %arg11[%c1_63, %c0_64, %c0_65] : memref<2x1x128xf32, #tpu.memory_space<vmem>>, vector<1x1x128xf32>
    %110 = vector.shape_cast %109 : vector<1x1x128xf32> to vector<1x128xf32>
    %cst_66 = arith.constant dense<0.000000e+00> : vector<128xf32>
    %111 = vector.multi_reduction <add>, %106, %cst_66 [1] : vector<128x128xf32> to vector<128xf32>
    %112 = vector.shape_cast %111 : vector<128xf32> to vector<128x1xf32>
    %cst_67 = arith.constant 1.280000e+02 : f32
    %113 = vector.broadcast %cst_67 : f32 to vector<128x1xf32>
    %114 = arith.divf %112, %113 : vector<128x1xf32>
    %115 = arith.mulf %106, %106 : vector<128x128xf32>
    %cst_68 = arith.constant dense<0.000000e+00> : vector<128xf32>
    %116 = vector.multi_reduction <add>, %115, %cst_68 [1] : vector<128x128xf32> to vector<128xf32>
    %117 = vector.shape_cast %116 : vector<128xf32> to vector<128x1xf32>
    %cst_69 = arith.constant 1.280000e+02 : f32
    %118 = vector.broadcast %cst_69 : f32 to vector<128x1xf32>
    %119 = arith.divf %117, %118 : vector<128x1xf32>
    %120 = arith.mulf %114, %114 : vector<128x1xf32>
    %121 = arith.subf %119, %120 : vector<128x1xf32>
    %cst_70 = arith.constant 0.000000e+00 : f32
    %122 = vector.broadcast %cst_70 : f32 to vector<128x1xf32>
    %123 = arith.maximumf %121, %122 : vector<128x1xf32>
    %124 = vector.broadcast %114 : vector<128x1xf32> to vector<128x128xf32>
    %125 = arith.subf %106, %124 : vector<128x128xf32>
    %cst_71 = arith.constant 9.99999974E-6 : f32
    %126 = vector.broadcast %cst_71 : f32 to vector<128x1xf32>
    %127 = arith.addf %123, %126 : vector<128x1xf32>
    %128 = math.rsqrt %127 : vector<128x1xf32>
    %129 = vector.broadcast %128 : vector<128x1xf32> to vector<128x128xf32>
    %130 = arith.mulf %125, %129 : vector<128x128xf32>
    %131 = vector.broadcast %108 : vector<1x128xf32> to vector<128x128xf32>
    %132 = arith.mulf %130, %131 : vector<128x128xf32>
    %133 = vector.broadcast %110 : vector<1x128xf32> to vector<128x128xf32>
    %134 = arith.addf %132, %133 : vector<128x128xf32>
    %135 = arith.truncf %134 : vector<128x128xf32> to vector<128x128xbf16>
    %c0_72 = arith.constant 0 : index
    %c0_73 = arith.constant 0 : index
    %136 = vector.load %arg12[%c0_72, %c0_73] : memref<128x16xbf16, #tpu.memory_space<vmem>>, vector<128x16xbf16>
    %cst_74 = arith.constant dense<0.000000e+00> : vector<128x16xf32>
    %137 = tpu.matmul %135, %136, %cst_74 {dimension_numbers = #tpu.dot_dimension_numbers<[1], [0], [0], [1], [0, 0, 1, 1], [], []>} : vector<128x128xbf16>, vector<128x16xbf16>, vector<128x16xf32> -> vector<128x16xf32>
    %c0_75 = arith.constant 0 : index
    %c0_76 = arith.constant 0 : index
    %138 = vector.load %arg13[%c0_75, %c0_76] : memref<1x16xf32, #tpu.memory_space<vmem>>, vector<1x16xf32>
    %139 = vector.broadcast %138 : vector<1x16xf32> to vector<128x16xf32>
    %140 = arith.addf %137, %139 : vector<128x16xf32>
    %141 = math.tanh %140 : vector<128x16xf32>
    %c0_77 = arith.constant 0 : index
    %c0_78 = arith.constant 0 : index
    %142 = vector.load %arg14[%c0_77, %c0_78] : memref<128x16xf32, #tpu.memory_space<vmem>>, vector<128x16xf32>
    tpu.vector_store %arg14[%c0_77, %c0_78], %141 {strides = array<i32>} : memref<128x16xf32, #tpu.memory_space<vmem>>, vector<128x16xf32>,
    return
  }
  func.func @transform_0(%arg0: i32) -> (i32, i32) {
    %c0_i32 = arith.constant 0 : i32
    %c0_i32_0 = arith.constant 0 : i32
    return %arg0, %c0_i32 : i32, i32
  }
  func.func @transform_1(%arg0: i32) -> (i32, i32) {
    %c0_i32 = arith.constant 0 : i32
    %c0_i32_0 = arith.constant 0 : i32
    %c0_i32_1 = arith.constant 0 : i32
    return %c0_i32, %c0_i32_0 : i32, i32
  }
  func.func @transform_2(%arg0: i32) -> (i32, i32) {
    %c0_i32 = arith.constant 0 : i32
    %c0_i32_0 = arith.constant 0 : i32
    %c0_i32_1 = arith.constant 0 : i32
    return %c0_i32, %c0_i32_0 : i32, i32
  }
  func.func @transform_3(%arg0: i32) -> (i32, i32) {
    %c0_i32 = arith.constant 0 : i32
    %c0_i32_0 = arith.constant 0 : i32
    %c0_i32_1 = arith.constant 0 : i32
    return %c0_i32, %c0_i32_0 : i32, i32
  }
  func.func @transform_4(%arg0: i32) -> (i32, i32) {
    %c0_i32 = arith.constant 0 : i32
    %c0_i32_0 = arith.constant 0 : i32
    %c0_i32_1 = arith.constant 0 : i32
    return %c0_i32, %c0_i32_0 : i32, i32
  }
  func.func @transform_5(%arg0: i32) -> (i32, i32, i32) {
    %c0_i32 = arith.constant 0 : i32
    %c0_i32_0 = arith.constant 0 : i32
    %c0_i32_1 = arith.constant 0 : i32
    %c0_i32_2 = arith.constant 0 : i32
    return %c0_i32, %c0_i32_0, %c0_i32_1 : i32, i32, i32
  }
  func.func @transform_6(%arg0: i32) -> (i32, i32, i32) {
    %c0_i32 = arith.constant 0 : i32
    %c0_i32_0 = arith.constant 0 : i32
    %c0_i32_1 = arith.constant 0 : i32
    %c0_i32_2 = arith.constant 0 : i32
    return %c0_i32, %c0_i32_0, %c0_i32_1 : i32, i32, i32
  }
  func.func @transform_7(%arg0: i32) -> (i32, i32, i32) {
    %c0_i32 = arith.constant 0 : i32
    %c0_i32_0 = arith.constant 0 : i32
    %c0_i32_1 = arith.constant 0 : i32
    %c0_i32_2 = arith.constant 0 : i32
    return %c0_i32, %c0_i32_0, %c0_i32_1 : i32, i32, i32
  }
  func.func @transform_8(%arg0: i32) -> (i32, i32, i32) {
    %c0_i32 = arith.constant 0 : i32
    %c0_i32_0 = arith.constant 0 : i32
    %c0_i32_1 = arith.constant 0 : i32
    %c0_i32_2 = arith.constant 0 : i32
    return %c0_i32, %c0_i32_0, %c0_i32_1 : i32, i32, i32
  }
  func.func @transform_9(%arg0: i32) -> (i32, i32, i32) {
    %c0_i32 = arith.constant 0 : i32
    %c0_i32_0 = arith.constant 0 : i32
    %c0_i32_1 = arith.constant 0 : i32
    %c0_i32_2 = arith.constant 0 : i32
    return %c0_i32, %c0_i32_0, %c0_i32_1 : i32, i32, i32
  }
  func.func @transform_10(%arg0: i32) -> (i32, i32, i32) {
    %c0_i32 = arith.constant 0 : i32
    %c0_i32_0 = arith.constant 0 : i32
    %c0_i32_1 = arith.constant 0 : i32
    %c0_i32_2 = arith.constant 0 : i32
    return %c0_i32, %c0_i32_0, %c0_i32_1 : i32, i32, i32
  }
  func.func @transform_11(%arg0: i32) -> (i32, i32) {
    %c0_i32 = arith.constant 0 : i32
    %c0_i32_0 = arith.constant 0 : i32
    %c0_i32_1 = arith.constant 0 : i32
    return %c0_i32, %c0_i32_0 : i32, i32
  }
  func.func @transform_12(%arg0: i32) -> (i32, i32) {
    %c0_i32 = arith.constant 0 : i32
    %c0_i32_0 = arith.constant 0 : i32
    %c0_i32_1 = arith.constant 0 : i32
    return %c0_i32, %c0_i32_0 : i32, i32
  }
  func.func @transform_13(%arg0: i32) -> (i32, i32) {
    %c0_i32 = arith.constant 0 : i32
    %c0_i32_0 = arith.constant 0 : i32
    return %arg0, %c0_i32 : i32, i32
  }
}

</mosaic_0001>

<bundles_post_ra>
// kernel: supervisor_forward.1
= control target key start
LH: loop header
LB: loop body
LE: loop exit
PB: predicated region body
PF: predicated region fallthrough
CT: control target
= control target key end

     0   :  { %s3228_s25 = smov 0   ;;  %s4480_s0 = inlined_call_operand.vmem [shape: bf16[512,16], index: 0, kind: input, shape index: {}]   ;;  %s4481_s1 = inlined_call_operand.vmem [shape: bf16[16,128], index: 1, kind: input, shape index: {}]   ;;  %s4482_s2 = inlined_call_operand.vmem [shape: f32[1,128], index: 2, kind: input, shape index: {}]   ;;  %s4483_s3 = inlined_call_operand.vmem [shape: f32[1,128], index: 3, kind: input, shape index: {}]   ;;  %s4484_s4 = inlined_call_operand.vmem [shape: f32[1,128], index: 4, kind: input, shape index: {}]   ;;  %s4485_s5 = inlined_call_operand.vmem [shape: bf16[2,128,128], index: 5, kind: input, shape index: {}]   ;;  %s4486_s6 = inlined_call_operand.vmem [shape: f32[2,1,128], index: 6, kind: input, shape index: {}]   ;;  %s4487_s7 = inlined_call_operand.vmem [shape: bf16[2,128,128], index: 7, kind: input, shape index: {}]   ;;  %s4488_s8 = inlined_call_operand.vmem [shape: f32[2,1,128], index: 8, kind: input, shape index: {}]   ;;  %s4489_s9 = inlined_call_operand.vmem [shape: f32[2,1,128], index: 9, kind: input, shape index: {}]   ;;  %s4490_s10 = inlined_call_operand.vmem [shape: f32[2,1,128], index: 10, kind: input, shape index: {}]   ;;  %s4491_s11 = inlined_call_operand.vmem [shape: bf16[128,16], index: 11, kind: input, shape index: {}]   ;;  %s4492_s12 = inlined_call_operand.vmem [shape: f32[1,16], index: 12, kind: input, shape index: {}]   ;;  %s4493_s13 = inlined_call_operand.vmem [shape: f32[512,16], index: 13, kind: output, shape index: {}]  }
   0x1 LB: > { %s2681_s26 = sadd.s32 4294967295, %s3155_s25   ;;  %p2685_p0 = scmp.ge.s32.totalorder %s3155_s25, 1  ;;  %s3155_s25 = sphi %s3228_s25, %s23_s25  }
   0x2   : > { %p388_p1 = scmp.lt.s32.totalorder %s3155_s25, 5 }
   0x4   : > { %p389_p2 = pnand %p2685_p0, %p388_p1 }
   0x5   : > { %s2686_s29 = sshll.u32 (!%p389_p2), %s2681_s26, 4 }
   0x6   : > { %392 = sbr.rel (%p389_p2) target bundleno = 1445 (0x5a5), region = 72  ;;  %p433_p3 = scmp.lt.s32.totalorder (!%p389_p2), %s2686_s29, 63 }
   0xb   : > { %v2940_v0 = vld [vmem:[%s4481_s1] sm:$0xff]  ;;  %s4503_s29 = smov (!%p433_p3, %s2686_s29), 63  ;;  %vm513_vm0 = vcmask 130048  }
   0xc   : > { %545 = vmatpush.bf16.msra.mxu0 %v2940_v0  ;;  %2981 = vmatpush.bf16.msra.mxu3 %v2940_v0  ;;  %s2687_s30 = sshll.u32 %s4503_s29, 2  ;;  %v3256_v9 = vld [vmem:[%s4482_s2] ss:$0 sm:$0xff] }
   0xd   : > { %s436_s16 = scalar_lea.vmem %s4480_s0, %s2687_s30 }
   0xe   : > { %v2932_v1 = vld [vmem:[%s436_s16] sm:$0xff]  ;;  %v2933_v2 = vld [vmem:[%s436_s16 + $0x8] sm:$0xff]  ;;  %v2934_v4 = vld [vmem:[%s436_s16 + $0x10] sm:$0xff] }
   0xf   : > { %2726 = vmatmul.msk.bf16.vlgmr.msra.gmra.mxu0 %vm513_vm0, %v2932_v1  ;;  %v2937_v3 = vld [vmem:[%s436_s16 + $0x28] sm:$0xff]  ;;  %v2938_v5 = vld [vmem:[%s436_s16 + $0x30] sm:$0xff]  ;;  %v2935_v6 = vld [vmem:[%s436_s16 + $0x18] sm:$0xff] }
  0x10   : > { %2731 = vmatmul.msk.bf16.vlgmr.msra.gmra.mxu3 %vm513_vm0, %v2937_v3  ;;  %v2939_v7 = vld [vmem:[%s436_s16 + $0x38] sm:$0xff]  ;;  %v2936_v8 = vld [vmem:[%s436_s16 + $0x20] sm:$0xff]  ;;  %s2689_s16 = sshll.u32 %s4503_s29, 3 }
  0x11   : > { %s4428_s19 = scalar_lea.vmem %s4493_s13, %s2689_s16 }
  0x1f   : > { %2727 = vmatmul.msk.bf16.gmra.mxu0 %vm513_vm0, %v2933_v2 }
  0x20   : > { %2732 = vmatmul.msk.bf16.gmra.mxu3 %vm513_vm0, %v2938_v5 }
  0x2f   : > { %2728 = vmatmul.msk.bf16.gmra.mxu0 %vm513_vm0, %v2934_v4 }
  0x30   : > { %2733 = vmatmul.msk.bf16.gmra.mxu3 %vm513_vm0, %v2939_v7 }
  0x3f   : > { %2729 = vmatmul.msk.bf16.gmra.mxu0 %vm513_vm0, %v2935_v6 }
  0x4f   : > { %2730 = vmatmul.msk.bf16.gmra.mxu0 %vm513_vm0, %v2936_v8 }
  0x8c   : > { %v547_v10 = vpop.f32.mrf.mxu0 }
  0x8d   : > { %v548_v11 = vadd.f32 %v3256_v9, %v547_v10 }
  0x8f   : > { %v603_v12 = vmul.f32 0.2, %v548_v11  ;;  %vm587_vm1 = vcmp.gt.f32.partialorder %v548_v11, 0.0 }
  0x91   : > { %v3259_v13 = vsel %vm587_vm1, %v548_v11, %v603_v12 }
  0x92   : > { %637 = vadd.xlane.f32.xlu0 %v3259_v13  ;;  %v692_v14 = vmul.f32 %v3259_v13, %v3259_v13 }
  0x93   : > { %v572_v38 = vpop.f32.mrf.mxu3 }
  0x94   : > { %v549_v15 = vpop.f32.mrf.mxu0  ;;  %708 = vadd.xlane.f32.xlu1 %v692_v14  ;;  %v573_v63 = vadd.f32 %v3256_v9, %v572_v38 }
  0x95   : > { %v550_v16 = vadd.f32 %v3256_v9, %v549_v15 }
  0x96   : > { %v613_v5 = vmul.f32 0.2, %v573_v63  ;;  %vm597_vm12 = vcmp.gt.f32.partialorder %v573_v63, 0.0 }
  0x97   : > { %vm588_vm2 = vcmp.gt.f32.partialorder %v550_v16, 0.0  ;;  %v604_v17 = vmul.f32 0.2, %v550_v16 }
  0x98   : > { %v3325_v8 = vsel %vm597_vm12, %v573_v63, %v613_v5 }
  0x99   : > { %v3265_v18 = vsel %vm588_vm2, %v550_v16, %v604_v17  ;;  %v702_v14 = vmul.f32 %v3325_v8, %v3325_v8 }
  0x9a   : > { %639 = vadd.xlane.f32.xlu0 %v3265_v18  ;;  %v693_v19 = vmul.f32 %v3265_v18, %v3265_v18 }
  0x9b   : > { %v574_v46 = vpop.f32.mrf.mxu3 }
  0x9c   : > { %v552_v20 = vpop.f32.mrf.mxu0  ;;  %710 = vadd.xlane.f32.xlu1 %v693_v19  ;;  %v575_v57 = vadd.f32 %v3256_v9, %v574_v46 }
  0x9d   : > { %v553_v21 = vadd.f32 %v3256_v9, %v552_v20 }
  0x9e   : > { %v614_v61 = vmul.f32 0.2, %v575_v57  ;;  %vm598_vm10 = vcmp.gt.f32.partialorder %v575_v57, 0.0 }
  0x9f   : > { %v605_v22 = vmul.f32 0.2, %v553_v21  ;;  %vm589_vm3 = vcmp.gt.f32.partialorder %v553_v21, 0.0 }
  0xa0   : > { %v3318_v3 = vsel %vm598_vm10, %v575_v57, %v614_v61 }
  0xa1   : > { %v3271_v23 = vsel %vm589_vm3, %v553_v21, %v605_v22  ;;  %v703_v17 = vmul.f32 %v3318_v3, %v3318_v3  ;;  %v3157_v22 = vmov 128.0  }
  0xa2   : > { %641 = vadd.xlane.f32.xlu2 %v3271_v23  ;;  %v694_v24 = vmul.f32 %v3271_v23, %v3271_v23  ;;  %3019 = vrcp.f32 %v3157_v22 }
  0xa3   : > { %v577_v53 = vpop.f32.mrf.mxu3 }
  0xa4   : > { %v554_v25 = vpop.f32.mrf.mxu0  ;;  %712 = vadd.xlane.f32.xlu0 %v694_v24  ;;  %v578_v2 = vadd.f32 %v3256_v9, %v577_v53  ;;  %v2942_v53 = vld [vmem:[%s4485_s5 + $0x8] sm:$0xff] }
  0xa5   : > { %v555_v26 = vadd.f32 %v3256_v9, %v554_v25 }
  0xa6   : > { %v615_v6 = vmul.f32 0.2, %v578_v2  ;;  %vm599_vm13 = vcmp.gt.f32.partialorder %v578_v2, 0.0 }
  0xa7   : > { %v606_v27 = vmul.f32 0.2, %v555_v26  ;;  %vm590_vm4 = vcmp.gt.f32.partialorder %v555_v26, 0.0 }
  0xa8   : > { %v3327_v12 = vsel %vm599_vm13, %v578_v2, %v615_v6 }
  0xa9   : > { %v3277_v28 = vsel %vm590_vm4, %v555_v26, %v606_v27  ;;  %v704_v26 = vmul.f32 %v3327_v12, %v3327_v12  ;;  %v3020_v27 = vpop.eup %3019 }
  0xaa   : > { %643 = vadd.xlane.f32.xlu2 %v3277_v28  ;;  %v695_v29 = vmul.f32 %v3277_v28, %v3277_v28  ;;  %vm674_vm2 = vweird.f32 %v3020_v27 }
  0xab   : > { %v579_v62 = vpop.f32.mrf.mxu3 }
  0xac   : > { %v557_v30 = vpop.f32.mrf.mxu0  ;;  %714 = vadd.xlane.f32.xlu1 %v695_v29  ;;  %v580_v7 = vadd.f32 %v3256_v9, %v579_v62 }
  0xad   : > { %v558_v31 = vadd.f32 %v3256_v9, %v557_v30 }
  0xae   : > { %v616_v11 = vmul.f32 0.2, %v580_v7  ;;  %vm600_vm14 = vcmp.gt.f32.partialorder %v580_v7, 0.0 }
  0xaf   : > { %v607_v32 = vmul.f32 0.2, %v558_v31  ;;  %vm591_vm5 = vcmp.gt.f32.partialorder %v558_v31, 0.0 }
  0xb0   : > { %v3334_v16 = vsel %vm600_vm14, %v580_v7, %v616_v11 }
  0xb1   : > { %v3283_v33 = vsel %vm591_vm5, %v558_v31, %v607_v32  ;;  %v705_v19 = vmul.f32 %v3334_v16, %v3334_v16  ;;  %v2948_v31 = vld [vmem:[%s4485_s5 + $0x38] sm:$0xff]  ;;  %v670_v32 = vmul.f32 128.0, %v3020_v27 }
  0xb2   : > { %645 = vadd.xlane.f32.xlu2 %v3283_v33  ;;  %v696_v34 = vmul.f32 %v3283_v33, %v3283_v33  ;;  %1126 = vmatpush.bf16.msra.mxu1 %v2948_v31 }
  0xb3   : > { %v582_v10 = vpop.f32.mrf.mxu3  ;;  %2982 = vmatpush.bf16.msra.mxu2 %v2948_v31  ;;  %2983 = vmatpush.bf16.msrb.mxu3 %v2948_v31 }
  0xb4   : > { %v559_v35 = vpop.f32.mrf.mxu0  ;;  %716 = vadd.xlane.f32.xlu1 %v696_v34  ;;  %v583_v15 = vadd.f32 %v3256_v9, %v582_v10  ;;  %v2947_v34 = vld [vmem:[%s4485_s5 + $0x30] sm:$0xff] }
  0xb5   : > { %v560_v36 = vadd.f32 %v3256_v9, %v559_v35  ;;  %v671_v35 = vsub.f32 1.0, %v670_v32 }
  0xb6   : > { %v617_v20 = vmul.f32 0.2, %v583_v15  ;;  %vm601_vm15 = vcmp.gt.f32.partialorder %v583_v15, 0.0  ;;  %1127 = vmatpush.bf16.msra.mxu1 %v2947_v34 }
  0xb7   : > { %v608_v37 = vmul.f32 0.2, %v560_v36  ;;  %vm592_vm6 = vcmp.gt.f32.partialorder %v560_v36, 0.0  ;;  %2984 = vmatpush.bf16.msra.mxu2 %v2947_v34  ;;  %2985 = vmatpush.bf16.msrb.mxu3 %v2947_v34  ;;  %v672_v38 = vmul.f32 %v3020_v27, %v671_v35 }
  0xb8   : > { %v3342_v25 = vsel %vm601_vm15, %v583_v15, %v617_v20 }
  0xb9   : > { %v3289_v39 = vsel %vm592_vm6, %v560_v36, %v608_v37  ;;  %v706_v29 = vmul.f32 %v3342_v25, %v3342_v25  ;;  %v2946_v37 = vld [vmem:[%s4485_s5 + $0x28] sm:$0xff] }
  0xba   : > { %647 = vadd.xlane.f32.xlu0 %v3289_v39  ;;  %v697_v40 = vmul.f32 %v3289_v39, %v3289_v39  ;;  %1128 = vmatpush.bf16.msra.mxu1 %v2946_v37 }
  0xbb   : > { %v584_v21 = vpop.f32.mrf.mxu3  ;;  %2986 = vmatpush.bf16.msra.mxu2 %v2946_v37  ;;  %2987 = vmatpush.bf16.msrb.mxu3 %v2946_v37 }
  0xbc   : > { %v562_v41 = vpop.f32.mrf.mxu0  ;;  %718 = vadd.xlane.f32.xlu2 %v697_v40  ;;  %v585_v24 = vadd.f32 %v3256_v9, %v584_v21  ;;  %v2945_v40 = vld [vmem:[%s4485_s5 + $0x20] sm:$0xff] }
  0xbd   : > { %v563_v42 = vadd.f32 %v3256_v9, %v562_v41  ;;  %v673_v41 = vadd.f32 %v3020_v27, %v672_v38 }
  0xbe   : > { %v618_v30 = vmul.f32 0.2, %v585_v24  ;;  %vm602_vm1 = vcmp.gt.f32.partialorder %v585_v24, 0.0  ;;  %1129 = vmatpush.bf16.msra.mxu1 %v2945_v40 }
  0xbf   : > { %v609_v43 = vmul.f32 0.2, %v563_v42  ;;  %vm593_vm7 = vcmp.gt.f32.partialorder %v563_v42, 0.0  ;;  %2988 = vmatpush.bf16.msra.mxu2 %v2945_v40  ;;  %2989 = vmatpush.bf16.msrb.mxu3 %v2945_v40 }
  0xc1   : > { %v3295_v44 = vsel %vm593_vm7, %v563_v42, %v609_v43  ;;  %v2944_v42 = vld [vmem:[%s4485_s5 + $0x18] sm:$0xff]  ;;  %v3369_v43 = vsel %vm674_vm2, %v3020_v27, %v673_v41 }
  0xc2   : > { %649 = vadd.xlane.f32.xlu0 %v3295_v44  ;;  %v698_v45 = vmul.f32 %v3295_v44, %v3295_v44  ;;  %1130 = vmatpush.bf16.msra.mxu1 %v2944_v42 }
  0xc3   : > { %2990 = vmatpush.bf16.msra.mxu2 %v2944_v42  ;;  %2991 = vmatpush.bf16.msrb.mxu3 %v2944_v42 }
  0xc4   : > { %v564_v47 = vpop.f32.mrf.mxu0  ;;  %720 = vadd.xlane.f32.xlu2 %v698_v45 }
  0xc5   : > { %v565_v48 = vadd.f32 %v3256_v9, %v564_v47  ;;  %v2943_v47 = vld [vmem:[%s4485_s5 + $0x10] sm:$0xff] }
  0xc6   : > { %1131 = vmatpush.bf16.msra.mxu1 %v2943_v47 }
  0xc7   : > { %v610_v49 = vmul.f32 0.2, %v565_v48  ;;  %vm594_vm8 = vcmp.gt.f32.partialorder %v565_v48, 0.0  ;;  %2992 = vmatpush.bf16.msra.mxu2 %v2943_v47  ;;  %2993 = vmatpush.bf16.msrb.mxu3 %v2943_v47 }
  0xc9   : > { %v3301_v50 = vsel %vm594_vm8, %v565_v48, %v610_v49 }
  0xca   : > { %651 = vadd.xlane.f32.xlu1 %v3301_v50  ;;  %v699_v51 = vmul.f32 %v3301_v50, %v3301_v50  ;;  %1132 = vmatpush.bf16.msra.mxu1 %v2942_v53 }
  0xcb   : > { %2994 = vmatpush.bf16.msra.mxu2 %v2942_v53  ;;  %2995 = vmatpush.bf16.msrb.mxu3 %v2942_v53 }
  0xcc   : > { %v567_v52 = vpop.f32.mrf.mxu0  ;;  %722 = vadd.xlane.f32.xlu0 %v699_v51 }
  0xcd   : > { %v568_v54 = vadd.f32 %v3256_v9, %v567_v52 }
  0xcf   : > { %v611_v55 = vmul.f32 0.2, %v568_v54  ;;  %vm595_vm9 = vcmp.gt.f32.partialorder %v568_v54, 0.0 }
  0xd1   : > { %v3307_v56 = vsel %vm595_vm9, %v568_v54, %v611_v55 }
  0xd2   : > { %653 = vadd.xlane.f32.xlu1 %v3307_v56  ;;  %v700_v58 = vmul.f32 %v3307_v56, %v3307_v56 }
  0xd4   : > { %v569_v59 = vpop.f32.mrf.mxu0  ;;  %724 = vadd.xlane.f32.xlu0 %v700_v58 }
  0xd5   : > { %v570_v60 = vadd.f32 %v3256_v9, %v569_v59  ;;  %v3352_v9 = vsel %vm602_vm1, %v585_v24, %v618_v30  ;;  %v2941_v59 = vld [vmem:[%s4485_s5] sm:$0xff] }
  0xd6   : > { %v707_v36 = vmul.f32 %v3352_v9, %v3352_v9  ;;  %1133 = vmatpush.bf16.msra.mxu1 %v2941_v59  ;;  %2996 = vmatpush.bf16.msra.mxu2 %v2941_v59 }
  0xd7   : > { %v612_v0 = vmul.f32 0.2, %v570_v60  ;;  %vm596_vm11 = vcmp.gt.f32.partialorder %v570_v60, 0.0  ;;  %2997 = vmatpush.bf16.msrb.mxu3 %v2941_v59 }
  0xd9   : > { %v3315_v1 = vsel %vm596_vm11, %v570_v60, %v612_v0 }
  0xda   : > { %655 = vadd.xlane.f32.xlu2 %v3315_v1  ;;  %v701_v4 = vmul.f32 %v3315_v1, %v3315_v1 }
  0xdc   : > { %659 = vadd.xlane.f32.xlu0 %v3318_v3  ;;  %726 = vadd.xlane.f32.xlu1 %v701_v4 }
  0xe2   : > { %657 = vadd.xlane.f32.xlu2 %v3325_v8 }
  0xe4   : > { %661 = vadd.xlane.f32.xlu0 %v3327_v12  ;;  %728 = vadd.xlane.f32.xlu1 %v702_v14 }
  0xea   : > { %730 = vadd.xlane.f32.xlu2 %v703_v17 }
  0xec   : > { %663 = vadd.xlane.f32.xlu1 %v3334_v16  ;;  %734 = vadd.xlane.f32.xlu0 %v705_v19 }
  0xf2   : > { %732 = vadd.xlane.f32.xlu2 %v704_v26 }
  0xf4   : > { %665 = vadd.xlane.f32.xlu1 %v3342_v25  ;;  %736 = vadd.xlane.f32.xlu0 %v706_v29 }
  0xfa   : > { %667 = vadd.xlane.f32.xlu2 %v3352_v9 }
  0xfc   : > { %738 = vadd.xlane.f32.xlu1 %v707_v36 }
 0x105   : > { %v638_v45 = vpop.xlane.xlu0 %637 }
 0x106   : > { %v3372_v46 = vmul.f32 %v3369_v43, %v638_v45 }
 0x107   : > { %v709_v48 = vpop.xlane.xlu1 %708 }
 0x108   : > { %v756_v49 = vmul.f32 %v3372_v46, %v3372_v46  ;;  %v740_v51 = vmul.f32 %v709_v48, %v3369_v43  ;;  %v804_v40 = vsub.f32 %v3259_v13, %v3372_v46 }
 0x10a   : > { %v772_v52 = vsub.f32 %v740_v51, %v756_v49 }
 0x10c   : > { %v788_v54 = vmax.f32 %v772_v52, 0.0 }
 0x10d   : > { %v640_v55 = vpop.xlane.xlu0 %639 }
 0x10e   : > { %v820_v57 = vadd.f32 1e-05, %v788_v54  ;;  %v3384_v58 = vmul.f32 %v3369_v43, %v640_v55  ;;  %v3412_v54 = vld [vmem:[%s4483_s3] ss:$0 sm:$0xff] }
 0x10f   : > { %v711_v60 = vpop.xlane.xlu1 %710 }
 0x110   : > { %3021 = vrsqrt.f32 %v820_v57  ;;  %v757_v61 = vmul.f32 %v3384_v58, %v3384_v58  ;;  %v741_v62 = vmul.f32 %v711_v60, %v3369_v43  ;;  %vm842_vm4 = vweird.f32 %v820_v57 }
 0x112   : > { %v773_v63 = vsub.f32 %v741_v62, %v757_v61 }
 0x114   : > { %v789_v0 = vmax.f32 %v773_v63, 0.0 }
 0x115   : > { %v642_v2 = vpop.xlane.xlu2 %641 }
 0x116   : > { %v3022_v4 = vpop.eup %3021  ;;  %v3393_v5 = vmul.f32 %v3369_v43, %v642_v2  ;;  %v821_v7 = vadd.f32 1e-05, %v789_v0  ;;  %v3423_v2 = vld [vmem:[%s4484_s4] ss:$0 sm:$0xff] }
 0x117   : > { %v837_v6 = vmul.f32 %v3022_v4, %v820_v57  ;;  %v713_v10 = vpop.xlane.xlu0 %712  ;;  %vm843_vm3 = vweird.f32 %v3022_v4  ;;  %v805_v57 = vsub.f32 %v3265_v18, %v3384_v58 }
 0x118   : > { %v758_v11 = vmul.f32 %v3393_v5, %v3393_v5  ;;  %v742_v14 = vmul.f32 %v713_v10, %v3369_v43  ;;  %3023 = vrsqrt.f32 %v821_v7  ;;  %vm844_vm5 = vmor %vm842_vm4, %vm843_vm3  ;;  %vm852_vm7 = vweird.f32 %v821_v7 }
 0x119   : > { %v838_v15 = vmul.f32 %v3022_v4, %v837_v6 }
 0x11a   : > { %v774_v17 = vsub.f32 %v742_v14, %v758_v11 }
 0x11b   : > { %v839_v19 = vmul.f32 0.5, %v838_v15 }
 0x11c   : > { %v790_v20 = vmax.f32 %v774_v17, 0.0 }
 0x11d   : > { %v840_v21 = vsub.f32 1.5, %v839_v19  ;;  %v644_v22 = vpop.xlane.xlu2 %643 }
 0x11e   : > { %v822_v24 = vadd.f32 1e-05, %v790_v20  ;;  %v3399_v26 = vmul.f32 %v3369_v43, %v644_v22  ;;  %v3024_v27 = vpop.eup %3023 }
 0x11f   : > { %v715_v29 = vpop.xlane.xlu1 %714  ;;  %v847_v30 = vmul.f32 %v3024_v27, %v821_v7  ;;  %v841_v31 = vmul.f32 %v3022_v4, %v840_v21  ;;  %vm853_vm6 = vweird.f32 %v3024_v27 }
 0x120   : > { %3025 = vrsqrt.f32 %v822_v24  ;;  %v759_v32 = vmul.f32 %v3399_v26, %v3399_v26  ;;  %v743_v34 = vmul.f32 %v715_v29, %v3369_v43  ;;  %vm854_vm8 = vmor %vm852_vm7, %vm853_vm6  ;;  %vm862_vm10 = vweird.f32 %v822_v24 }
 0x121   : > { %v848_v35 = vmul.f32 %v3024_v27, %v847_v30  ;;  %v845_v38 = vsel %vm844_vm5, %v3022_v4, %v841_v31 }
 0x122   : > { %v775_v36 = vsub.f32 %v743_v34, %v759_v32  ;;  %v996_v53 = vmul.f32 %v845_v38, %v804_v40  ;;  %v806_v34 = vsub.f32 %v3271_v23, %v3393_v5  ;;  %v807_v5 = vsub.f32 %v3277_v28, %v3399_v26 }
 0x123   : > { %v849_v37 = vmul.f32 0.5, %v848_v35 }
 0x124   : > { %v791_v41 = vmax.f32 %v775_v36, 0.0  ;;  %v1015_v0 = vmul.f32 %v3412_v54, %v996_v53 }
 0x125   : > { %v646_v42 = vpop.xlane.xlu2 %645  ;;  %v850_v47 = vsub.f32 1.5, %v849_v37 }
 0x126   : > { %v3026_v45 = vpop.eup %3025  ;;  %v3407_v48 = vmul.f32 %v3369_v43, %v646_v42  ;;  %v823_v51 = vadd.f32 1e-05, %v791_v41  ;;  %v3432_v15 = vadd.f32 %v3423_v2, %v1015_v0 }
 0x127   : > { %v857_v49 = vmul.f32 %v3026_v45, %v822_v24  ;;  %v717_v52 = vpop.xlane.xlu1 %716  ;;  %v851_v55 = vmul.f32 %v3024_v27, %v850_v47  ;;  %vm863_vm9 = vweird.f32 %v3026_v45 }
 0x128   : > { %v760_v13 = vmul.f32 %v3407_v48, %v3407_v48  ;;  %v744_v46 = vmul.f32 %v717_v52, %v3369_v43  ;;  %3027 = vrsqrt.f32 %v823_v51  ;;  %vm864_vm11 = vmor %vm862_vm10, %vm863_vm9  ;;  %vm872_vm13 = vweird.f32 %v823_v51 }
 0x129   : > { %v858_v59 = vmul.f32 %v3026_v45, %v857_v49  ;;  %v855_v61 = vsel %vm854_vm8, %v3024_v27, %v851_v55 }
 0x12a   : > { %v776_v60 = vsub.f32 %v744_v46, %v760_v13  ;;  %v997_v63 = vmul.f32 %v855_v61, %v805_v57 }
 0x12b   : > { %v859_v62 = vmul.f32 0.5, %v858_v59 }
 0x12c   : > { %v792_v4 = vmax.f32 %v776_v60, 0.0  ;;  %v1016_v10 = vmul.f32 %v3412_v54, %v997_v63 }
 0x12d   : > { %v860_v6 = vsub.f32 1.5, %v859_v62  ;;  %v648_v7 = vpop.xlane.xlu0 %647 }
 0x12e   : > { %v3426_v18 = vadd.f32 1e-05, %v792_v4  ;;  %v3429_v58 = vmul.f32 %v3369_v43, %v648_v7  ;;  %v3028_v11 = vpop.eup %3027  ;;  %v3435_v17 = vadd.f32 %v3423_v2, %v1016_v10 }
 0x12f   : > { %v719_v14 = vpop.xlane.xlu2 %718  ;;  %v867_v19 = vmul.f32 %v3028_v11, %v823_v51  ;;  %v861_v20 = vmul.f32 %v3026_v45, %v860_v6  ;;  %vm873_vm12 = vweird.f32 %v3028_v11 }
 0x130   : > { %3029 = vrsqrt.f32 %v3426_v18  ;;  %v761_v21 = vmul.f32 %v3429_v58, %v3429_v58  ;;  %v745_v22 = vmul.f32 %v719_v14, %v3369_v43  ;;  %v1050_v27 = vpack.c.bf16 %v3435_v17, %v3432_v15  ;;  %vm874_vm14 = vmor %vm872_vm13, %vm873_vm12 }
 0x131   : > { %v868_v29 = vmul.f32 %v3028_v11, %v867_v19  ;;  %v865_v32 = vsel %vm864_vm11, %v3026_v45, %v861_v20  ;;  %vm882_vm1 = vweird.f32 %v3426_v18 }
 0x132   : > { %v777_v30 = vsub.f32 %v745_v22, %v761_v21  ;;  %1134 = vmatmul.bf16.vlgmr.msra.gmra.mxu1 %v1050_v27  ;;  %v998_v47 = vmul.f32 %v865_v32, %v806_v34  ;;  %v808_v32 = vsub.f32 %v3283_v33, %v3407_v48  ;;  %v809_v33 = vsub.f32 %v3289_v39, %v3429_v58 }
 0x133   : > { %v869_v31 = vmul.f32 0.5, %v868_v29 }
 0x134   : > { %v793_v35 = vmax.f32 %v777_v30, 0.0  ;;  %v1017_v57 = vmul.f32 %v3412_v54, %v998_v47 }
 0x135   : > { %v650_v36 = vpop.xlane.xlu0 %649  ;;  %v870_v38 = vsub.f32 1.5, %v869_v31 }
 0x136   : > { %v3030_v37 = vpop.eup %3029  ;;  %v3446_v40 = vmul.f32 %v3369_v43, %v650_v36  ;;  %v825_v24 = vadd.f32 1e-05, %v793_v35  ;;  %v3462_v0 = vadd.f32 %v3423_v2, %v1017_v57 }
 0x137   : > { %v877_v41 = vmul.f32 %v3030_v37, %v3426_v18  ;;  %v721_v42 = vpop.xlane.xlu2 %720  ;;  %v871_v23 = vmul.f32 %v3028_v11, %v870_v38  ;;  %vm883_vm15 = vweird.f32 %v3030_v37 }
 0x138   : > { %v762_v45 = vmul.f32 %v3446_v40, %v3446_v40  ;;  %v746_v49 = vmul.f32 %v721_v42, %v3369_v43  ;;  %3031 = vrsqrt.f32 %v825_v24  ;;  %vm3474_vm2 = vmor %vm882_vm1, %vm883_vm15  ;;  %vm892_vm4 = vweird.f32 %v825_v24 }
 0x139   : > { %v878_v52 = vmul.f32 %v3030_v37, %v877_v41  ;;  %v875_v13 = vsel %vm874_vm14, %v3028_v11, %v871_v23 }
 0x13a   : > { %v778_v53 = vsub.f32 %v746_v49, %v762_v45  ;;  %v999_v55 = vmul.f32 %v875_v13, %v807_v5 }
 0x13b   : > { %v879_v46 = vmul.f32 0.5, %v878_v52 }
 0x13c   : > { %v794_v59 = vmax.f32 %v778_v53, 0.0  ;;  %v1018_v61 = vmul.f32 %v3412_v54, %v999_v55 }
 0x13d   : > { %v880_v51 = vsub.f32 1.5, %v879_v46  ;;  %v652_v60 = vpop.xlane.xlu1 %651 }
 0x13e   : > { %v3456_v62 = vadd.f32 1e-05, %v794_v59  ;;  %v3459_v63 = vmul.f32 %v3369_v43, %v652_v60  ;;  %v3032_v28 = vpop.eup %3031  ;;  %v3465_v4 = vadd.f32 %v3423_v2, %v1018_v61 }
 0x13f   : > { %v723_v26 = vpop.xlane.xlu0 %722  ;;  %v887_v6 = vmul.f32 %v3032_v28, %v825_v24  ;;  %v881_v14 = vmul.f32 %v3030_v37, %v880_v51  ;;  %vm893_vm3 = vweird.f32 %v3032_v28 }
 0x140   : > { %3033 = vrsqrt.f32 %v3456_v62  ;;  %v763_v7 = vmul.f32 %v3459_v63, %v3459_v63  ;;  %v747_v10 = vmul.f32 %v723_v26, %v3369_v43  ;;  %v1051_v11 = vpack.c.bf16 %v3465_v4, %v3462_v0  ;;  %vm894_vm5 = vmor %vm892_vm4, %vm893_vm3 }
 0x141   : > { %v888_v19 = vmul.f32 %v3032_v28, %v887_v6  ;;  %v885_v30 = vsel %vm3474_vm2, %v3030_v37, %v881_v14  ;;  %vm902_vm7 = vweird.f32 %v3456_v62 }
 0x142   : > { %v779_v20 = vsub.f32 %v747_v10, %v763_v7  ;;  %1139 = vmatmul.bf16.gmra.mxu1 %v1051_v11  ;;  %v1000_v47 = vmul.f32 %v885_v30, %v808_v32 }
 0x143   : > { %v889_v22 = vmul.f32 0.5, %v888_v19 }
 0x144   : > { %v795_v27 = vmax.f32 %v779_v20, 0.0  ;;  %v1019_v52 = vmul.f32 %v3412_v54, %v1000_v47 }
 0x145   : > { %v654_v29 = vpop.xlane.xlu1 %653  ;;  %v890_v34 = vsub.f32 1.5, %v889_v22 }
 0x146   : > { %v3034_v31 = vpop.eup %3033  ;;  %v3483_v18 = vmul.f32 %v3369_v43, %v654_v29  ;;  %v827_v36 = vadd.f32 1e-05, %v795_v27  ;;  %v3503_v61 = vadd.f32 %v3423_v2, %v1019_v52  ;;  %v810_v29 = vsub.f32 %v3295_v44, %v3446_v40 }
 0x147   : > { %v897_v35 = vmul.f32 %v3034_v31, %v3456_v62  ;;  %v725_v38 = vpop.xlane.xlu0 %724  ;;  %v891_v37 = vmul.f32 %v3032_v28, %v890_v34  ;;  %vm903_vm6 = vweird.f32 %v3034_v31 }
 0x148   : > { %v764_v41 = vmul.f32 %v3483_v18, %v3483_v18  ;;  %v748_v42 = vmul.f32 %v725_v38, %v3369_v43  ;;  %3035 = vrsqrt.f32 %v827_v36  ;;  %vm3511_vm8 = vmor %vm902_vm7, %vm903_vm6  ;;  %vm912_vm10 = vweird.f32 %v827_v36 }
 0x149   : > { %v898_v48 = vmul.f32 %v3034_v31, %v897_v35  ;;  %v895_v49 = vsel %vm894_vm5, %v3032_v28, %v891_v37  ;;  %v811_v37 = vsub.f32 %v3301_v50, %v3459_v63 }
 0x14a   : > { %v780_v45 = vsub.f32 %v748_v42, %v764_v41  ;;  %v1001_v23 = vmul.f32 %v895_v49, %v809_v33 }
 0x14b   : > { %v899_v24 = vmul.f32 0.5, %v898_v48 }
 0x14c   : > { %v796_v5 = vmax.f32 %v780_v45, 0.0  ;;  %v1020_v46 = vmul.f32 %v3412_v54, %v1001_v23 }
 0x14d   : > { %v900_v53 = vsub.f32 1.5, %v899_v24  ;;  %v656_v13 = vpop.xlane.xlu2 %655 }
 0x14e   : > { %v3493_v55 = vadd.f32 1e-05, %v796_v5  ;;  %v3496_v57 = vmul.f32 %v3369_v43, %v656_v13  ;;  %v3036_v39 = vpop.eup %3035  ;;  %v3499_v51 = vadd.f32 %v3423_v2, %v1020_v46 }
 0x14f   : > { %v660_v58 = vpop.xlane.xlu0 %659  ;;  %v727_v59 = vpop.xlane.xlu1 %726  ;;  %v907_v60 = vmul.f32 %v3036_v39, %v827_v36  ;;  %v901_v6 = vmul.f32 %v3034_v31, %v900_v53  ;;  %vm913_vm9 = vweird.f32 %v3036_v39 }
 0x150   : > { %3037 = vrsqrt.f32 %v3493_v55  ;;  %v765_v28 = vmul.f32 %v3496_v57, %v3496_v57  ;;  %v749_v26 = vmul.f32 %v727_v59, %v3369_v43  ;;  %v1052_v10 = vpack.c.bf16 %v3499_v51, %v3503_v61  ;;  %vm914_vm11 = vmor %vm912_vm10, %vm913_vm9 }
 0x151   : > { %v908_v7 = vmul.f32 %v3036_v39, %v907_v60  ;;  %v905_v22 = vsel %vm3511_vm8, %v3034_v31, %v901_v6  ;;  %v3537_v23 = vmul.f32 %v3369_v43, %v660_v58  ;;  %vm922_vm13 = vweird.f32 %v3493_v55 }
 0x152   : > { %v781_v11 = vsub.f32 %v749_v26, %v765_v28  ;;  %1144 = vmatmul.bf16.vlgmr.msra.gmra.mxu2 %v1052_v10  ;;  %v1002_v42 = vmul.f32 %v905_v22, %v810_v29 }
 0x153   : > { %v909_v19 = vmul.f32 0.5, %v908_v7  ;;  %v767_v63 = vmul.f32 %v3537_v23, %v3537_v23 }
 0x154   : > { %v797_v20 = vmax.f32 %v781_v11, 0.0  ;;  %v1021_v24 = vmul.f32 %v3412_v54, %v1002_v42 }
 0x155   : > { %v658_v21 = vpop.xlane.xlu2 %657  ;;  %v910_v30 = vsub.f32 1.5, %v909_v19 }
 0x156   : > { %v3517_v27 = vpop.eup %3037  ;;  %v3522_v62 = vmul.f32 %v3369_v43, %v658_v21  ;;  %v3526_v34 = vadd.f32 1e-05, %v797_v20  ;;  %v3548_v58 = vadd.f32 %v3423_v2, %v1021_v24 }
 0x157   : > { %v917_v32 = vmul.f32 %v3517_v27, %v3493_v55  ;;  %v662_v35 = vpop.xlane.xlu0 %661  ;;  %v729_v38 = vpop.xlane.xlu1 %728  ;;  %v911_v40 = vmul.f32 %v3036_v39, %v910_v30  ;;  %vm923_vm12 = vweird.f32 %v3517_v27 }
 0x158   : > { %v766_v31 = vmul.f32 %v3522_v62, %v3522_v62  ;;  %v750_v41 = vmul.f32 %v729_v38, %v3369_v43  ;;  %3039 = vrsqrt.f32 %v3526_v34  ;;  %v3559_v10 = vmul.f32 %v3369_v43, %v662_v35  ;;  %vm3577_vm14 = vmor %vm922_vm13, %vm923_vm12 }
 0x159   : > { %v918_v44 = vmul.f32 %v3517_v27, %v917_v32  ;;  %v915_v48 = vsel %vm914_vm11, %v3036_v39, %v911_v40  ;;  %v812_v38 = vsub.f32 %v3307_v56, %v3483_v18  ;;  %v2956_v18 = vld [vmem:[%s4487_s7 + $0x38] sm:$0xff]  ;;  %vm932_vm1 = vweird.f32 %v3526_v34 }
 0x15a   : > { %v782_v47 = vsub.f32 %v750_v41, %v766_v31  ;;  %v1003_v49 = vmul.f32 %v915_v48, %v811_v37  ;;  %v768_v22 = vmul.f32 %v3559_v10, %v3559_v10  ;;  %1267 = vmatpush.bf16.msrb.mxu2 %v2956_v18 }
 0x15b   : > { %v919_v33 = vmul.f32 0.5, %v918_v44 }
 0x15c   : > { %v798_v45 = vmax.f32 %v782_v47, 0.0  ;;  %v1022_v53 = vmul.f32 %v3412_v54, %v1003_v49 }
 0x15d   : > { %v731_v36 = vpop.xlane.xlu2 %730  ;;  %v920_v50 = vsub.f32 1.5, %v919_v33 }
 0x15e   : > { %v3539_v5 = vadd.f32 1e-05, %v798_v45  ;;  %v751_v52 = vmul.f32 %v731_v36, %v3369_v43  ;;  %v3040_v13 = vpop.eup %3039  ;;  %v3555_v6 = vadd.f32 %v3423_v2, %v1022_v53 }
 0x15f   : > { %v664_v46 = vpop.xlane.xlu1 %663  ;;  %v735_v39 = vpop.xlane.xlu0 %734  ;;  %v927_v59 = vmul.f32 %v3040_v13, %v3526_v34  ;;  %v921_v20 = vmul.f32 %v3517_v27, %v920_v50  ;;  %vm933_vm15 = vweird.f32 %v3040_v13  ;;  %v813_v34 = vsub.f32 %v3315_v1, %v3496_v57 }
 0x160   : > { %3041 = vrsqrt.f32 %v3539_v5  ;;  %v783_v60 = vsub.f32 %v751_v52, %v767_v63  ;;  %v3551_v28 = vmul.f32 %v3369_v43, %v664_v46  ;;  %v753_v26 = vmul.f32 %v735_v39, %v3369_v43  ;;  %vm934_vm2 = vmor %vm932_vm1, %vm933_vm15 }
 0x161   : > { %v928_v7 = vmul.f32 %v3040_v13, %v927_v59  ;;  %v1053_v19 = vpack.c.bf16 %v3555_v6, %v3548_v58  ;;  %v925_v56 = vsel %vm3577_vm14, %v3517_v27, %v921_v20  ;;  %v2955_v27 = vld [vmem:[%s4487_s7 + $0x30] sm:$0xff]  ;;  %vm942_vm5 = vweird.f32 %v3539_v5 }
 0x162   : > { %v799_v11 = vmax.f32 %v783_v60, 0.0  ;;  %v769_v14 = vmul.f32 %v3551_v28, %v3551_v28  ;;  %v1004_v53 = vmul.f32 %v925_v56, %v812_v38  ;;  %1268 = vmatpush.bf16.msrb.mxu2 %v2955_v27 }
 0x163   : > { %v929_v21 = vmul.f32 0.5, %v928_v7  ;;  %1149 = vmatmul.bf16.gmra.mxu2 %v1053_v19  ;;  %v2954_v7 = vld [vmem:[%s4487_s7 + $0x28] sm:$0xff] }
 0x164   : > { %v3569_v29 = vadd.f32 1e-05, %v799_v11  ;;  %v785_v30 = vsub.f32 %v753_v26, %v769_v14  ;;  %v1023_v1 = vmul.f32 %v3412_v54, %v1004_v53 }
 0x165   : > { %v733_v32 = vpop.xlane.xlu2 %732  ;;  %v930_v41 = vsub.f32 1.5, %v929_v21 }
 0x166   : > { %v3571_v35 = vpop.eup %3041  ;;  %v752_v42 = vmul.f32 %v733_v32, %v3369_v43  ;;  %3043 = vrsqrt.f32 %v3569_v29  ;;  %v801_v37 = vmax.f32 %v785_v30, 0.0  ;;  %1269 = vmatpush.bf16.msrb.mxu2 %v2954_v7  ;;  %vm952_vm7 = vweird.f32 %v3569_v29 }
 0x167   : > { %v937_v55 = vmul.f32 %v3571_v35, %v3539_v5  ;;  %v666_v44 = vpop.xlane.xlu1 %665  ;;  %v737_v40 = vpop.xlane.xlu0 %736  ;;  %v931_v49 = vmul.f32 %v3040_v13, %v930_v41  ;;  %vm943_vm3 = vweird.f32 %v3571_v35 }
 0x168   : > { %v784_v47 = vsub.f32 %v752_v42, %v768_v22  ;;  %v3592_v33 = vmul.f32 %v3369_v43, %v666_v44  ;;  %v754_v48 = vmul.f32 %v737_v40, %v3369_v43  ;;  %v3601_v24 = vadd.f32 1e-05, %v801_v37  ;;  %vm3639_vm6 = vmor %vm942_vm5, %vm943_vm3 }
 0x169   : > { %v938_v45 = vmul.f32 %v3571_v35, %v937_v55  ;;  %v935_v63 = vsel %vm934_vm2, %v3040_v13, %v931_v49  ;;  %v3629_v42 = vadd.f32 %v3423_v2, %v1023_v1 }
 0x16a   : > { %v800_v36 = vmax.f32 %v784_v47, 0.0  ;;  %v770_v52 = vmul.f32 %v3592_v33, %v3592_v33  ;;  %3045 = vrsqrt.f32 %v3601_v24  ;;  %v1005_v26 = vmul.f32 %v935_v63, %v813_v34 }
 0x16b   : > { %v939_v50 = vmul.f32 0.5, %v938_v45  ;;  %v814_v34 = vsub.f32 %v3325_v8, %v3522_v62  ;;  %v2952_v8 = vld [vmem:[%s4487_s7 + $0x18] sm:$0xff]  ;;  %vm972_vm10 = vweird.f32 %v3601_v24 }
 0x16c   : > { %v3608_v46 = vadd.f32 1e-05, %v800_v36  ;;  %v786_v39 = vsub.f32 %v754_v48, %v770_v52  ;;  %v3044_v59 = vpop.eup %3043  ;;  %v1024_v20 = vmul.f32 %v3412_v54, %v1005_v26  ;;  %v815_v36 = vsub.f32 %v3318_v3, %v3537_v23 }
 0x16d   : > { %v668_v60 = vpop.xlane.xlu2 %667  ;;  %v947_v11 = vmul.f32 %v3044_v59, %v3569_v29  ;;  %v940_v57 = vsub.f32 1.5, %v939_v50  ;;  %vm953_vm4 = vweird.f32 %v3044_v59  ;;  %v2953_v29 = vld [vmem:[%s4487_s7 + $0x20] sm:$0xff] }
 0x16e   : > { %3047 = vrsqrt.f32 %v3608_v46  ;;  %v802_v13 = vmax.f32 %v786_v39, 0.0  ;;  %v3617_v14 = vmul.f32 %v3369_v43, %v668_v60  ;;  %v3626_v38 = vadd.f32 %v3423_v2, %v1024_v20  ;;  %vm954_vm8 = vmor %vm952_vm7, %vm953_vm4  ;;  %1270 = vmatpush.bf16.msrb.mxu2 %v2953_v29  ;;  %v2950_v29 = vld [vmem:[%s4487_s7 + $0x8] sm:$0xff] }
 0x16f   : > { %v739_v19 = vpop.xlane.xlu1 %738  ;;  %v948_v21 = vmul.f32 %v3044_v59, %v947_v11  ;;  %v941_v44 = vmul.f32 %v3571_v35, %v940_v57  ;;  %vm962_vm13 = vweird.f32 %v3608_v46 }
 0x170   : > { %v755_v22 = vmul.f32 %v739_v19, %v3369_v43  ;;  %v3621_v30 = vadd.f32 1e-05, %v802_v13  ;;  %v771_v32 = vmul.f32 %v3617_v14, %v3617_v14  ;;  %v3046_v31 = vpop.eup %3045  ;;  %v1054_v37 = vpack.c.bf16 %v3626_v38, %v3629_v42 }
 0x171   : > { %v949_v41 = vmul.f32 0.5, %v948_v21  ;;  %v967_v55 = vmul.f32 %v3046_v31, %v3601_v24  ;;  %v945_v5 = vsel %vm3639_vm6, %v3571_v35, %v941_v44  ;;  %vm973_vm9 = vweird.f32 %v3046_v31 }
 0x172   : > { %3049 = vrsqrt.f32 %v3621_v30  ;;  %v787_v18 = vsub.f32 %v755_v22, %v771_v32  ;;  %v1006_v7 = vmul.f32 %v945_v5, %v814_v34  ;;  %vm974_vm12 = vmor %vm972_vm10, %vm973_vm9  ;;  %v816_v19 = vsub.f32 %v3327_v12, %v3559_v10  ;;  %1271 = vmatpush.bf16.msrb.mxu2 %v2952_v8 }
 0x173   : > { %v950_v56 = vsub.f32 1.5, %v949_v41  ;;  %v968_v47 = vmul.f32 %v3046_v31, %v967_v55  ;;  %1154 = vmatmul.bf16.gmra.mxu2 %v1054_v37  ;;  %vm982_vm15 = vweird.f32 %v3621_v30 }
 0x174   : > { %v3048_v40 = vpop.eup %3047  ;;  %v803_v49 = vmax.f32 %v787_v18, 0.0  ;;  %v1025_v24 = vmul.f32 %v3412_v54, %v1006_v7 }
 0x175   : > { %v957_v48 = vmul.f32 %v3048_v40, %v3608_v46  ;;  %v951_v27 = vmul.f32 %v3044_v59, %v950_v56  ;;  %v969_v52 = vmul.f32 0.5, %v968_v47  ;;  %vm963_vm11 = vweird.f32 %v3048_v40 }
 0x176   : > { %v835_v50 = vadd.f32 1e-05, %v803_v49  ;;  %vm964_vm14 = vmor %vm962_vm13, %vm963_vm11  ;;  %v3674_v10 = vadd.f32 %v3423_v2, %v1025_v24 }
 0x177   : > { %v958_v53 = vmul.f32 %v3048_v40, %v957_v48  ;;  %v955_v63 = vsel %vm954_vm8, %v3044_v59, %v951_v27  ;;  %v970_v60 = vsub.f32 1.5, %v969_v52  ;;  %v817_v59 = vsub.f32 %v3334_v16, %v3551_v28  ;;  %v2951_v16 = vld [vmem:[%s4487_s7 + $0x10] sm:$0xff] }
 0x178   : > { %v3050_v39 = vpop.eup %3049  ;;  %v1007_v23 = vmul.f32 %v955_v63, %v815_v36  ;;  %3051 = vrsqrt.f32 %v835_v50  ;;  %1272 = vmatpush.bf16.msrb.mxu2 %v2951_v16  ;;  %vm992_vm2 = vweird.f32 %v835_v50  ;;  %v818_v36 = vsub.f32 %v3342_v25, %v3592_v33  ;;  %v2949_v33 = vld [vmem:[%s4487_s7] sm:$0xff] }
 0x179   : > { %v959_v3 = vmul.f32 0.5, %v958_v53  ;;  %v977_v26 = vmul.f32 %v3050_v39, %v3621_v30  ;;  %v971_v62 = vmul.f32 %v3046_v31, %v970_v60  ;;  %vm983_vm1 = vweird.f32 %v3050_v39 }
 0x17a   : > { %v1026_v1 = vmul.f32 %v3412_v54, %v1007_v23  ;;  %vm984_vm4 = vmor %vm982_vm15, %vm983_vm1  ;;  %v819_v30 = vsub.f32 %v3352_v9, %v3617_v14  ;;  %v3010_v14 = vld [vmem:[%s4486_s6] ss:$0 sm:$0xff] }
 0x17b   : > { %v960_v35 = vsub.f32 1.5, %v959_v3  ;;  %v978_v11 = vmul.f32 %v3050_v39, %v977_v26  ;;  %v975_v13 = vsel %vm974_vm12, %v3046_v31, %v971_v62 }
 0x17c   : > { %v1009_v21 = vmul.f32 %v975_v13, %v817_v59  ;;  %v3670_v32 = vadd.f32 %v3423_v2, %v1026_v1  ;;  %1273 = vmatpush.bf16.msrb.mxu2 %v2950_v29 }
 0x17d   : > { %v961_v57 = vmul.f32 %v3048_v40, %v960_v35  ;;  %v979_v20 = vmul.f32 0.5, %v978_v11 }
 0x17e   : > { %v3052_v22 = vpop.eup %3051  ;;  %v1028_v31 = vmul.f32 %v3412_v54, %v1009_v21  ;;  %v1055_v56 = vpack.c.bf16 %v3670_v32, %v3674_v10 }
 0x17f   : > { %v965_v28 = vsel %vm964_vm14, %v3048_v40, %v961_v57  ;;  %v980_v41 = vsub.f32 1.5, %v979_v20  ;;  %v987_v12 = vmul.f32 %v3052_v22, %v835_v50  ;;  %vm993_vm3 = vweird.f32 %v3052_v22 }
 0x180   : > { %v1008_v46 = vmul.f32 %v965_v28, %v816_v19  ;;  %v3683_v18 = vadd.f32 %v3423_v2, %v1028_v31  ;;  %vm994_vm5 = vmor %vm992_vm2, %vm993_vm3  ;;  %1274 = vmatpush.bf16.msrb.mxu2 %v2949_v33 }
 0x181   : > { %v988_v44 = vmul.f32 %v3052_v22, %v987_v12  ;;  %v981_v47 = vmul.f32 %v3050_v39, %v980_v41 }
 0x182   : > { %v1027_v55 = vmul.f32 %v3412_v54, %v1008_v46 }
 0x183   : > { %v989_v37 = vmul.f32 0.5, %v988_v44  ;;  %1159 = vmatmul.bf16.gmra.mxu2 %v1055_v56  ;;  %v985_v49 = vsel %vm984_vm4, %v3050_v39, %v981_v47 }
 0x184   : > { %v3680_v40 = vadd.f32 %v3423_v2, %v1027_v55  ;;  %v1010_v53 = vmul.f32 %v985_v49, %v818_v36 }
 0x185   : > { %v990_v45 = vsub.f32 1.5, %v989_v37 }
 0x186   : > { %v1056_v48 = vpack.c.bf16 %v3683_v18, %v3680_v40  ;;  %v1029_v63 = vmul.f32 %v3412_v54, %v1010_v53 }
 0x187   : > { %v991_v27 = vmul.f32 %v3052_v22, %v990_v45 }
 0x188   : > { %1164 = vmatmul.bf16.vlgmr.msrb.gmra.mxu3 %v1056_v48  ;;  %v3701_v25 = vadd.f32 %v3423_v2, %v1029_v63 }
 0x189   : > { %v995_v52 = vsel %vm994_vm5, %v3052_v22, %v991_v27 }
 0x18a   : > { %v1011_v5 = vmul.f32 %v995_v52, %v819_v30 }
 0x18c   : > { %v1030_v34 = vmul.f32 %v3412_v54, %v1011_v5 }
 0x18e   : > { %v3695_v50 = vadd.f32 %v3423_v2, %v1030_v34 }
 0x190   : > { %v1057_v9 = vpack.c.bf16 %v3695_v50, %v3701_v25 }
 0x198   : > { %1169 = vmatmul.bf16.gmra.mxu3 %v1057_v9 }
 0x1af   : > { %v1135_v54 = vpop.f32.mrf.mxu1 }
 0x1b0   : > { %v1136_v39 = vadd.f32 %v3010_v14, %v1135_v54 }
 0x1b2   : > { %v1175_v2 = vmax.f32 %v1136_v39, 0.0 }
 0x1b7   : > { %v1137_v60 = vpop.f32.mrf.mxu1 }
 0x1b8   : > { %v1138_v3 = vadd.f32 %v3010_v14, %v1137_v60 }
 0x1ba   : > { %v1176_v23 = vmax.f32 %v1138_v3, 0.0 }
 0x1bc   : > { %v1191_v26 = vpack.c.bf16 %v1176_v23, %v1175_v2 }
 0x1be   : > { %1275 = vmatmul.bf16.vlgmr.msrb.gmra.mxu2 %v1191_v26 }
 0x1bf   : > { %v1140_v7 = vpop.f32.mrf.mxu1 }
 0x1c0   : > { %v1141_v8 = vadd.f32 %v3010_v14, %v1140_v7 }
 0x1c2   : > { %v1177_v59 = vmax.f32 %v1141_v8, 0.0 }
 0x1c7   : > { %v1142_v62 = vpop.f32.mrf.mxu1 }
 0x1c8   : > { %v1143_v35 = vadd.f32 %v3010_v14, %v1142_v62 }
 0x1ca   : > { %v1178_v11 = vmax.f32 %v1143_v35, 0.0  ;;  %v3714_v35 = vld [vmem:[%s4488_s8] ss:$0 sm:$0xff] }
 0x1cc   : > { %v1192_v1 = vpack.c.bf16 %v1178_v11, %v1177_v59 }
 0x1ce   : > { %1280 = vmatmul.bf16.gmra.mxu2 %v1192_v1 }
 0x1d5   : > { %v1145_v57 = vpop.f32.mrf.mxu2 }
 0x1d6   : > { %v1146_v13 = vadd.f32 %v3010_v14, %v1145_v57 }
 0x1d8   : > { %v1179_v24 = vmax.f32 %v1146_v13, 0.0 }
 0x1dd   : > { %v1147_v19 = vpop.f32.mrf.mxu2 }
 0x1de   : > { %v1148_v20 = vadd.f32 %v3010_v14, %v1147_v19 }
 0x1e0   : > { %v1180_v21 = vmax.f32 %v1148_v20, 0.0 }
 0x1e2   : > { %v1193_v16 = vpack.c.bf16 %v1180_v21, %v1179_v24 }
 0x1e4   : > { %1285 = vmatmul.bf16.gmra.mxu2 %v1193_v16 }
 0x1e6   : > { %v1150_v28 = vpop.f32.mrf.mxu2 }
 0x1e7   : > { %v1151_v22 = vadd.f32 %v3010_v14, %v1150_v28 }
 0x1e9   : > { %v1181_v41 = vmax.f32 %v1151_v22, 0.0 }
 0x1ee   : > { %v1152_v46 = vpop.f32.mrf.mxu2 }
 0x1ef   : > { %v1153_v31 = vadd.f32 %v3010_v14, %v1152_v46 }
 0x1f1   : > { %v1182_v12 = vmax.f32 %v1153_v31, 0.0 }
 0x1f3   : > { %v1194_v55 = vpack.c.bf16 %v1182_v12, %v1181_v41 }
 0x1f5   : > { %1290 = vmatmul.bf16.gmra.mxu2 %v1194_v55 }
 0x1f6   : > { %v1155_v44 = vpop.f32.mrf.mxu2 }
 0x1f7   : > { %v1156_v56 = vadd.f32 %v3010_v14, %v1155_v44 }
 0x1f9   : > { %v1183_v48 = vmax.f32 %v1156_v56, 0.0 }
 0x1fe   : > { %v1157_v37 = vpop.f32.mrf.mxu2 }
 0x1ff   : > { %v1158_v47 = vadd.f32 %v3010_v14, %v1157_v37 }
 0x201   : > { %v1184_v45 = vmax.f32 %v1158_v47, 0.0 }
 0x203   : > { %v1195_v49 = vpack.c.bf16 %v1184_v45, %v1183_v48 }
 0x205   : > { %1295 = vmatmul.bf16.gmra.mxu2 %v1195_v49 }
 0x206   : > { %v1160_v27 = vpop.f32.mrf.mxu2 }
 0x207   : > { %v1161_v30 = vadd.f32 %v3010_v14, %v1160_v27 }
 0x209   : > { %v1185_v5 = vmax.f32 %v1161_v30, 0.0 }
 0x20b   : > { %v1165_v36 = vpop.f32.mrf.mxu3 }
 0x20c   : > { %v1166_v33 = vadd.f32 %v3010_v14, %v1165_v36 }
 0x20e   : > { %v1162_v52 = vpop.f32.mrf.mxu2  ;;  %v1187_v60 = vmax.f32 %v1166_v33, 0.0 }
 0x20f   : > { %v1163_v53 = vadd.f32 %v3010_v14, %v1162_v52 }
 0x211   : > { %v1186_v34 = vmax.f32 %v1163_v53, 0.0 }
 0x213   : > { %v1196_v63 = vpack.c.bf16 %v1186_v34, %v1185_v5  ;;  %v1167_v29 = vpop.f32.mrf.mxu3 }
 0x214   : > { %v1168_v9 = vadd.f32 %v3010_v14, %v1167_v29 }
 0x215   : > { %1300 = vmatmul.bf16.gmra.mxu2 %v1196_v63 }
 0x216   : > { %v1188_v39 = vmax.f32 %v1168_v9, 0.0 }
 0x218   : > { %v1197_v3 = vpack.c.bf16 %v1188_v39, %v1187_v60 }
 0x21b   : > { %v1170_v54 = vpop.f32.mrf.mxu3 }
 0x21c   : > { %v1171_v26 = vadd.f32 %v3010_v14, %v1170_v54 }
 0x21e   : > { %v1189_v8 = vmax.f32 %v1171_v26, 0.0 }
 0x223   : > { %v1172_v2 = vpop.f32.mrf.mxu3 }
 0x224   : > { %v1173_v23 = vadd.f32 %v3010_v14, %v1172_v2 }
 0x225   : > { %1305 = vmatmul.bf16.gmra.mxu2 %v1197_v3 }
 0x226   : > { %v1190_v7 = vmax.f32 %v1173_v23, 0.0 }
 0x228   : > { %v1198_v62 = vpack.c.bf16 %v1190_v7, %v1189_v8 }
 0x235   : > { %1310 = vmatmul.bf16.gmra.mxu2 %v1198_v62 }
 0x241   : > { %v1276_v59 = vpop.f32.mrf.mxu2 }
 0x242   : > { %v1277_v11 = vadd.f32 %v3714_v35, %v1276_v59 }
 0x244   : > { %v1316_v1 = vmax.f32 %v1277_v11, 0.0 }
 0x246   : > { %v3718_v57 = vadd.f32 %v1316_v1, %v3432_v15 }
 0x248   : > { %1350 = vadd.xlane.f32.xlu2 %v3718_v57  ;;  %v1398_v14 = vmul.f32 %v3718_v57, %v3718_v57 }
 0x249   : > { %v1278_v13 = vpop.f32.mrf.mxu2 }
 0x24a   : > { %v1279_v19 = vadd.f32 %v3714_v35, %v1278_v13  ;;  %1414 = vadd.xlane.f32.xlu1 %v1398_v14  ;;  %v2964_v13 = vld [vmem:[%s4485_s5 + $0x78] sm:$0xff] }
 0x24b   : > { %1834 = vmatpush.bf16.msra.mxu3 %v2964_v13 }
 0x24c   : > { %v1317_v20 = vmax.f32 %v1279_v19, 0.0 }
 0x24e   : > { %v3725_v24 = vadd.f32 %v1317_v20, %v3435_v17 }
 0x250   : > { %1352 = vadd.xlane.f32.xlu0 %v3725_v24  ;;  %v1399_v21 = vmul.f32 %v3725_v24, %v3725_v24 }
 0x251   : > { %v1281_v15 = vpop.f32.mrf.mxu2 }
 0x252   : > { %v1282_v16 = vadd.f32 %v3714_v35, %v1281_v15  ;;  %1416 = vadd.xlane.f32.xlu2 %v1399_v21 }
 0x254   : > { %v1318_v28 = vmax.f32 %v1282_v16, 0.0 }
 0x256   : > { %v3732_v22 = vadd.f32 %v1318_v28, %v3462_v0  ;;  %v2962_v28 = vld [vmem:[%s4485_s5 + $0x68] sm:$0xff] }
 0x258   : > { %1354 = vadd.xlane.f32.xlu0 %v3732_v22  ;;  %v1400_v46 = vmul.f32 %v3732_v22, %v3732_v22 }
 0x259   : > { %v1283_v17 = vpop.f32.mrf.mxu2 }
 0x25a   : > { %v1284_v31 = vadd.f32 %v3714_v35, %v1283_v17  ;;  %1418 = vadd.xlane.f32.xlu2 %v1400_v46 }
 0x25c   : > { %v1319_v41 = vmax.f32 %v1284_v31, 0.0 }
 0x25e   : > { %v3739_v12 = vadd.f32 %v1319_v41, %v3465_v4 }
 0x260   : > { %1356 = vadd.xlane.f32.xlu1 %v3739_v12  ;;  %v1401_v55 = vmul.f32 %v3739_v12, %v3739_v12 }
 0x262   : > { %1420 = vadd.xlane.f32.xlu0 %v1401_v55 }
 0x267   : > { %v1286_v0 = vpop.f32.mrf.mxu2 }
 0x268   : > { %v1287_v44 = vadd.f32 %v3714_v35, %v1286_v0  ;;  %v2960_v0 = vld [vmem:[%s4485_s5 + $0x58] sm:$0xff] }
 0x26a   : > { %v1320_v56 = vmax.f32 %v1287_v44, 0.0 }
 0x26c   : > { %v3746_v37 = vadd.f32 %v1320_v56, %v3503_v61 }
 0x26e   : > { %1358 = vadd.xlane.f32.xlu1 %v3746_v37  ;;  %v1402_v47 = vmul.f32 %v3746_v37, %v3746_v37 }
 0x26f   : > { %v1288_v4 = vpop.f32.mrf.mxu2 }
 0x270   : > { %v1289_v48 = vadd.f32 %v3714_v35, %v1288_v4  ;;  %1422 = vadd.xlane.f32.xlu0 %v1402_v47 }
 0x272   : > { %v1321_v45 = vmax.f32 %v1289_v48, 0.0 }
 0x274   : > { %v3753_v49 = vadd.f32 %v1321_v45, %v3499_v51 }
 0x276   : > { %1360 = vadd.xlane.f32.xlu2 %v3753_v49  ;;  %v1403_v27 = vmul.f32 %v3753_v49, %v3753_v49 }
 0x278   : > { %v1291_v61 = vpop.f32.mrf.mxu2  ;;  %1424 = vadd.xlane.f32.xlu1 %v1403_v27  ;;  %v2959_v27 = vld [vmem:[%s4485_s5 + $0x50] sm:$0xff] }
 0x279   : > { %v1292_v36 = vadd.f32 %v3714_v35, %v1291_v61 }
 0x27b   : > { %v1322_v30 = vmax.f32 %v1292_v36, 0.0 }
 0x27d   : > { %v3760_v52 = vadd.f32 %v1322_v30, %v3548_v58 }
 0x27f   : > { %1362 = vadd.xlane.f32.xlu2 %v3760_v52  ;;  %v1404_v53 = vmul.f32 %v3760_v52, %v3760_v52 }
 0x280   : > { %v1293_v51 = vpop.f32.mrf.mxu2 }
 0x281   : > { %v1294_v5 = vadd.f32 %v3714_v35, %v1293_v51  ;;  %1426 = vadd.xlane.f32.xlu1 %v1404_v53 }
 0x283   : > { %v1323_v34 = vmax.f32 %v1294_v5, 0.0  ;;  %v2958_v5 = vld [vmem:[%s4485_s5 + $0x48] sm:$0xff] }
 0x285   : > { %v3767_v63 = vadd.f32 %v1323_v34, %v3555_v6 }
 0x287   : > { %1364 = vadd.xlane.f32.xlu0 %v3767_v63  ;;  %v1405_v29 = vmul.f32 %v3767_v63, %v3767_v63 }
 0x288   : > { %v1296_v58 = vpop.f32.mrf.mxu2 }
 0x289   : > { %1428 = vadd.xlane.f32.xlu2 %v1405_v29  ;;  %v1297_v9 = vadd.f32 %v3714_v35, %v1296_v58 }
 0x28b   : > { %v1324_v33 = vmax.f32 %v1297_v9, 0.0 }
 0x28d   : > { %v3774_v54 = vadd.f32 %v1324_v33, %v3629_v42 }
 0x28f   : > { %1366 = vadd.xlane.f32.xlu0 %v3774_v54  ;;  %v1406_v39 = vmul.f32 %v3774_v54, %v3774_v54 }
 0x290   : > { %v1298_v6 = vpop.f32.mrf.mxu2 }
 0x291   : > { %v1299_v60 = vadd.f32 %v3714_v35, %v1298_v6  ;;  %1430 = vadd.xlane.f32.xlu2 %v1406_v39  ;;  %v2957_v6 = vld [vmem:[%s4485_s5 + $0x40] sm:$0xff] }
 0x293   : > { %v1325_v3 = vmax.f32 %v1299_v60, 0.0 }
 0x295   : > { %v3781_v2 = vadd.f32 %v1325_v3, %v3626_v38 }
 0x297   : > { %1368 = vadd.xlane.f32.xlu1 %v3781_v2  ;;  %v1407_v23 = vmul.f32 %v3781_v2, %v3781_v2 }
 0x298   : > { %v1301_v42 = vpop.f32.mrf.mxu2 }
 0x299   : > { %v1302_v26 = vadd.f32 %v3714_v35, %v1301_v42  ;;  %1432 = vadd.xlane.f32.xlu0 %v1407_v23 }
 0x29b   : > { %v1326_v7 = vmax.f32 %v1302_v26, 0.0 }
 0x29d   : > { %v3788_v8 = vadd.f32 %v1326_v7, %v3674_v10 }
 0x29f   : > { %1370 = vadd.xlane.f32.xlu1 %v3788_v8  ;;  %v1408_v62 = vmul.f32 %v3788_v8, %v3788_v8 }
 0x2a0   : > { %v1303_v38 = vpop.f32.mrf.mxu2 }
 0x2a1   : > { %v1304_v59 = vadd.f32 %v3714_v35, %v1303_v38  ;;  %1434 = vadd.xlane.f32.xlu0 %v1408_v62 }
 0x2a3   : > { %v1327_v11 = vmax.f32 %v1304_v59, 0.0 }
 0x2a5   : > { %v3795_v1 = vadd.f32 %v1327_v11, %v3670_v32  ;;  %v2963_v32 = vld [vmem:[%s4485_s5 + $0x70] sm:$0xff] }
 0x2a6   : > { %1835 = vmatpush.bf16.msra.mxu3 %v2963_v32 }
 0x2a7   : > { %1372 = vadd.xlane.f32.xlu2 %v3795_v1  ;;  %v1409_v14 = vmul.f32 %v3795_v1, %v3795_v1 }
 0x2a8   : > { %v1306_v10 = vpop.f32.mrf.mxu2 }
 0x2a9   : > { %v1307_v19 = vadd.f32 %v3714_v35, %v1306_v10  ;;  %1436 = vadd.xlane.f32.xlu1 %v1409_v14 }
 0x2aa   : > { %1836 = vmatpush.bf16.msra.mxu3 %v2962_v28 }
 0x2ab   : > { %v1328_v20 = vmax.f32 %v1307_v19, 0.0 }
 0x2ad   : > { %v3808_v21 = vadd.f32 %v1328_v20, %v3680_v40  ;;  %v2961_v40 = vld [vmem:[%s4485_s5 + $0x60] sm:$0xff] }
 0x2ae   : > { %1837 = vmatpush.bf16.msra.mxu3 %v2961_v40 }
 0x2af   : > { %1374 = vadd.xlane.f32.xlu2 %v3808_v21  ;;  %v1410_v15 = vmul.f32 %v3808_v21, %v3808_v21 }
 0x2b0   : > { %v1308_v16 = vpop.f32.mrf.mxu2 }
 0x2b1   : > { %v1309_v46 = vadd.f32 %v3714_v35, %v1308_v16  ;;  %1438 = vadd.xlane.f32.xlu1 %v1410_v15 }
 0x2b2   : > { %1838 = vmatpush.bf16.msra.mxu3 %v2960_v0 }
 0x2b3   : > { %v1329_v17 = vmax.f32 %v1309_v46, 0.0 }
 0x2b5   : > { %v3821_v31 = vadd.f32 %v1329_v17, %v3683_v18 }
 0x2b6   : > { %1839 = vmatpush.bf16.msra.mxu3 %v2959_v27 }
 0x2b7   : > { %1376 = vadd.xlane.f32.xlu0 %v3821_v31  ;;  %v1411_v41 = vmul.f32 %v3821_v31, %v3821_v31 }
 0x2b8   : > { %v1311_v55 = vpop.f32.mrf.mxu2 }
 0x2b9   : > { %v1312_v44 = vadd.f32 %v3714_v35, %v1311_v55  ;;  %1440 = vadd.xlane.f32.xlu2 %v1411_v41 }
 0x2ba   : > { %1840 = vmatpush.bf16.msra.mxu3 %v2958_v5  ;;  %v3881_v5 = vld [vmem:[%s4489_s9] ss:$0 sm:$0xff] }
 0x2bb   : > { %v1351_v56 = vpop.xlane.xlu2 %1350  ;;  %v1330_v18 = vmax.f32 %v1312_v44, 0.0 }
 0x2bc   : > { %v3831_v47 = vmul.f32 %v1351_v56, %v3369_v43 }
 0x2bd   : > { %v1415_v4 = vpop.xlane.xlu1 %1414  ;;  %v3840_v61 = vadd.f32 %v1330_v18, %v3701_v25 }
 0x2be   : > { %v1462_v48 = vmul.f32 %v3831_v47, %v3831_v47  ;;  %v1446_v45 = vmul.f32 %v1415_v4, %v3369_v43  ;;  %1841 = vmatpush.bf16.msra.mxu3 %v2957_v6 }
 0x2bf   : > { %1378 = vadd.xlane.f32.xlu0 %v3840_v61  ;;  %v1412_v30 = vmul.f32 %v3840_v61, %v3840_v61 }
 0x2c0   : > { %v1478_v36 = vsub.f32 %v1446_v45, %v1462_v48  ;;  %v1313_v51 = vpop.f32.mrf.mxu2  ;;  %v1510_v48 = vsub.f32 %v3718_v57, %v3831_v47 }
 0x2c1   : > { %v1314_v34 = vadd.f32 %v3714_v35, %v1313_v51  ;;  %1442 = vadd.xlane.f32.xlu2 %v1412_v30 }
 0x2c2   : > { %v1494_v53 = vmax.f32 %v1478_v36, 0.0 }
 0x2c3   : > { %v1353_v29 = vpop.xlane.xlu0 %1352  ;;  %v1331_v9 = vmax.f32 %v1314_v34, 0.0 }
 0x2c4   : > { %v1526_v58 = vadd.f32 1e-05, %v1494_v53  ;;  %v3850_v25 = vmul.f32 %v1353_v29, %v3369_v43 }
 0x2c5   : > { %v1417_v33 = vpop.xlane.xlu2 %1416  ;;  %v3858_v60 = vadd.f32 %v1331_v9, %v3695_v50 }
 0x2c6   : > { %3053 = vrsqrt.f32 %v1526_v58  ;;  %v1463_v39 = vmul.f32 %v3850_v25, %v3850_v25  ;;  %v1447_v35 = vmul.f32 %v1417_v33, %v3369_v43  ;;  %vm1548_vm7 = vweird.f32 %v1526_v58 }
 0x2c7   : > { %1380 = vadd.xlane.f32.xlu1 %v3858_v60  ;;  %v1413_v23 = vmul.f32 %v3858_v60, %v3858_v60  ;;  %v1511_v29 = vsub.f32 %v3725_v24, %v3850_v25 }
 0x2c8   : > { %v1479_v3 = vsub.f32 %v1447_v35, %v1463_v39  ;;  %v3889_v39 = vld [vmem:[%s4490_s10] ss:$0 sm:$0xff] }
 0x2c9   : > { %1444 = vadd.xlane.f32.xlu0 %v1413_v23 }
 0x2ca   : > { %v1495_v42 = vmax.f32 %v1479_v3, 0.0 }
 0x2cb   : > { %v1355_v26 = vpop.xlane.xlu0 %1354 }
 0x2cc   : > { %v3054_v7 = vpop.eup %3053  ;;  %v3865_v62 = vmul.f32 %v1355_v26, %v3369_v43  ;;  %v1527_v59 = vadd.f32 1e-05, %v1495_v42 }
 0x2cd   : > { %v1543_v38 = vmul.f32 %v3054_v7, %v1526_v58  ;;  %v1419_v50 = vpop.xlane.xlu2 %1418  ;;  %vm1549_vm6 = vweird.f32 %v3054_v7 }
 0x2ce   : > { %v1464_v11 = vmul.f32 %v3865_v62, %v3865_v62  ;;  %v1448_v14 = vmul.f32 %v1419_v50, %v3369_v43  ;;  %3055 = vrsqrt.f32 %v1527_v59  ;;  %vm1550_vm8 = vmor %vm1548_vm7, %vm1549_vm6  ;;  %vm1558_vm10 = vweird.f32 %v1527_v59 }
 0x2cf   : > { %v1544_v10 = vmul.f32 %v3054_v7, %v1543_v38 }
 0x2d0   : > { %v1480_v13 = vsub.f32 %v1448_v14, %v1464_v11 }
 0x2d1   : > { %v1545_v19 = vmul.f32 0.5, %v1544_v10 }
 0x2d2   : > { %v1496_v20 = vmax.f32 %v1480_v13, 0.0 }
 0x2d3   : > { %v1546_v32 = vsub.f32 1.5, %v1545_v19  ;;  %v1357_v15 = vpop.xlane.xlu1 %1356 }
 0x2d4   : > { %v1528_v16 = vadd.f32 1e-05, %v1496_v20  ;;  %v3871_v28 = vmul.f32 %v1357_v15, %v3369_v43  ;;  %v3056_v46 = vpop.eup %3055  ;;  %v1512_v15 = vsub.f32 %v3732_v22, %v3865_v62 }
 0x2d5   : > { %v1421_v17 = vpop.xlane.xlu0 %1420  ;;  %v1547_v40 = vmul.f32 %v3054_v7, %v1546_v32  ;;  %v1553_v41 = vmul.f32 %v3056_v46, %v1527_v59  ;;  %vm1559_vm9 = vweird.f32 %v3056_v46 }
 0x2d6   : > { %3057 = vrsqrt.f32 %v1528_v16  ;;  %v1465_v55 = vmul.f32 %v3871_v28, %v3871_v28  ;;  %v1449_v0 = vmul.f32 %v1421_v17, %v3369_v43  ;;  %vm1560_vm11 = vmor %vm1558_vm10, %vm1559_vm9  ;;  %vm1568_vm13 = vweird.f32 %v1528_v16 }
 0x2d7   : > { %v1554_v44 = vmul.f32 %v3056_v46, %v1553_v41  ;;  %v1551_v18 = vsel %vm1550_vm8, %v3054_v7, %v1547_v40 }
 0x2d8   : > { %v1481_v56 = vsub.f32 %v1449_v0, %v1465_v55  ;;  %v1702_v30 = vmul.f32 %v1551_v18, %v1510_v48 }
 0x2d9   : > { %v1555_v4 = vmul.f32 0.5, %v1554_v44 }
 0x2da   : > { %v1497_v45 = vmax.f32 %v1481_v56, 0.0  ;;  %v1721_v33 = vmul.f32 %v3881_v5, %v1702_v30  ;;  %v1513_v56 = vsub.f32 %v3739_v12, %v3871_v28 }
 0x2db   : > { %v1556_v36 = vsub.f32 1.5, %v1555_v4 }
 0x2dc   : > { %v3058_v27 = vpop.eup %3057  ;;  %v1529_v51 = vadd.f32 1e-05, %v1497_v45  ;;  %v3899_v7 = vadd.f32 %v3889_v39, %v1721_v33 }
 0x2dd   : > { %v1563_v53 = vmul.f32 %v3058_v27, %v1528_v16  ;;  %v1557_v34 = vmul.f32 %v3056_v46, %v1556_v36  ;;  %vm1569_vm12 = vweird.f32 %v3058_v27 }
 0x2de   : > { %3059 = vrsqrt.f32 %v1529_v51  ;;  %vm1570_vm14 = vmor %vm1568_vm13, %vm1569_vm12  ;;  %vm1578_vm1 = vweird.f32 %v1529_v51 }
 0x2df   : > { %v1564_v58 = vmul.f32 %v3058_v27, %v1563_v53  ;;  %v1561_v57 = vsel %vm1560_vm11, %v3056_v46, %v1557_v34 }
 0x2e0   : > { %v1703_v47 = vmul.f32 %v1561_v57, %v1511_v29 }
 0x2e1   : > { %v1565_v9 = vmul.f32 0.5, %v1564_v58  ;;  %v1359_v6 = vpop.xlane.xlu1 %1358 }
 0x2e2   : > { %v3892_v3 = vmul.f32 %v1359_v6, %v3369_v43  ;;  %v1722_v24 = vmul.f32 %v3881_v5, %v1703_v47 }
 0x2e3   : > { %v1566_v35 = vsub.f32 1.5, %v1565_v9  ;;  %v1423_v25 = vpop.xlane.xlu0 %1422 }
 0x2e4   : > { %v3060_v23 = vpop.eup %3059  ;;  %v1466_v42 = vmul.f32 %v3892_v3, %v3892_v3  ;;  %v1450_v26 = vmul.f32 %v1423_v25, %v3369_v43  ;;  %v3902_v38 = vadd.f32 %v3889_v39, %v1722_v24 }
 0x2e5   : > { %v1573_v59 = vmul.f32 %v3060_v23, %v1529_v51  ;;  %v1567_v50 = vmul.f32 %v3058_v27, %v1566_v35  ;;  %vm1579_vm15 = vweird.f32 %v3060_v23 }
 0x2e6   : > { %v1482_v11 = vsub.f32 %v1450_v26, %v1466_v42  ;;  %v1756_v14 = vpack.c.bf16 %v3902_v38, %v3899_v7  ;;  %vm1580_vm2 = vmor %vm1578_vm1, %vm1579_vm15 }
 0x2e7   : > { %v1574_v10 = vmul.f32 %v3060_v23, %v1573_v59  ;;  %v1571_v32 = vsel %vm1570_vm14, %v3058_v27, %v1567_v50 }
 0x2e8   : > { %v1498_v13 = vmax.f32 %v1482_v11, 0.0  ;;  %1842 = vmatmul.bf16.vlgmr.msra.gmra.mxu3 %v1756_v14  ;;  %v1704_v55 = vmul.f32 %v1571_v32, %v1512_v15  ;;  %v1514_v32 = vsub.f32 %v3746_v37, %v3892_v3 }
 0x2e9   : > { %v1575_v19 = vmul.f32 0.5, %v1574_v10  ;;  %v1361_v20 = vpop.xlane.xlu2 %1360 }
 0x2ea   : > { %v1530_v46 = vadd.f32 1e-05, %v1498_v13  ;;  %v3909_v17 = vmul.f32 %v1361_v20, %v3369_v43  ;;  %v1723_v4 = vmul.f32 %v3881_v5, %v1704_v55 }
 0x2eb   : > { %v1576_v40 = vsub.f32 1.5, %v1575_v19  ;;  %v1425_v41 = vpop.xlane.xlu1 %1424 }
 0x2ec   : > { %3061 = vrsqrt.f32 %v1530_v46  ;;  %v1467_v16 = vmul.f32 %v3909_v17, %v3909_v17  ;;  %v1451_v0 = vmul.f32 %v1425_v41, %v3369_v43  ;;  %v3922_v29 = vadd.f32 %v3889_v39, %v1723_v4 }
 0x2ed   : > { %v1577_v44 = vmul.f32 %v3060_v23, %v1576_v40  ;;  %vm1588_vm4 = vweird.f32 %v1530_v46 }
 0x2ee   : > { %v1483_v22 = vsub.f32 %v1451_v0, %v1467_v16 }
 0x2ef   : > { %v1581_v62 = vsel %vm1580_vm2, %v3060_v23, %v1577_v44 }
 0x2f0   : > { %v1705_v18 = vmul.f32 %v1581_v62, %v1513_v56  ;;  %v1499_v48 = vmax.f32 %v1483_v22, 0.0  ;;  %v1515_v56 = vsub.f32 %v3753_v49, %v3909_v17 }
 0x2f2   : > { %v3062_v45 = vpop.eup %3061  ;;  %v1363_v27 = vpop.xlane.xlu2 %1362  ;;  %v1724_v36 = vmul.f32 %v3881_v5, %v1705_v18  ;;  %v1531_v53 = vadd.f32 1e-05, %v1499_v48 }
 0x2f3   : > { %v1583_v30 = vmul.f32 %v3062_v45, %v1530_v46  ;;  %v3919_v51 = vmul.f32 %v1363_v27, %v3369_v43  ;;  %vm1589_vm3 = vweird.f32 %v3062_v45 }
 0x2f4   : > { %v1427_v34 = vpop.xlane.xlu1 %1426  ;;  %v3925_v12 = vadd.f32 %v3889_v39, %v1724_v36  ;;  %3063 = vrsqrt.f32 %v1531_v53  ;;  %vm1590_vm5 = vmor %vm1588_vm4, %vm1589_vm3  ;;  %vm1598_vm7 = vweird.f32 %v1531_v53 }
 0x2f5   : > { %v1584_v28 = vmul.f32 %v3062_v45, %v1583_v30  ;;  %v1468_v58 = vmul.f32 %v3919_v51, %v3919_v51  ;;  %v1452_v57 = vmul.f32 %v1427_v34, %v3369_v43 }
 0x2f6   : > { %v1757_v47 = vpack.c.bf16 %v3925_v12, %v3922_v29 }
 0x2f7   : > { %v1585_v9 = vmul.f32 0.5, %v1584_v28  ;;  %v1484_v33 = vsub.f32 %v1452_v57, %v1468_v58 }
 0x2f8   : > { %1847 = vmatmul.bf16.gmra.mxu3 %v1757_v47 }
 0x2f9   : > { %v1586_v6 = vsub.f32 1.5, %v1585_v9  ;;  %v1500_v35 = vmax.f32 %v1484_v33, 0.0 }
 0x2fa   : > { %v1365_v24 = vpop.xlane.xlu0 %1364  ;;  %v3064_v25 = vpop.eup %3063 }
 0x2fb   : > { %v3933_v23 = vmul.f32 %v1365_v24, %v3369_v43  ;;  %v1593_v42 = vmul.f32 %v3064_v25, %v1531_v53  ;;  %v1532_v26 = vadd.f32 1e-05, %v1500_v35  ;;  %v1587_v50 = vmul.f32 %v3062_v45, %v1586_v6 }
 0x2fc   : > { %v1429_v59 = vpop.xlane.xlu2 %1428  ;;  %vm1599_vm6 = vweird.f32 %v3064_v25 }
 0x2fd   : > { %v1469_v11 = vmul.f32 %v3933_v23, %v3933_v23  ;;  %v1453_v14 = vmul.f32 %v1429_v59, %v3369_v43  ;;  %v1594_v10 = vmul.f32 %v3064_v25, %v1593_v42  ;;  %3065 = vrsqrt.f32 %v1532_v26  ;;  %vm1600_vm8 = vmor %vm1598_vm7, %vm1599_vm6 }
 0x2fe   : > { %v1591_v20 = vsel %vm1590_vm5, %v3062_v45, %v1587_v50  ;;  %vm1608_vm10 = vweird.f32 %v1532_v26 }
 0x2ff   : > { %v1485_v13 = vsub.f32 %v1453_v14, %v1469_v11  ;;  %v1595_v19 = vmul.f32 0.5, %v1594_v10  ;;  %v1706_v55 = vmul.f32 %v1591_v20, %v1514_v32  ;;  %v1516_v11 = vsub.f32 %v3760_v52, %v3919_v51 }
 0x301   : > { %v1501_v15 = vmax.f32 %v1485_v13, 0.0  ;;  %v1596_v40 = vsub.f32 1.5, %v1595_v19  ;;  %v1725_v45 = vmul.f32 %v3881_v5, %v1706_v55 }
 0x302   : > { %v1367_v16 = vpop.xlane.xlu0 %1366 }
 0x303   : > { %v1533_v41 = vadd.f32 1e-05, %v1501_v15  ;;  %v3066_v0 = vpop.eup %3065  ;;  %v3941_v44 = vmul.f32 %v1367_v16, %v3369_v43  ;;  %v1597_v46 = vmul.f32 %v3064_v25, %v1596_v40  ;;  %v3951_v28 = vadd.f32 %v3889_v39, %v1725_v45 }
 0x304   : > { %v1603_v22 = vmul.f32 %v3066_v0, %v1532_v26  ;;  %v1431_v62 = vpop.xlane.xlu2 %1430  ;;  %vm1609_vm9 = vweird.f32 %v3066_v0  ;;  %v1517_v40 = vsub.f32 %v3767_v63, %v3933_v23 }
 0x305   : > { %3067 = vrsqrt.f32 %v1533_v41  ;;  %v1470_v37 = vmul.f32 %v3941_v44, %v3941_v44  ;;  %v1454_v3 = vmul.f32 %v1431_v62, %v3369_v43  ;;  %v1601_v18 = vsel %vm1600_vm8, %v3064_v25, %v1597_v46  ;;  %vm1610_vm11 = vmor %vm1608_vm10, %vm1609_vm9 }
 0x306   : > { %v1604_v4 = vmul.f32 %v3066_v0, %v1603_v22  ;;  %v1707_v48 = vmul.f32 %v1601_v18, %v1515_v56  ;;  %vm1618_vm13 = vweird.f32 %v1533_v41 }
 0x307   : > { %v1486_v27 = vsub.f32 %v1454_v3, %v1470_v37 }
 0x308   : > { %v1605_v36 = vmul.f32 0.5, %v1604_v4  ;;  %v1726_v30 = vmul.f32 %v3881_v5, %v1707_v48 }
 0x309   : > { %v1502_v53 = vmax.f32 %v1486_v27, 0.0 }
 0x30a   : > { %v1606_v17 = vsub.f32 1.5, %v1605_v36  ;;  %v1369_v34 = vpop.xlane.xlu1 %1368  ;;  %v3954_v58 = vadd.f32 %v3889_v39, %v1726_v30 }
 0x30b   : > { %v3068_v49 = vpop.eup %3067  ;;  %v1534_v47 = vadd.f32 1e-05, %v1502_v53  ;;  %v3957_v9 = vmul.f32 %v1369_v34, %v3369_v43 }
 0x30c   : > { %v1613_v57 = vmul.f32 %v3068_v49, %v1533_v41  ;;  %v1433_v33 = vpop.xlane.xlu0 %1432  ;;  %v1758_v6 = vpack.c.bf16 %v3954_v58, %v3951_v28  ;;  %v1607_v35 = vmul.f32 %v3066_v0, %v1606_v17  ;;  %vm1619_vm12 = vweird.f32 %v3068_v49 }
 0x30d   : > { %3069 = vrsqrt.f32 %v1534_v47  ;;  %v1471_v25 = vmul.f32 %v3957_v9, %v3957_v9  ;;  %v1455_v42 = vmul.f32 %v1433_v33, %v3369_v43  ;;  %vm1620_vm14 = vmor %vm1618_vm13, %vm1619_vm12  ;;  %vm1628_vm1 = vweird.f32 %v1534_v47 }
 0x30e   : > { %v1614_v24 = vmul.f32 %v3068_v49, %v1613_v57  ;;  %1852 = vmatmul.bf16.gmra.mxu3 %v1758_v6  ;;  %v1611_v50 = vsel %vm1610_vm11, %v3066_v0, %v1607_v35 }
 0x30f   : > { %v1487_v14 = vsub.f32 %v1455_v42, %v1471_v25  ;;  %v1708_v26 = vmul.f32 %v1611_v50, %v1516_v11  ;;  %v1518_v25 = vsub.f32 %v3774_v54, %v3941_v44 }
 0x310   : > { %v1615_v59 = vmul.f32 0.5, %v1614_v24 }
 0x311   : > { %v1503_v13 = vmax.f32 %v1487_v14, 0.0  ;;  %v1727_v22 = vmul.f32 %v3881_v5, %v1708_v26 }
 0x312   : > { %v1616_v10 = vsub.f32 1.5, %v1615_v59  ;;  %v1371_v19 = vpop.xlane.xlu1 %1370 }
 0x313   : > { %v3070_v20 = vpop.eup %3069  ;;  %v3967_v32 = vmul.f32 %v1371_v19, %v3369_v43  ;;  %v1535_v55 = vadd.f32 1e-05, %v1503_v13  ;;  %v3977_v4 = vadd.f32 %v3889_v39, %v1727_v22 }
 0x314   : > { %v1617_v15 = vmul.f32 %v3068_v49, %v1616_v10  ;;  %v1623_v16 = vmul.f32 %v3070_v20, %v1534_v47  ;;  %v1435_v0 = vpop.xlane.xlu0 %1434  ;;  %vm1629_vm15 = vweird.f32 %v3070_v20  ;;  %v2972_v47 = vld [vmem:[%s4487_s7 + $0x78] sm:$0xff] }
 0x315   : > { %v1472_v52 = vmul.f32 %v3967_v32, %v3967_v32  ;;  %v1456_v51 = vmul.f32 %v1435_v0, %v3369_v43  ;;  %3071 = vrsqrt.f32 %v1535_v55  ;;  %vm1630_vm2 = vmor %vm1628_vm1, %vm1629_vm15  ;;  %vm1638_vm4 = vweird.f32 %v1535_v55  ;;  %1977 = vmatpush.bf16.msrb.mxu0 %v2972_v47 }
 0x316   : > { %v1621_v46 = vsel %vm1620_vm14, %v3068_v49, %v1617_v15  ;;  %v1624_v56 = vmul.f32 %v3070_v20, %v1623_v16  ;;  %v1519_v15 = vsub.f32 %v3781_v2, %v3957_v9 }
 0x317   : > { %v1709_v41 = vmul.f32 %v1621_v46, %v1517_v40  ;;  %v1488_v62 = vsub.f32 %v1456_v51, %v1472_v52 }
 0x318   : > { %v1625_v37 = vmul.f32 0.5, %v1624_v56 }
 0x319   : > { %v1728_v3 = vmul.f32 %v3881_v5, %v1709_v41  ;;  %v1504_v63 = vmax.f32 %v1488_v62, 0.0 }
 0x31a   : > { %v1626_v23 = vsub.f32 1.5, %v1625_v37  ;;  %v1373_v18 = vpop.xlane.xlu2 %1372 }
 0x31b   : > { %v3980_v48 = vadd.f32 %v3889_v39, %v1728_v3  ;;  %v3982_v45 = vadd.f32 1e-05, %v1504_v63  ;;  %v3985_v27 = vmul.f32 %v1373_v18, %v3369_v43  ;;  %v3072_v36 = vpop.eup %3071 }
 0x31c   : > { %v1437_v30 = vpop.xlane.xlu1 %1436  ;;  %v1633_v49 = vmul.f32 %v3072_v36, %v1535_v55  ;;  %v1627_v17 = vmul.f32 %v3070_v20, %v1626_v23  ;;  %vm1639_vm3 = vweird.f32 %v3072_v36  ;;  %v2971_v23 = vld [vmem:[%s4487_s7 + $0x70] sm:$0xff] }
 0x31d   : > { %v1759_v53 = vpack.c.bf16 %v3980_v48, %v3977_v4  ;;  %3073 = vrsqrt.f32 %v3982_v45  ;;  %v1473_v34 = vmul.f32 %v3985_v27, %v3985_v27  ;;  %v1457_v57 = vmul.f32 %v1437_v30, %v3369_v43  ;;  %vm1640_vm5 = vmor %vm1638_vm4, %vm1639_vm3  ;;  %1978 = vmatpush.bf16.msrb.mxu0 %v2971_v23 }
 0x31e   : > { %v1634_v33 = vmul.f32 %v3072_v36, %v1633_v49  ;;  %v1631_v24 = vsel %vm1630_vm2, %v3070_v20, %v1627_v17  ;;  %vm1648_vm7 = vweird.f32 %v3982_v45 }
 0x31f   : > { %1857 = vmatmul.bf16.gmra.mxu3 %v1759_v53  ;;  %v1489_v6 = vsub.f32 %v1457_v57, %v1473_v34  ;;  %v1710_v26 = vmul.f32 %v1631_v24, %v1518_v25 }
 0x320   : > { %v1635_v35 = vmul.f32 0.5, %v1634_v33 }
 0x321   : > { %v1505_v42 = vmax.f32 %v1489_v6, 0.0  ;;  %v1729_v46 = vmul.f32 %v3881_v5, %v1710_v26  ;;  %v1520_v6 = vsub.f32 %v3788_v8, %v3967_v32  ;;  %v2970_v32 = vld [vmem:[%s4487_s7 + $0x68] sm:$0xff]  ;;  %v1521_v26 = vsub.f32 %v3795_v1, %v3985_v27 }
 0x322   : > { %v1375_v59 = vpop.xlane.xlu2 %1374  ;;  %v1636_v11 = vsub.f32 1.5, %v1635_v35  ;;  %1979 = vmatpush.bf16.msrb.mxu0 %v2970_v32 }
 0x323   : > { %v3074_v50 = vpop.eup %3073  ;;  %v3996_v14 = vmul.f32 %v1375_v59, %v3369_v43  ;;  %v1537_v13 = vadd.f32 1e-05, %v1505_v42  ;;  %v4015_v3 = vadd.f32 %v3889_v39, %v1729_v46 }
 0x324   : > { %v1643_v10 = vmul.f32 %v3074_v50, %v3982_v45  ;;  %v1439_v19 = vpop.xlane.xlu1 %1438  ;;  %v1637_v20 = vmul.f32 %v3072_v36, %v1636_v11  ;;  %vm1649_vm6 = vweird.f32 %v3074_v50 }
 0x325   : > { %v1474_v54 = vmul.f32 %v3996_v14, %v3996_v14  ;;  %v1458_v44 = vmul.f32 %v1439_v19, %v3369_v43  ;;  %3075 = vrsqrt.f32 %v1537_v13  ;;  %vm1650_vm8 = vmor %vm1648_vm7, %vm1649_vm6  ;;  %vm1658_vm10 = vweird.f32 %v1537_v13 }
 0x326   : > { %v1644_v40 = vmul.f32 %v3074_v50, %v1643_v10  ;;  %v1641_v0 = vsel %vm1640_vm5, %v3072_v36, %v1637_v20 }
 0x327   : > { %v1490_v16 = vsub.f32 %v1458_v44, %v1474_v54  ;;  %v1711_v51 = vmul.f32 %v1641_v0, %v1519_v15 }
 0x328   : > { %v1645_v52 = vmul.f32 0.5, %v1644_v40 }
 0x329   : > { %v1506_v55 = vmax.f32 %v1490_v16, 0.0  ;;  %v1730_v22 = vmul.f32 %v3881_v5, %v1711_v51 }
 0x32a   : > { %v1646_v56 = vsub.f32 1.5, %v1645_v52  ;;  %v1377_v41 = vpop.xlane.xlu0 %1376 }
 0x32b   : > { %v4009_v62 = vadd.f32 1e-05, %v1506_v55  ;;  %v4012_v37 = vmul.f32 %v1377_v41, %v3369_v43  ;;  %v3076_v2 = vpop.eup %3075  ;;  %v4018_v63 = vadd.f32 %v3889_v39, %v1730_v22  ;;  %v2968_v55 = vld [vmem:[%s4487_s7 + $0x58] sm:$0xff] }
 0x32c   : > { %v1441_v9 = vpop.xlane.xlu2 %1440  ;;  %v1653_v18 = vmul.f32 %v3076_v2, %v1537_v13  ;;  %v1647_v36 = vmul.f32 %v3074_v50, %v1646_v56  ;;  %vm1659_vm9 = vweird.f32 %v3076_v2  ;;  %v2969_v13 = vld [vmem:[%s4487_s7 + $0x60] sm:$0xff] }
 0x32d   : > { %3077 = vrsqrt.f32 %v4009_v62  ;;  %v1475_v30 = vmul.f32 %v4012_v37, %v4012_v37  ;;  %v1459_v53 = vmul.f32 %v1441_v9, %v3369_v43  ;;  %v1760_v49 = vpack.c.bf16 %v4018_v63, %v4015_v3  ;;  %vm1660_vm11 = vmor %vm1658_vm10, %vm1659_vm9  ;;  %1980 = vmatpush.bf16.msrb.mxu0 %v2969_v13 }
 0x32e   : > { %v1654_v17 = vmul.f32 %v3076_v2, %v1653_v18  ;;  %v1651_v33 = vsel %vm1650_vm8, %v3074_v50, %v1647_v36  ;;  %vm1668_vm13 = vweird.f32 %v4009_v62 }
 0x32f   : > { %v1491_v34 = vsub.f32 %v1459_v53, %v1475_v30  ;;  %1862 = vmatmul.bf16.gmra.mxu3 %v1760_v49  ;;  %v1712_v10 = vmul.f32 %v1651_v33, %v1520_v6  ;;  %v1522_v33 = vsub.f32 %v3808_v21, %v3996_v14 }
 0x330   : > { %v1655_v57 = vmul.f32 0.5, %v1654_v17  ;;  %v2967_v17 = vld [vmem:[%s4487_s7 + $0x50] sm:$0xff] }
 0x331   : > { %v1507_v35 = vmax.f32 %v1491_v34, 0.0  ;;  %v1731_v16 = vmul.f32 %v3881_v5, %v1712_v10  ;;  %1981 = vmatpush.bf16.msrb.mxu0 %v2968_v55  ;;  %v1523_v10 = vsub.f32 %v3821_v31, %v4012_v37  ;;  %v2966_v37 = vld [vmem:[%s4487_s7 + $0x48] sm:$0xff] }
 0x332   : > { %v1379_v24 = vpop.xlane.xlu0 %1378  ;;  %v1656_v42 = vsub.f32 1.5, %v1655_v57 }
 0x333   : > { %v3078_v25 = vpop.eup %3077  ;;  %v4033_v59 = vmul.f32 %v1379_v24, %v3369_v43  ;;  %v1539_v45 = vadd.f32 1e-05, %v1507_v35  ;;  %v4056_v22 = vadd.f32 %v3889_v39, %v1731_v16 }
 0x334   : > { %v1663_v11 = vmul.f32 %v3078_v25, %v4009_v62  ;;  %v1443_v47 = vpop.xlane.xlu2 %1442  ;;  %v1657_v8 = vmul.f32 %v3076_v2, %v1656_v42  ;;  %vm1669_vm12 = vweird.f32 %v3078_v25 }
 0x335   : > { %v1476_v50 = vmul.f32 %v4033_v59, %v4033_v59  ;;  %v1460_v19 = vmul.f32 %v1443_v47, %v3369_v43  ;;  %3079 = vrsqrt.f32 %v1539_v45  ;;  %vm1670_vm14 = vmor %vm1668_vm13, %vm1669_vm12  ;;  %1982 = vmatpush.bf16.msrb.mxu0 %v2967_v17  ;;  %vm1678_vm1 = vweird.f32 %v1539_v45 }
 0x336   : > { %v1664_v54 = vmul.f32 %v3078_v25, %v1663_v11  ;;  %v1661_v20 = vsel %vm1660_vm11, %v3076_v2, %v1657_v8  ;;  %v1524_v16 = vsub.f32 %v3840_v61, %v4033_v59 }
 0x337   : > { %v1492_v44 = vsub.f32 %v1460_v19, %v1476_v50  ;;  %v1713_v40 = vmul.f32 %v1661_v20, %v1521_v26 }
 0x338   : > { %v1665_v15 = vmul.f32 0.5, %v1664_v54 }
 0x339   : > { %v1508_v0 = vmax.f32 %v1492_v44, 0.0  ;;  %v1732_v46 = vmul.f32 %v3881_v5, %v1713_v40  ;;  %1983 = vmatpush.bf16.msrb.mxu0 %v2966_v37 }
 0x33a   : > { %v1666_v52 = vsub.f32 1.5, %v1665_v15  ;;  %v1381_v51 = vpop.xlane.xlu1 %1380 }
 0x33b   : > { %v1540_v1 = vadd.f32 1e-05, %v1508_v0  ;;  %v4050_v27 = vmul.f32 %v1381_v51, %v3369_v43  ;;  %v3080_v56 = vpop.eup %3079  ;;  %v4059_v2 = vadd.f32 %v3889_v39, %v1732_v46 }
 0x33c   : > { %v1445_v41 = vpop.xlane.xlu0 %1444  ;;  %v1673_v9 = vmul.f32 %v3080_v56, %v1539_v45  ;;  %v1667_v23 = vmul.f32 %v3078_v25, %v1666_v52  ;;  %vm1679_vm15 = vweird.f32 %v3080_v56 }
 0x33d   : > { %3081 = vrsqrt.f32 %v1540_v1  ;;  %v1477_v18 = vmul.f32 %v4050_v27, %v4050_v27  ;;  %v1461_v36 = vmul.f32 %v1445_v41, %v3369_v43  ;;  %v1761_v30 = vpack.c.bf16 %v4059_v2, %v4056_v22  ;;  %vm1680_vm2 = vmor %vm1678_vm1, %vm1679_vm15 }
 0x33e   : > { %v1674_v53 = vmul.f32 %v3080_v56, %v1673_v9  ;;  %v1671_v57 = vsel %vm1670_vm14, %v3078_v25, %v1667_v23  ;;  %vm1688_vm4 = vweird.f32 %v1540_v1  ;;  %v1525_v46 = vsub.f32 %v3858_v60, %v4050_v27  ;;  %v3014_v23 = vld [vmem:[%s4486_s6 + $0x1] ss:$0 sm:$0xff] }
 0x33f   : > { %v1493_v49 = vsub.f32 %v1461_v36, %v1477_v18  ;;  %1867 = vmatmul.bf16.gmra.mxu3 %v1761_v30  ;;  %v1714_v11 = vmul.f32 %v1671_v57, %v1522_v33 }
 0x340   : > { %v1675_v34 = vmul.f32 0.5, %v1674_v53 }
 0x341   : > { %v1509_v6 = vmax.f32 %v1493_v49, 0.0  ;;  %v1733_v21 = vmul.f32 %v3881_v5, %v1714_v11 }
 0x342   : > { %v1676_v24 = vsub.f32 1.5, %v1675_v34 }
 0x343   : > { %v3082_v35 = vpop.eup %3081  ;;  %v1541_v42 = vadd.f32 1e-05, %v1509_v6  ;;  %v4077_v54 = vadd.f32 %v3889_v39, %v1733_v21 }
 0x344   : > { %v1683_v62 = vmul.f32 %v3082_v35, %v1540_v1  ;;  %v1677_v47 = vmul.f32 %v3080_v56, %v1676_v24  ;;  %vm1689_vm3 = vweird.f32 %v3082_v35  ;;  %v2965_v1 = vld [vmem:[%s4487_s7 + $0x40] sm:$0xff] }
 0x345   : > { %3083 = vrsqrt.f32 %v1541_v42  ;;  %vm1690_vm5 = vmor %vm1688_vm4, %vm1689_vm3  ;;  %vm1698_vm7 = vweird.f32 %v1541_v42  ;;  %1984 = vmatpush.bf16.msrb.mxu0 %v2965_v1 }
 0x346   : > { %v1684_v50 = vmul.f32 %v3082_v35, %v1683_v62  ;;  %v1681_v25 = vsel %vm1680_vm2, %v3080_v56, %v1677_v47 }
 0x347   : > { %v1715_v8 = vmul.f32 %v1681_v25, %v1523_v10 }
 0x348   : > { %v1685_v19 = vmul.f32 0.5, %v1684_v50 }
 0x349   : > { %v1734_v32 = vmul.f32 %v3881_v5, %v1715_v8 }
 0x34a   : > { %v1686_v14 = vsub.f32 1.5, %v1685_v19 }
 0x34b   : > { %v3084_v26 = vpop.eup %3083  ;;  %v4080_v45 = vadd.f32 %v3889_v39, %v1734_v32 }
 0x34c   : > { %v1687_v44 = vmul.f32 %v3082_v35, %v1686_v14  ;;  %v1693_v31 = vmul.f32 %v3084_v26, %v1541_v42  ;;  %vm1699_vm6 = vweird.f32 %v3084_v26 }
 0x34d   : > { %v1762_v20 = vpack.c.bf16 %v4080_v45, %v4077_v54  ;;  %vm1700_vm8 = vmor %vm1698_vm7, %vm1699_vm6 }
 0x34e   : > { %v1694_v13 = vmul.f32 %v3084_v26, %v1693_v31  ;;  %v1691_v40 = vsel %vm1690_vm5, %v3082_v35, %v1687_v44 }
 0x34f   : > { %1872 = vmatmul.bf16.gmra.mxu3 %v1762_v20  ;;  %v1716_v52 = vmul.f32 %v1691_v40, %v1524_v16 }
 0x350   : > { %v1695_v15 = vmul.f32 0.5, %v1694_v13 }
 0x351   : > { %v1735_v41 = vmul.f32 %v3881_v5, %v1716_v52 }
 0x352   : > { %v1696_v0 = vsub.f32 1.5, %v1695_v15 }
 0x353   : > { %v4097_v59 = vadd.f32 %v3889_v39, %v1735_v41 }
 0x354   : > { %v1697_v51 = vmul.f32 %v3084_v26, %v1696_v0 }
 0x356   : > { %v1701_v55 = vsel %vm1700_vm8, %v3084_v26, %v1697_v51 }
 0x357   : > { %v1717_v56 = vmul.f32 %v1701_v55, %v1525_v46 }
 0x359   : > { %v1736_v61 = vmul.f32 %v3881_v5, %v1717_v56 }
 0x35b   : > { %v4100_v9 = vadd.f32 %v3889_v39, %v1736_v61 }
 0x35d   : > { %v1763_v60 = vpack.c.bf16 %v4100_v9, %v4097_v59 }
 0x35f   : > { %1877 = vmatmul.bf16.gmra.mxu3 %v1763_v60 }
 0x36b   : > { %v1843_v27 = vpop.f32.mrf.mxu3 }
 0x36c   : > { %v1844_v18 = vadd.f32 %v3014_v23, %v1843_v27 }
 0x36e   : > { %v1883_v53 = vmax.f32 %v1844_v18, 0.0 }
 0x373   : > { %v1845_v36 = vpop.f32.mrf.mxu3 }
 0x374   : > { %v1846_v30 = vadd.f32 %v3014_v23, %v1845_v36 }
 0x376   : > { %v1884_v5 = vmax.f32 %v1846_v30, 0.0 }
 0x378   : > { %v1899_v49 = vpack.c.bf16 %v1884_v5, %v1883_v53 }
 0x37a   : > { %1985 = vmatmul.bf16.vlgmr.msrb.gmra.mxu0 %v1899_v49 }
 0x37b   : > { %v1848_v17 = vpop.f32.mrf.mxu3 }
 0x37c   : > { %v1849_v34 = vadd.f32 %v3014_v23, %v1848_v17 }
 0x37e   : > { %v1885_v33 = vmax.f32 %v1849_v34, 0.0 }
 0x383   : > { %v1850_v39 = vpop.f32.mrf.mxu3 }
 0x384   : > { %v1851_v57 = vadd.f32 %v3014_v23, %v1850_v39 }
 0x386   : > { %v1886_v6 = vmax.f32 %v1851_v57, 0.0  ;;  %v4110_v57 = vld [vmem:[%s4488_s8 + $0x1] ss:$0 sm:$0xff] }
 0x388   : > { %v1900_v35 = vpack.c.bf16 %v1886_v6, %v1885_v33 }
 0x38a   : > { %1990 = vmatmul.bf16.gmra.mxu0 %v1900_v35 }
 0x391   : > { %v1853_v24 = vpop.f32.mrf.mxu3 }
 0x392   : > { %v1854_v62 = vadd.f32 %v3014_v23, %v1853_v24 }
 0x394   : > { %v1887_v47 = vmax.f32 %v1854_v62, 0.0 }
 0x399   : > { %v1855_v42 = vpop.f32.mrf.mxu3 }
 0x39a   : > { %v1856_v11 = vadd.f32 %v3014_v23, %v1855_v42 }
 0x39c   : > { %v1888_v10 = vmax.f32 %v1856_v11, 0.0 }
 0x39e   : > { %v1901_v50 = vpack.c.bf16 %v1888_v10, %v1887_v47 }
 0x3a0   : > { %1995 = vmatmul.bf16.gmra.mxu0 %v1901_v50 }
 0x3a2   : > { %v1858_v25 = vpop.f32.mrf.mxu3 }
 0x3a3   : > { %v1859_v19 = vadd.f32 %v3014_v23, %v1858_v25 }
 0x3a5   : > { %v1889_v14 = vmax.f32 %v1859_v19, 0.0 }
 0x3aa   : > { %v1860_v8 = vpop.f32.mrf.mxu3 }
 0x3ab   : > { %v1861_v21 = vadd.f32 %v3014_v23, %v1860_v8 }
 0x3ad   : > { %v1890_v32 = vmax.f32 %v1861_v21, 0.0 }
 0x3af   : > { %v1902_v26 = vpack.c.bf16 %v1890_v32, %v1889_v14 }
 0x3b1   : > { %2000 = vmatmul.bf16.gmra.mxu0 %v1902_v26 }
 0x3b2   : > { %v1863_v44 = vpop.f32.mrf.mxu3 }
 0x3b3   : > { %v1864_v31 = vadd.f32 %v3014_v23, %v1863_v44 }
 0x3b5   : > { %v1891_v13 = vmax.f32 %v1864_v31, 0.0 }
 0x3ba   : > { %v1865_v37 = vpop.f32.mrf.mxu3 }
 0x3bb   : > { %v1866_v20 = vadd.f32 %v3014_v23, %v1865_v37 }
 0x3bd   : > { %v1892_v15 = vmax.f32 %v1866_v20, 0.0 }
 0x3bf   : > { %v1903_v40 = vpack.c.bf16 %v1892_v15, %v1891_v13 }
 0x3c1   : > { %2005 = vmatmul.bf16.gmra.mxu0 %v1903_v40 }
 0x3c2   : > { %v1868_v16 = vpop.f32.mrf.mxu3 }
 0x3c3   : > { %v1869_v0 = vadd.f32 %v3014_v23, %v1868_v16 }
 0x3c5   : > { %v1893_v46 = vmax.f32 %v1869_v0, 0.0 }
 0x3ca   : > { %v1870_v52 = vpop.f32.mrf.mxu3 }
 0x3cb   : > { %v1871_v51 = vadd.f32 %v3014_v23, %v1870_v52 }
 0x3cd   : > { %v1894_v55 = vmax.f32 %v1871_v51, 0.0 }
 0x3cf   : > { %v1904_v1 = vpack.c.bf16 %v1894_v55, %v1893_v46 }
 0x3d1   : > { %2010 = vmatmul.bf16.gmra.mxu0 %v1904_v1 }
 0x3d2   : > { %v1873_v56 = vpop.f32.mrf.mxu3 }
 0x3d3   : > { %v1874_v41 = vadd.f32 %v3014_v23, %v1873_v56 }
 0x3d5   : > { %v1895_v27 = vmax.f32 %v1874_v41, 0.0 }
 0x3da   : > { %v1875_v61 = vpop.f32.mrf.mxu3 }
 0x3db   : > { %v1876_v60 = vadd.f32 %v3014_v23, %v1875_v61 }
 0x3dd   : > { %v1896_v18 = vmax.f32 %v1876_v60, 0.0 }
 0x3df   : > { %v1905_v36 = vpack.c.bf16 %v1896_v18, %v1895_v27 }
 0x3e1   : > { %2015 = vmatmul.bf16.gmra.mxu0 %v1905_v36 }
 0x3e2   : > { %v1878_v30 = vpop.f32.mrf.mxu3 }
 0x3e3   : > { %v1879_v53 = vadd.f32 %v3014_v23, %v1878_v30 }
 0x3e5   : > { %v1897_v17 = vmax.f32 %v1879_v53, 0.0 }
 0x3ea   : > { %v1880_v5 = vpop.f32.mrf.mxu3 }
 0x3eb   : > { %v1881_v49 = vadd.f32 %v3014_v23, %v1880_v5 }
 0x3ed   : > { %v1898_v34 = vmax.f32 %v1881_v49, 0.0 }
 0x3ef   : > { %v1906_v39 = vpack.c.bf16 %v1898_v34, %v1897_v17 }
 0x3f1   : > { %2020 = vmatmul.bf16.gmra.mxu0 %v1906_v39 }
 0x3f7   : > { %v1986_v33 = vpop.f32.mrf.mxu0 }
 0x3f8   : > { %v1987_v6 = vadd.f32 %v4110_v57, %v1986_v33 }
 0x3fa   : > { %v2026_v35 = vmax.f32 %v1987_v6, 0.0 }
 0x3fc   : > { %v4114_v24 = vadd.f32 %v2026_v35, %v3899_v7 }
 0x3fe   : > { %2062 = vadd.xlane.f32.xlu1 %v4114_v24  ;;  %v2110_v23 = vmul.f32 %v4114_v24, %v4114_v24 }
 0x3ff   : > { %v1988_v62 = vpop.f32.mrf.mxu0 }
 0x400   : > { %v1989_v42 = vadd.f32 %v4110_v57, %v1988_v62  ;;  %2126 = vadd.xlane.f32.xlu0 %v2110_v23  ;;  %v2980_v62 = vld [vmem:[%s4491_s11 + $0x38] sm:$0xff] }
 0x401   : > { %2544 = vmatpush.bf16.msrb.mxu1 %v2980_v62 }
 0x402   : > { %v2027_v11 = vmax.f32 %v1989_v42, 0.0 }
 0x404   : > { %v4121_v47 = vadd.f32 %v2027_v11, %v3902_v38 }
 0x406   : > { %2064 = vadd.xlane.f32.xlu2 %v4121_v47  ;;  %v2111_v10 = vmul.f32 %v4121_v47, %v4121_v47 }
 0x407   : > { %v1991_v7 = vpop.f32.mrf.mxu0 }
 0x408   : > { %v1992_v50 = vadd.f32 %v4110_v57, %v1991_v7  ;;  %2128 = vadd.xlane.f32.xlu1 %v2111_v10 }
 0x40a   : > { %v2028_v25 = vmax.f32 %v1992_v50, 0.0 }
 0x40c   : > { %v4128_v19 = vadd.f32 %v2028_v25, %v3922_v29  ;;  %v2978_v25 = vld [vmem:[%s4491_s11 + $0x28] sm:$0xff] }
 0x40e   : > { %2066 = vadd.xlane.f32.xlu2 %v4128_v19  ;;  %v2112_v8 = vmul.f32 %v4128_v19, %v4128_v19 }
 0x40f   : > { %v1993_v38 = vpop.f32.mrf.mxu0 }
 0x410   : > { %v1994_v21 = vadd.f32 %v4110_v57, %v1993_v38  ;;  %2130 = vadd.xlane.f32.xlu1 %v2112_v8 }
 0x412   : > { %v2029_v14 = vmax.f32 %v1994_v21, 0.0 }
 0x414   : > { %v4135_v32 = vadd.f32 %v2029_v14, %v3925_v12 }
 0x416   : > { %2068 = vadd.xlane.f32.xlu0 %v4135_v32  ;;  %v2113_v26 = vmul.f32 %v4135_v32, %v4135_v32 }
 0x418   : > { %2132 = vadd.xlane.f32.xlu2 %v2113_v26 }
 0x41d   : > { %v1996_v29 = vpop.f32.mrf.mxu0 }
 0x41e   : > { %v1997_v44 = vadd.f32 %v4110_v57, %v1996_v29  ;;  %v2976_v29 = vld [vmem:[%s4491_s11 + $0x18] sm:$0xff] }
 0x420   : > { %v2030_v31 = vmax.f32 %v1997_v44, 0.0 }
 0x422   : > { %v4142_v37 = vadd.f32 %v2030_v31, %v3951_v28 }
 0x424   : > { %2070 = vadd.xlane.f32.xlu0 %v4142_v37  ;;  %v2114_v20 = vmul.f32 %v4142_v37, %v4142_v37 }
 0x425   : > { %v1998_v12 = vpop.f32.mrf.mxu0 }
 0x426   : > { %v1999_v13 = vadd.f32 %v4110_v57, %v1998_v12  ;;  %2134 = vadd.xlane.f32.xlu2 %v2114_v20 }
 0x428   : > { %v2031_v15 = vmax.f32 %v1999_v13, 0.0 }
 0x42a   : > { %v4149_v40 = vadd.f32 %v2031_v15, %v3954_v58 }
 0x42c   : > { %2072 = vadd.xlane.f32.xlu1 %v4149_v40  ;;  %v2115_v16 = vmul.f32 %v4149_v40, %v4149_v40 }
 0x42e   : > { %v2001_v28 = vpop.f32.mrf.mxu0  ;;  %2136 = vadd.xlane.f32.xlu0 %v2115_v16  ;;  %v2975_v16 = vld [vmem:[%s4491_s11 + $0x10] sm:$0xff] }
 0x42f   : > { %v2002_v0 = vadd.f32 %v4110_v57, %v2001_v28 }
 0x431   : > { %v2032_v52 = vmax.f32 %v2002_v0, 0.0 }
 0x433   : > { %v4156_v51 = vadd.f32 %v2032_v52, %v3977_v4 }
 0x435   : > { %2074 = vadd.xlane.f32.xlu1 %v4156_v51  ;;  %v2116_v46 = vmul.f32 %v4156_v51, %v4156_v51 }
 0x436   : > { %v2003_v58 = vpop.f32.mrf.mxu0 }
 0x437   : > { %v2004_v55 = vadd.f32 %v4110_v57, %v2003_v58  ;;  %2138 = vadd.xlane.f32.xlu0 %v2116_v46 }
 0x439   : > { %v2033_v1 = vmax.f32 %v2004_v55, 0.0  ;;  %v2974_v55 = vld [vmem:[%s4491_s11 + $0x8] sm:$0xff] }
 0x43b   : > { %v4163_v56 = vadd.f32 %v2033_v1, %v3980_v48 }
 0x43d   : > { %2076 = vadd.xlane.f32.xlu2 %v4163_v56  ;;  %v2117_v41 = vmul.f32 %v4163_v56, %v4163_v56 }
 0x43e   : > { %v2006_v4 = vpop.f32.mrf.mxu0 }
 0x43f   : > { %2140 = vadd.xlane.f32.xlu1 %v2117_v41  ;;  %v2007_v61 = vadd.f32 %v4110_v57, %v2006_v4 }
 0x441   : > { %v2034_v60 = vmax.f32 %v2007_v61, 0.0 }
 0x443   : > { %v4170_v27 = vadd.f32 %v2034_v60, %v4015_v3 }
 0x445   : > { %2078 = vadd.xlane.f32.xlu2 %v4170_v27  ;;  %v2118_v18 = vmul.f32 %v4170_v27, %v4170_v27 }
 0x446   : > { %v2008_v48 = vpop.f32.mrf.mxu0 }
 0x447   : > { %v2009_v36 = vadd.f32 %v4110_v57, %v2008_v48  ;;  %2142 = vadd.xlane.f32.xlu1 %v2118_v18  ;;  %v2973_v48 = vld [vmem:[%s4491_s11] sm:$0xff] }
 0x449   : > { %v2035_v30 = vmax.f32 %v2009_v36, 0.0 }
 0x44b   : > { %v4177_v53 = vadd.f32 %v2035_v30, %v4018_v63 }
 0x44d   : > { %2080 = vadd.xlane.f32.xlu0 %v4177_v53  ;;  %v2119_v5 = vmul.f32 %v4177_v53, %v4177_v53 }
 0x44e   : > { %v2011_v3 = vpop.f32.mrf.mxu0 }
 0x44f   : > { %v2012_v49 = vadd.f32 %v4110_v57, %v2011_v3  ;;  %2144 = vadd.xlane.f32.xlu2 %v2119_v5 }
 0x451   : > { %v2036_v17 = vmax.f32 %v2012_v49, 0.0 }
 0x453   : > { %v4184_v34 = vadd.f32 %v2036_v17, %v4056_v22 }
 0x455   : > { %2082 = vadd.xlane.f32.xlu0 %v4184_v34  ;;  %v2120_v39 = vmul.f32 %v4184_v34, %v4184_v34 }
 0x456   : > { %v2013_v63 = vpop.f32.mrf.mxu0 }
 0x457   : > { %v2014_v33 = vadd.f32 %v4110_v57, %v2013_v63  ;;  %2146 = vadd.xlane.f32.xlu2 %v2120_v39 }
 0x459   : > { %v2037_v6 = vmax.f32 %v2014_v33, 0.0 }
 0x45b   : > { %v4191_v35 = vadd.f32 %v2037_v6, %v4059_v2  ;;  %v2979_v2 = vld [vmem:[%s4491_s11 + $0x30] sm:$0xff] }
 0x45c   : > { %2545 = vmatpush.bf16.msrb.mxu1 %v2979_v2 }
 0x45d   : > { %2084 = vadd.xlane.f32.xlu1 %v4191_v35  ;;  %v2121_v23 = vmul.f32 %v4191_v35, %v4191_v35 }
 0x45e   : > { %v2016_v22 = vpop.f32.mrf.mxu0 }
 0x45f   : > { %v2017_v42 = vadd.f32 %v4110_v57, %v2016_v22  ;;  %2148 = vadd.xlane.f32.xlu0 %v2121_v23 }
 0x460   : > { %2546 = vmatpush.bf16.msrb.mxu1 %v2978_v25 }
 0x461   : > { %v2038_v11 = vmax.f32 %v2017_v42, 0.0 }
 0x463   : > { %v4204_v10 = vadd.f32 %v2038_v11, %v4077_v54  ;;  %v2977_v54 = vld [vmem:[%s4491_s11 + $0x20] sm:$0xff] }
 0x464   : > { %2547 = vmatpush.bf16.msrb.mxu1 %v2977_v54 }
 0x465   : > { %2086 = vadd.xlane.f32.xlu1 %v4204_v10  ;;  %v2122_v7 = vmul.f32 %v4204_v10, %v4204_v10 }
 0x466   : > { %v2018_v50 = vpop.f32.mrf.mxu0 }
 0x467   : > { %v2019_v8 = vadd.f32 %v4110_v57, %v2018_v50  ;;  %2150 = vadd.xlane.f32.xlu0 %v2122_v7 }
 0x468   : > { %2548 = vmatpush.bf16.msrb.mxu1 %v2976_v29 }
 0x469   : > { %v2039_v38 = vmax.f32 %v2019_v8, 0.0 }
 0x46b   : > { %v4217_v21 = vadd.f32 %v2039_v38, %v4080_v45 }
 0x46c   : > { %2549 = vmatpush.bf16.msrb.mxu1 %v2975_v16 }
 0x46d   : > { %2088 = vadd.xlane.f32.xlu2 %v4217_v21  ;;  %v2123_v14 = vmul.f32 %v4217_v21, %v4217_v21 }
 0x46e   : > { %v2021_v26 = vpop.f32.mrf.mxu0 }
 0x46f   : > { %v2022_v44 = vadd.f32 %v4110_v57, %v2021_v26  ;;  %2152 = vadd.xlane.f32.xlu1 %v2123_v14 }
 0x470   : > { %2550 = vmatpush.bf16.msrb.mxu1 %v2974_v55  ;;  %v4277_v55 = vld [vmem:[%s4489_s9 + $0x1] ss:$0 sm:$0xff] }
 0x471   : > { %v2063_v31 = vpop.xlane.xlu1 %2062  ;;  %v2040_v45 = vmax.f32 %v2022_v44, 0.0 }
 0x472   : > { %v4227_v20 = vmul.f32 %v2063_v31, %v3369_v43 }
 0x473   : > { %v2127_v12 = vpop.xlane.xlu0 %2126  ;;  %v4236_v28 = vadd.f32 %v2040_v45, %v4097_v59 }
 0x474   : > { %v2174_v13 = vmul.f32 %v4227_v20, %v4227_v20  ;;  %v2158_v15 = vmul.f32 %v2127_v12, %v3369_v43  ;;  %2551 = vmatpush.bf16.msrb.mxu1 %v2973_v48 }
 0x475   : > { %2090 = vadd.xlane.f32.xlu2 %v4236_v28  ;;  %v2124_v52 = vmul.f32 %v4236_v28, %v4236_v28 }
 0x476   : > { %v2190_v0 = vsub.f32 %v2158_v15, %v2174_v13  ;;  %v2023_v58 = vpop.f32.mrf.mxu0  ;;  %v2222_v13 = vsub.f32 %v4114_v24, %v4227_v20 }
 0x477   : > { %v2024_v1 = vadd.f32 %v4110_v57, %v2023_v58  ;;  %2154 = vadd.xlane.f32.xlu1 %v2124_v52 }
 0x478   : > { %v2206_v46 = vmax.f32 %v2190_v0, 0.0 }
 0x479   : > { %v2065_v41 = vpop.xlane.xlu2 %2064  ;;  %v2041_v61 = vmax.f32 %v2024_v1, 0.0 }
 0x47a   : > { %v2238_v4 = vadd.f32 1e-05, %v2206_v46  ;;  %v4246_v59 = vmul.f32 %v2065_v41, %v3369_v43 }
 0x47b   : > { %v2129_v60 = vpop.xlane.xlu1 %2128  ;;  %v4254_v36 = vadd.f32 %v2041_v61, %v4100_v9 }
 0x47c   : > { %3085 = vrsqrt.f32 %v2238_v4  ;;  %v2175_v18 = vmul.f32 %v4246_v59, %v4246_v59  ;;  %v2159_v57 = vmul.f32 %v2129_v60, %v3369_v43  ;;  %vm2260_vm10 = vweird.f32 %v2238_v4 }
 0x47d   : > { %2092 = vadd.xlane.f32.xlu0 %v4254_v36  ;;  %v2125_v5 = vmul.f32 %v4254_v36, %v4254_v36  ;;  %v2223_v41 = vsub.f32 %v4121_v47, %v4246_v59 }
 0x47e   : > { %v2191_v30 = vsub.f32 %v2159_v57, %v2175_v18  ;;  %v4285_v18 = vld [vmem:[%s4490_s10 + $0x1] ss:$0 sm:$0xff] }
 0x47f   : > { %2156 = vadd.xlane.f32.xlu2 %v2125_v5 }
 0x480   : > { %v2207_v3 = vmax.f32 %v2191_v30, 0.0 }
 0x481   : > { %v2067_v49 = vpop.xlane.xlu2 %2066 }
 0x482   : > { %v3086_v17 = vpop.eup %3085  ;;  %v4261_v39 = vmul.f32 %v2067_v49, %v3369_v43  ;;  %v2239_v33 = vadd.f32 1e-05, %v2207_v3 }
 0x483   : > { %v2255_v63 = vmul.f32 %v3086_v17, %v2238_v4  ;;  %v2131_v9 = vpop.xlane.xlu1 %2130  ;;  %vm2261_vm9 = vweird.f32 %v3086_v17 }
 0x484   : > { %v2176_v6 = vmul.f32 %v4261_v39, %v4261_v39  ;;  %v2160_v23 = vmul.f32 %v2131_v9, %v3369_v43  ;;  %3087 = vrsqrt.f32 %v2239_v33  ;;  %vm2262_vm11 = vmor %vm2260_vm10, %vm2261_vm9  ;;  %vm2270_vm13 = vweird.f32 %v2239_v33 }
 0x485   : > { %v2256_v22 = vmul.f32 %v3086_v17, %v2255_v63 }
 0x486   : > { %v2192_v62 = vsub.f32 %v2160_v23, %v2176_v6 }
 0x487   : > { %v2257_v42 = vmul.f32 0.5, %v2256_v22 }
 0x488   : > { %v2208_v11 = vmax.f32 %v2192_v62, 0.0 }
 0x489   : > { %v2258_v2 = vsub.f32 1.5, %v2257_v42  ;;  %v2069_v7 = vpop.xlane.xlu0 %2068 }
 0x48a   : > { %v2240_v50 = vadd.f32 1e-05, %v2208_v11  ;;  %v4267_v25 = vmul.f32 %v2069_v7, %v3369_v43  ;;  %v3088_v8 = vpop.eup %3087  ;;  %v2224_v7 = vsub.f32 %v4128_v19, %v4261_v39 }
 0x48b   : > { %v2133_v38 = vpop.xlane.xlu2 %2132  ;;  %v2259_v54 = vmul.f32 %v3086_v17, %v2258_v2  ;;  %v2265_v14 = vmul.f32 %v3088_v8, %v2239_v33  ;;  %vm2271_vm12 = vweird.f32 %v3088_v8 }
 0x48c   : > { %3089 = vrsqrt.f32 %v2240_v50  ;;  %v2177_v26 = vmul.f32 %v4267_v25, %v4267_v25  ;;  %v2161_v29 = vmul.f32 %v2133_v38, %v3369_v43  ;;  %vm2272_vm14 = vmor %vm2270_vm13, %vm2271_vm12  ;;  %vm2280_vm1 = vweird.f32 %v2240_v50 }
 0x48d   : > { %v2266_v44 = vmul.f32 %v3088_v8, %v2265_v14  ;;  %v2263_v12 = vsel %vm2262_vm11, %v3086_v17, %v2259_v54 }
 0x48e   : > { %v2193_v31 = vsub.f32 %v2161_v29, %v2177_v26  ;;  %v2414_v58 = vmul.f32 %v2263_v12, %v2222_v13 }
 0x48f   : > { %v2267_v45 = vmul.f32 0.5, %v2266_v44 }
 0x490   : > { %v2209_v15 = vmax.f32 %v2193_v31, 0.0  ;;  %v2433_v60 = vmul.f32 %v4277_v55, %v2414_v58  ;;  %v2225_v31 = vsub.f32 %v4135_v32, %v4267_v25 }
 0x491   : > { %v2268_v0 = vsub.f32 1.5, %v2267_v45 }
 0x492   : > { %v3090_v16 = vpop.eup %3089  ;;  %v2241_v46 = vadd.f32 1e-05, %v2209_v15  ;;  %v2452_v17 = vadd.f32 %v4285_v18, %v2433_v60 }
 0x493   : > { %v2275_v52 = vmul.f32 %v3090_v16, %v2240_v50  ;;  %v2269_v1 = vmul.f32 %v3088_v8, %v2268_v0  ;;  %vm2281_vm15 = vweird.f32 %v3090_v16 }
 0x494   : > { %3091 = vrsqrt.f32 %v2241_v46  ;;  %vm2282_vm2 = vmor %vm2280_vm1, %vm2281_vm15  ;;  %vm2290_vm4 = vweird.f32 %v2241_v46 }
 0x495   : > { %v2276_v4 = vmul.f32 %v3090_v16, %v2275_v52  ;;  %v2273_v24 = vsel %vm2272_vm14, %v3088_v8, %v2269_v1 }
 0x496   : > { %v2415_v61 = vmul.f32 %v2273_v24, %v2223_v41 }
 0x497   : > { %v2277_v20 = vmul.f32 0.5, %v2276_v4  ;;  %v2071_v48 = vpop.xlane.xlu0 %2070 }
 0x498   : > { %v4288_v30 = vmul.f32 %v2071_v48, %v3369_v43  ;;  %v2434_v47 = vmul.f32 %v4277_v55, %v2415_v61 }
 0x499   : > { %v2278_v57 = vsub.f32 1.5, %v2277_v20  ;;  %v2135_v59 = vpop.xlane.xlu2 %2134 }
 0x49a   : > { %v3092_v5 = vpop.eup %3091  ;;  %v2178_v3 = vmul.f32 %v4288_v30, %v4288_v30  ;;  %v2162_v49 = vmul.f32 %v2135_v59, %v3369_v43  ;;  %v2453_v63 = vadd.f32 %v4285_v18, %v2434_v47 }
 0x49b   : > { %v2285_v33 = vmul.f32 %v3092_v5, %v2241_v46  ;;  %v2279_v9 = vmul.f32 %v3090_v16, %v2278_v57  ;;  %vm2291_vm3 = vweird.f32 %v3092_v5 }
 0x49c   : > { %v2194_v6 = vsub.f32 %v2162_v49, %v2178_v3  ;;  %v2468_v23 = vpack.c.bf16 %v2453_v63, %v2452_v17  ;;  %vm2292_vm5 = vmor %vm2290_vm4, %vm2291_vm3 }
 0x49d   : > { %v2286_v22 = vmul.f32 %v3092_v5, %v2285_v33  ;;  %v2283_v2 = vsel %vm2282_vm2, %v3090_v16, %v2279_v9 }
 0x49e   : > { %v2210_v62 = vmax.f32 %v2194_v6, 0.0  ;;  %2552 = vmatmul.bf16.vlgmr.msrb.gmra.mxu1 %v2468_v23  ;;  %v2416_v26 = vmul.f32 %v2283_v2, %v2224_v7 }
 0x49f   : > { %v2287_v42 = vmul.f32 0.5, %v2286_v22  ;;  %v2073_v11 = vpop.xlane.xlu1 %2072 }
 0x4a0   : > { %v2242_v8 = vadd.f32 1e-05, %v2210_v62  ;;  %v4299_v38 = vmul.f32 %v2073_v11, %v3369_v43  ;;  %v2435_v12 = vmul.f32 %v4277_v55, %v2416_v26 }
 0x4a1   : > { %v2288_v54 = vsub.f32 1.5, %v2287_v42  ;;  %v2137_v14 = vpop.xlane.xlu0 %2136  ;;  %v2226_v42 = vsub.f32 %v4142_v37, %v4288_v30 }
 0x4a2   : > { %3093 = vrsqrt.f32 %v2242_v8  ;;  %v2179_v50 = vmul.f32 %v4299_v38, %v4299_v38  ;;  %v2163_v29 = vmul.f32 %v2137_v14, %v3369_v43  ;;  %v2454_v41 = vadd.f32 %v4285_v18, %v2435_v12 }
 0x4a3   : > { %v2289_v44 = vmul.f32 %v3092_v5, %v2288_v54  ;;  %vm2300_vm7 = vweird.f32 %v2242_v8 }
 0x4a4   : > { %v2195_v19 = vsub.f32 %v2163_v29, %v2179_v50 }
 0x4a5   : > { %v2293_v39 = vsel %vm2292_vm5, %v3092_v5, %v2289_v44  ;;  %v2227_v44 = vsub.f32 %v4149_v40, %v4299_v38 }
 0x4a6   : > { %v2417_v45 = vmul.f32 %v2293_v39, %v2225_v31  ;;  %v2211_v13 = vmax.f32 %v2195_v19, 0.0 }
 0x4a8   : > { %v2075_v15 = vpop.xlane.xlu1 %2074  ;;  %v3094_v16 = vpop.eup %3093  ;;  %v2436_v52 = vmul.f32 %v4277_v55, %v2417_v45  ;;  %v2243_v58 = vadd.f32 1e-05, %v2211_v13 }
 0x4a9   : > { %v4308_v0 = vmul.f32 %v2075_v15, %v3369_v43  ;;  %v2295_v46 = vmul.f32 %v3094_v16, %v2242_v8  ;;  %vm2301_vm6 = vweird.f32 %v3094_v16 }
 0x4aa   : > { %v2139_v1 = vpop.xlane.xlu0 %2138  ;;  %v2455_v4 = vadd.f32 %v4285_v18, %v2436_v52  ;;  %3095 = vrsqrt.f32 %v2243_v58  ;;  %vm2302_vm8 = vmor %vm2300_vm7, %vm2301_vm6  ;;  %vm2310_vm10 = vweird.f32 %v2243_v58 }
 0x4ab   : > { %v2180_v32 = vmul.f32 %v4308_v0, %v4308_v0  ;;  %v2164_v25 = vmul.f32 %v2139_v1, %v3369_v43  ;;  %v2296_v24 = vmul.f32 %v3094_v16, %v2295_v46 }
 0x4ac   : > { %v2469_v61 = vpack.c.bf16 %v2455_v4, %v2454_v41 }
 0x4ad   : > { %v2196_v20 = vsub.f32 %v2164_v25, %v2180_v32  ;;  %v2297_v60 = vmul.f32 0.5, %v2296_v24 }
 0x4ae   : > { %2557 = vmatmul.bf16.gmra.mxu1 %v2469_v61 }
 0x4af   : > { %v2212_v48 = vmax.f32 %v2196_v20, 0.0  ;;  %v2298_v57 = vsub.f32 1.5, %v2297_v60 }
 0x4b0   : > { %v2077_v47 = vpop.xlane.xlu2 %2076  ;;  %v3096_v3 = vpop.eup %3095 }
 0x4b1   : > { %v2244_v59 = vadd.f32 1e-05, %v2212_v48  ;;  %v4317_v5 = vmul.f32 %v2077_v47, %v3369_v43  ;;  %v2305_v17 = vmul.f32 %v3096_v3, %v2243_v58  ;;  %v2299_v63 = vmul.f32 %v3094_v16, %v2298_v57 }
 0x4b2   : > { %v2141_v49 = vpop.xlane.xlu1 %2140  ;;  %vm2311_vm9 = vweird.f32 %v3096_v3 }
 0x4b3   : > { %3097 = vrsqrt.f32 %v2244_v59  ;;  %v2181_v33 = vmul.f32 %v4317_v5, %v4317_v5  ;;  %v2165_v9 = vmul.f32 %v2141_v49, %v3369_v43  ;;  %v2306_v6 = vmul.f32 %v3096_v3, %v2305_v17  ;;  %vm2312_vm11 = vmor %vm2310_vm10, %vm2311_vm9 }
 0x4b4   : > { %v2303_v62 = vsel %vm2302_vm8, %v3094_v16, %v2299_v63  ;;  %vm2320_vm13 = vweird.f32 %v2244_v59 }
 0x4b5   : > { %v2197_v23 = vsub.f32 %v2165_v9, %v2181_v33  ;;  %v2307_v22 = vmul.f32 0.5, %v2306_v6  ;;  %v2418_v26 = vmul.f32 %v2303_v62, %v2226_v42 }
 0x4b7   : > { %v2213_v11 = vmax.f32 %v2197_v23, 0.0  ;;  %v2308_v7 = vsub.f32 1.5, %v2307_v22  ;;  %v2437_v13 = vmul.f32 %v4277_v55, %v2418_v26  ;;  %v2229_v22 = vsub.f32 %v4163_v56, %v4317_v5 }
 0x4b8   : > { %v2079_v50 = vpop.xlane.xlu2 %2078 }
 0x4b9   : > { %v3098_v2 = vpop.eup %3097  ;;  %v2245_v14 = vadd.f32 1e-05, %v2213_v11  ;;  %v4325_v29 = vmul.f32 %v2079_v50, %v3369_v43  ;;  %v2309_v8 = vmul.f32 %v3096_v3, %v2308_v7  ;;  %v2456_v58 = vadd.f32 %v4285_v18, %v2437_v13 }
 0x4ba   : > { %v2315_v54 = vmul.f32 %v3098_v2, %v2244_v59  ;;  %v2143_v37 = vpop.xlane.xlu1 %2142  ;;  %vm2321_vm12 = vweird.f32 %v3098_v2 }
 0x4bb   : > { %3099 = vrsqrt.f32 %v2245_v14  ;;  %v2182_v30 = vmul.f32 %v4325_v29, %v4325_v29  ;;  %v2166_v19 = vmul.f32 %v2143_v37, %v3369_v43  ;;  %v2313_v39 = vsel %vm2312_vm11, %v3096_v3, %v2309_v8  ;;  %vm2322_vm14 = vmor %vm2320_vm13, %vm2321_vm12 }
 0x4bc   : > { %v2316_v31 = vmul.f32 %v3098_v2, %v2315_v54  ;;  %v2419_v12 = vmul.f32 %v2313_v39, %v2227_v44  ;;  %v2228_v3 = vsub.f32 %v4156_v51, %v4308_v0  ;;  %vm2330_vm1 = vweird.f32 %v2245_v14 }
 0x4bd   : > { %v2198_v15 = vsub.f32 %v2166_v19, %v2182_v30 }
 0x4be   : > { %v2317_v45 = vmul.f32 0.5, %v2316_v31  ;;  %v2438_v52 = vmul.f32 %v4277_v55, %v2419_v12 }
 0x4bf   : > { %v2214_v46 = vmax.f32 %v2198_v15, 0.0 }
 0x4c0   : > { %v2318_v16 = vsub.f32 1.5, %v2317_v45  ;;  %v2081_v38 = vpop.xlane.xlu0 %2080  ;;  %v2457_v1 = vadd.f32 %v4285_v18, %v2438_v52 }
 0x4c1   : > { %v3100_v40 = vpop.eup %3099  ;;  %v2246_v25 = vadd.f32 1e-05, %v2214_v46  ;;  %v4337_v41 = vmul.f32 %v2081_v38, %v3369_v43 }
 0x4c2   : > { %v2325_v32 = vmul.f32 %v3100_v40, %v2245_v14  ;;  %v2319_v4 = vmul.f32 %v3098_v2, %v2318_v16  ;;  %v2145_v24 = vpop.xlane.xlu2 %2144  ;;  %v2470_v20 = vpack.c.bf16 %v2457_v1, %v2456_v58  ;;  %vm2331_vm15 = vweird.f32 %v3100_v40 }
 0x4c3   : > { %3101 = vrsqrt.f32 %v2246_v25  ;;  %v2183_v60 = vmul.f32 %v4337_v41, %v4337_v41  ;;  %v2167_v48 = vmul.f32 %v2145_v24, %v3369_v43  ;;  %vm2332_vm2 = vmor %vm2330_vm1, %vm2331_vm15  ;;  %vm2340_vm4 = vweird.f32 %v2246_v25 }
 0x4c4   : > { %v2326_v61 = vmul.f32 %v3100_v40, %v2325_v32  ;;  %2562 = vmatmul.bf16.gmra.mxu1 %v2470_v20  ;;  %v2323_v47 = vsel %vm2322_vm14, %v3098_v2, %v2319_v4  ;;  %v2230_v1 = vsub.f32 %v4170_v27, %v4325_v29  ;;  %v2231_v27 = vsub.f32 %v4177_v53, %v4337_v41 }
 0x4c5   : > { %v2199_v49 = vsub.f32 %v2167_v48, %v2183_v60  ;;  %v2420_v59 = vmul.f32 %v2323_v47, %v2228_v3 }
 0x4c6   : > { %v2327_v57 = vmul.f32 0.5, %v2326_v61 }
 0x4c7   : > { %v2215_v63 = vmax.f32 %v2199_v49, 0.0  ;;  %v2439_v14 = vmul.f32 %v4277_v55, %v2420_v59 }
 0x4c8   : > { %v2328_v17 = vsub.f32 1.5, %v2327_v57  ;;  %v2083_v33 = vpop.xlane.xlu0 %2082 }
 0x4c9   : > { %v3102_v9 = vpop.eup %3101  ;;  %v4345_v6 = vmul.f32 %v2083_v33, %v3369_v43  ;;  %v2247_v42 = vadd.f32 1e-05, %v2215_v63  ;;  %v2458_v31 = vadd.f32 %v4285_v18, %v2439_v14 }
 0x4ca   : > { %v2329_v23 = vmul.f32 %v3100_v40, %v2328_v17  ;;  %v2335_v62 = vmul.f32 %v3102_v9, %v2246_v25  ;;  %v2147_v11 = vpop.xlane.xlu2 %2146  ;;  %vm2341_vm3 = vweird.f32 %v3102_v9 }
 0x4cb   : > { %v2184_v51 = vmul.f32 %v4345_v6, %v4345_v6  ;;  %v2168_v0 = vmul.f32 %v2147_v11, %v3369_v43  ;;  %3103 = vrsqrt.f32 %v2247_v42  ;;  %vm2342_vm5 = vmor %vm2340_vm4, %vm2341_vm3  ;;  %vm2350_vm7 = vweird.f32 %v2247_v42 }
 0x4cc   : > { %v2333_v2 = vsel %vm2332_vm2, %v3100_v40, %v2329_v23  ;;  %v2336_v7 = vmul.f32 %v3102_v9, %v2335_v62 }
 0x4cd   : > { %v2421_v54 = vmul.f32 %v2333_v2, %v2229_v22  ;;  %v2200_v50 = vsub.f32 %v2168_v0, %v2184_v51 }
 0x4ce   : > { %v2337_v26 = vmul.f32 0.5, %v2336_v7 }
 0x4cf   : > { %v2440_v8 = vmul.f32 %v4277_v55, %v2421_v54  ;;  %v2216_v56 = vmax.f32 %v2200_v50, 0.0 }
 0x4d0   : > { %v2338_v5 = vsub.f32 1.5, %v2337_v26  ;;  %v2085_v44 = vpop.xlane.xlu1 %2084 }
 0x4d1   : > { %v2459_v37 = vadd.f32 %v4285_v18, %v2440_v8  ;;  %v2248_v30 = vadd.f32 1e-05, %v2216_v56  ;;  %v4357_v19 = vmul.f32 %v2085_v44, %v3369_v43  ;;  %v3104_v39 = vpop.eup %3103 }
 0x4d2   : > { %v2149_v45 = vpop.xlane.xlu0 %2148  ;;  %v2345_v13 = vmul.f32 %v3104_v39, %v2247_v42  ;;  %v2339_v15 = vmul.f32 %v3102_v9, %v2338_v5  ;;  %vm2351_vm6 = vweird.f32 %v3104_v39 }
 0x4d3   : > { %v2471_v12 = vpack.c.bf16 %v2459_v37, %v2458_v31  ;;  %3105 = vrsqrt.f32 %v2248_v30  ;;  %v2185_v16 = vmul.f32 %v4357_v19, %v4357_v19  ;;  %v2169_v52 = vmul.f32 %v2149_v45, %v3369_v43  ;;  %vm2352_vm8 = vmor %vm2350_vm7, %vm2351_vm6 }
 0x4d4   : > { %v2346_v46 = vmul.f32 %v3104_v39, %v2345_v13  ;;  %v2343_v58 = vsel %vm2342_vm5, %v3102_v9, %v2339_v15  ;;  %vm2360_vm10 = vweird.f32 %v2248_v30  ;;  %v2232_v31 = vsub.f32 %v4184_v34, %v4345_v6 }
 0x4d5   : > { %2567 = vmatmul.bf16.gmra.mxu1 %v2471_v12  ;;  %v2201_v40 = vsub.f32 %v2169_v52, %v2185_v16  ;;  %v2422_v25 = vmul.f32 %v2343_v58, %v2230_v1  ;;  %v2233_v6 = vsub.f32 %v4191_v35, %v4357_v19 }
 0x4d6   : > { %v2347_v38 = vmul.f32 0.5, %v2346_v46 }
 0x4d7   : > { %v2217_v32 = vmax.f32 %v2201_v40, 0.0  ;;  %v2441_v9 = vmul.f32 %v4277_v55, %v2422_v25 }
 0x4d8   : > { %v2087_v4 = vpop.xlane.xlu1 %2086  ;;  %v2348_v20 = vsub.f32 1.5, %v2347_v38 }
 0x4d9   : > { %v3106_v24 = vpop.eup %3105  ;;  %v4365_v61 = vmul.f32 %v2087_v4, %v3369_v43  ;;  %v2249_v48 = vadd.f32 1e-05, %v2217_v32  ;;  %v2460_v0 = vadd.f32 %v4285_v18, %v2441_v9 }
 0x4da   : > { %v2355_v60 = vmul.f32 %v3106_v24, %v2248_v30  ;;  %v2151_v57 = vpop.xlane.xlu0 %2150  ;;  %v2349_v49 = vmul.f32 %v3104_v39, %v2348_v20  ;;  %vm2361_vm9 = vweird.f32 %v3106_v24 }
 0x4db   : > { %v2186_v47 = vmul.f32 %v4365_v61, %v4365_v61  ;;  %v2170_v3 = vmul.f32 %v2151_v57, %v3369_v43  ;;  %3107 = vrsqrt.f32 %v2249_v48  ;;  %vm2362_vm11 = vmor %vm2360_vm10, %vm2361_vm9  ;;  %vm2370_vm13 = vweird.f32 %v2249_v48 }
 0x4dc   : > { %v2356_v29 = vmul.f32 %v3106_v24, %v2355_v60  ;;  %v2353_v63 = vsel %vm2352_vm8, %v3104_v39, %v2349_v49 }
 0x4dd   : > { %v2202_v17 = vsub.f32 %v2170_v3, %v2186_v47  ;;  %v2423_v59 = vmul.f32 %v2353_v63, %v2231_v27 }
 0x4de   : > { %v2357_v33 = vmul.f32 0.5, %v2356_v29 }
 0x4df   : > { %v2218_v23 = vmax.f32 %v2202_v17, 0.0  ;;  %v2442_v42 = vmul.f32 %v4277_v55, %v2423_v59 }
 0x4e0   : > { %v2358_v22 = vsub.f32 1.5, %v2357_v33  ;;  %v2089_v62 = vpop.xlane.xlu2 %2088 }
 0x4e1   : > { %v4374_v11 = vadd.f32 1e-05, %v2218_v23  ;;  %v4377_v51 = vmul.f32 %v2089_v62, %v3369_v43  ;;  %v3108_v53 = vpop.eup %3107  ;;  %v2461_v2 = vadd.f32 %v4285_v18, %v2442_v42  ;;  %v2234_v62 = vsub.f32 %v4204_v10, %v4365_v61 }
 0x4e2   : > { %v2153_v41 = vpop.xlane.xlu1 %2152  ;;  %v2365_v7 = vmul.f32 %v3108_v53, %v2249_v48  ;;  %v2359_v54 = vmul.f32 %v3106_v24, %v2358_v22  ;;  %vm2371_vm12 = vweird.f32 %v3108_v53 }
 0x4e3   : > { %3109 = vrsqrt.f32 %v4374_v11  ;;  %v2187_v14 = vmul.f32 %v4377_v51, %v4377_v51  ;;  %v2171_v50 = vmul.f32 %v2153_v41, %v3369_v43  ;;  %v2472_v26 = vpack.c.bf16 %v2461_v2, %v2460_v0  ;;  %vm2372_vm14 = vmor %vm2370_vm13, %vm2371_vm12 }
 0x4e4   : > { %v2366_v8 = vmul.f32 %v3108_v53, %v2365_v7  ;;  %v2363_v44 = vsel %vm2362_vm11, %v3106_v24, %v2359_v54  ;;  %vm2380_vm1 = vweird.f32 %v4374_v11 }
 0x4e5   : > { %v2203_v56 = vsub.f32 %v2171_v50, %v2187_v14  ;;  %2572 = vmatmul.bf16.gmra.mxu1 %v2472_v26  ;;  %v2424_v52 = vmul.f32 %v2363_v44, %v2232_v31 }
 0x4e6   : > { %v2367_v5 = vmul.f32 0.5, %v2366_v8 }
 0x4e7   : > { %v2219_v37 = vmax.f32 %v2203_v56, 0.0  ;;  %v2443_v24 = vmul.f32 %v4277_v55, %v2424_v52 }
 0x4e8   : > { %v2091_v39 = vpop.xlane.xlu2 %2090  ;;  %v2368_v12 = vsub.f32 1.5, %v2367_v5 }
 0x4e9   : > { %v3110_v45 = vpop.eup %3109  ;;  %v4388_v13 = vmul.f32 %v2091_v39, %v3369_v43  ;;  %v2251_v30 = vadd.f32 1e-05, %v2219_v37  ;;  %v2462_v35 = vadd.f32 %v4285_v18, %v2443_v24 }
 0x4ea   : > { %v2375_v15 = vmul.f32 %v3110_v45, %v4374_v11  ;;  %v2155_v16 = vpop.xlane.xlu1 %2154  ;;  %v2369_v34 = vmul.f32 %v3108_v53, %v2368_v12  ;;  %vm2381_vm15 = vweird.f32 %v3110_v45  ;;  %v2235_v11 = vsub.f32 %v4217_v21, %v4377_v51 }
 0x4eb   : > { %v2188_v46 = vmul.f32 %v4388_v13, %v4388_v13  ;;  %v2172_v40 = vmul.f32 %v2155_v16, %v3369_v43  ;;  %3111 = vrsqrt.f32 %v2251_v30  ;;  %vm2382_vm2 = vmor %vm2380_vm1, %vm2381_vm15  ;;  %vm2390_vm4 = vweird.f32 %v2251_v30 }
 0x4ec   : > { %v2376_v38 = vmul.f32 %v3110_v45, %v2375_v15  ;;  %v2373_v1 = vsel %vm2372_vm14, %v3108_v53, %v2369_v34  ;;  %v2236_v12 = vsub.f32 %v4236_v28, %v4388_v13  ;;  %v4421_v13 = vld [vmem:[%s4492_s12] ss:$0 sm:$0xff] }
 0x4ed   : > { %v2204_v58 = vsub.f32 %v2172_v40, %v2188_v46  ;;  %v2425_v4 = vmul.f32 %v2373_v1, %v2233_v6 }
 0x4ee   : > { %v2377_v32 = vmul.f32 0.5, %v2376_v38 }
 0x4ef   : > { %v2220_v20 = vmax.f32 %v2204_v58, 0.0  ;;  %v2444_v57 = vmul.f32 %v4277_v55, %v2425_v4 }
 0x4f0   : > { %v2378_v60 = vsub.f32 1.5, %v2377_v32  ;;  %v2093_v48 = vpop.xlane.xlu0 %2092 }
 0x4f1   : > { %v2252_v25 = vadd.f32 1e-05, %v2220_v20  ;;  %v2109_v47 = vmul.f32 %v2093_v48, %v3369_v43  ;;  %v3112_v3 = vpop.eup %3111  ;;  %v2463_v19 = vadd.f32 %v4285_v18, %v2444_v57 }
 0x4f2   : > { %v2157_v49 = vpop.xlane.xlu2 %2156  ;;  %v2385_v27 = vmul.f32 %v3112_v3, %v2251_v30  ;;  %v2379_v29 = vmul.f32 %v3110_v45, %v2378_v60  ;;  %vm2391_vm3 = vweird.f32 %v3112_v3 }
 0x4f3   : > { %3113 = vrsqrt.f32 %v2252_v25  ;;  %v2189_v17 = vmul.f32 %v2109_v47, %v2109_v47  ;;  %v2173_v63 = vmul.f32 %v2157_v49, %v3369_v43  ;;  %v2473_v33 = vpack.c.bf16 %v2463_v19, %v2462_v35  ;;  %vm2392_vm5 = vmor %vm2390_vm4, %vm2391_vm3 }
 0x4f4   : > { %v2386_v59 = vmul.f32 %v3112_v3, %v2385_v27  ;;  %v2383_v22 = vsel %vm2382_vm2, %v3110_v45, %v2379_v29  ;;  %vm2400_vm7 = vweird.f32 %v2252_v25  ;;  %v2237_v52 = vsub.f32 %v4254_v36, %v2109_v47 }
 0x4f5   : > { %v2205_v9 = vsub.f32 %v2173_v63, %v2189_v17  ;;  %2577 = vmatmul.bf16.gmra.mxu1 %v2473_v33  ;;  %v2426_v7 = vmul.f32 %v2383_v22, %v2234_v62 }
 0x4f6   : > { %v2387_v23 = vmul.f32 0.5, %v2386_v59 }
 0x4f7   : > { %v2221_v42 = vmax.f32 %v2205_v9, 0.0  ;;  %v2445_v10 = vmul.f32 %v4277_v55, %v2426_v7 }
 0x4f8   : > { %v2388_v41 = vsub.f32 1.5, %v2387_v23 }
 0x4f9   : > { %v3114_v53 = vpop.eup %3113  ;;  %v2253_v2 = vadd.f32 1e-05, %v2221_v42  ;;  %v2464_v5 = vadd.f32 %v4285_v18, %v2445_v10 }
 0x4fa   : > { %v2395_v0 = vmul.f32 %v3114_v53, %v2252_v25  ;;  %v2389_v43 = vmul.f32 %v3112_v3, %v2388_v41  ;;  %vm2401_vm6 = vweird.f32 %v3114_v53 }
 0x4fb   : > { %3115 = vrsqrt.f32 %v2253_v2  ;;  %vm2402_vm8 = vmor %vm2400_vm7, %vm2401_vm6  ;;  %vm2410_vm10 = vweird.f32 %v2253_v2 }
 0x4fc   : > { %v2396_v54 = vmul.f32 %v3114_v53, %v2395_v0  ;;  %v2393_v14 = vsel %vm2392_vm5, %v3112_v3, %v2389_v43 }
 0x4fd   : > { %v2427_v26 = vmul.f32 %v2393_v14, %v2235_v11 }
 0x4fe   : > { %v2397_v50 = vmul.f32 0.5, %v2396_v54 }
 0x4ff   : > { %v2446_v8 = vmul.f32 %v4277_v55, %v2427_v26 }
 0x500   : > { %v2398_v61 = vsub.f32 1.5, %v2397_v50 }
 0x501   : > { %v3116_v56 = vpop.eup %3115  ;;  %v2465_v44 = vadd.f32 %v4285_v18, %v2446_v8 }
 0x502   : > { %v2405_v31 = vmul.f32 %v3116_v56, %v2253_v2  ;;  %v2399_v37 = vmul.f32 %v3114_v53, %v2398_v61  ;;  %vm2411_vm9 = vweird.f32 %v3116_v56 }
 0x503   : > { %v2474_v21 = vpack.c.bf16 %v2465_v44, %v2464_v5  ;;  %vm2412_vm11 = vmor %vm2410_vm10, %vm2411_vm9 }
 0x504   : > { %v2406_v51 = vmul.f32 %v3116_v56, %v2405_v31  ;;  %v2403_v45 = vsel %vm2402_vm8, %v3114_v53, %v2399_v37 }
 0x505   : > { %2582 = vmatmul.bf16.gmra.mxu1 %v2474_v21  ;;  %v2428_v30 = vmul.f32 %v2403_v45, %v2236_v12 }
 0x506   : > { %v2407_v39 = vmul.f32 0.5, %v2406_v51 }
 0x507   : > { %v2447_v34 = vmul.f32 %v4277_v55, %v2428_v30 }
 0x508   : > { %v2408_v15 = vsub.f32 1.5, %v2407_v39 }
 0x509   : > { %v2466_v38 = vadd.f32 %v4285_v18, %v2447_v34 }
 0x50a   : > { %v2409_v16 = vmul.f32 %v3116_v56, %v2408_v15 }
 0x50c   : > { %v2413_v46 = vsel %vm2412_vm11, %v3116_v56, %v2409_v16 }
 0x50d   : > { %v2429_v40 = vmul.f32 %v2413_v46, %v2237_v52 }
 0x50f   : > { %v2448_v6 = vmul.f32 %v4277_v55, %v2429_v40 }
 0x511   : > { %v2467_v58 = vadd.f32 %v4285_v18, %v2448_v6 }
 0x513   : > { %v2475_v28 = vpack.c.bf16 %v2467_v58, %v2466_v38 }
 0x515   : > { %2587 = vmatmul.bf16.gmra.mxu1 %v2475_v28 }
 0x51b   : > { %v2553_v1 = vpop.f32.mrf.mxu1 }
 0x51c   : > { %v2554_v36 = vadd.f32 %v4421_v13, %v2553_v1 }
 0x51e   : > { %3117 = vtanh.f32 %v2554_v36 }
 0x523   : > { %v2555_v55 = vpop.f32.mrf.mxu1 }
 0x524   : > { %v3118_v18 = vpop.eup %3117  ;;  %v2556_v32 = vadd.f32 %v4421_v13, %v2555_v55 }
 0x525   : > { %2609 = vst.msk [vmem:[%s4428_s19] sm:$0xff] %vm513_vm0, %v3118_v18 }
 0x526   : > { %3119 = vtanh.f32 %v2556_v32 }
 0x52b   : > { %v2558_v4 = vpop.f32.mrf.mxu1 }
 0x52c   : > { %v3120_v24 = vpop.eup %3119  ;;  %v2559_v20 = vadd.f32 %v4421_v13, %v2558_v4 }
 0x52d   : > { %2610 = vst.msk [vmem:[%s4428_s19 + $0x8] sm:$0xff] %vm513_vm0, %v3120_v24 }
 0x52e   : > { %3121 = vtanh.f32 %v2559_v20 }
 0x533   : > { %v2560_v60 = vpop.f32.mrf.mxu1 }
 0x534   : > { %v3122_v48 = vpop.eup %3121  ;;  %v2561_v57 = vadd.f32 %v4421_v13, %v2560_v60 }
 0x535   : > { %2611 = vst.msk [vmem:[%s4428_s19 + $0x10] sm:$0xff] %vm513_vm0, %v3122_v48 }
 0x536   : > { %3123 = vtanh.f32 %v2561_v57 }
 0x53c   : > { %v3124_v25 = vpop.eup %3123 }
 0x53d   : > { %2612 = vst.msk [vmem:[%s4428_s19 + $0x18] sm:$0xff] %vm513_vm0, %v3124_v25 }
 0x541   : > { %v2563_v47 = vpop.f32.mrf.mxu1 }
 0x542   : > { %v2564_v3 = vadd.f32 %v4421_v13, %v2563_v47 }
 0x544   : > { %3125 = vtanh.f32 %v2564_v3 }
 0x549   : > { %v2565_v49 = vpop.f32.mrf.mxu1 }
 0x54a   : > { %v3126_v35 = vpop.eup %3125  ;;  %v2566_v19 = vadd.f32 %v4421_v13, %v2565_v49 }
 0x54b   : > { %2613 = vst.msk [vmem:[%s4428_s19 + $0x20] sm:$0xff] %vm513_vm0, %v3126_v35 }
 0x54c   : > { %3127 = vtanh.f32 %v2566_v19 }
 0x552   : > { %v2568_v27 = vpop.f32.mrf.mxu1  ;;  %v3128_v29 = vpop.eup %3127 }
 0x553   : > { %v2569_v17 = vadd.f32 %v4421_v13, %v2568_v27  ;;  %2614 = vst.msk [vmem:[%s4428_s19 + $0x28] sm:$0xff] %vm513_vm0, %v3128_v29 }
 0x555   : > { %3129 = vtanh.f32 %v2569_v17 }
 0x55a   : > { %v2570_v63 = vpop.f32.mrf.mxu1 }
 0x55b   : > { %v3130_v33 = vpop.eup %3129  ;;  %v2571_v59 = vadd.f32 %v4421_v13, %v2570_v63 }
 0x55c   : > { %2615 = vst.msk [vmem:[%s4428_s19 + $0x30] sm:$0xff] %vm513_vm0, %v3130_v33 }
 0x55d   : > { %3131 = vtanh.f32 %v2571_v59 }
 0x562   : > { %v2573_v23 = vpop.f32.mrf.mxu1 }
 0x563   : > { %v3132_v9 = vpop.eup %3131  ;;  %v2574_v22 = vadd.f32 %v4421_v13, %v2573_v23 }
 0x564   : > { %2616 = vst.msk [vmem:[%s4428_s19 + $0x38] sm:$0xff] %vm513_vm0, %v3132_v9 }
 0x565   : > { %3133 = vtanh.f32 %v2574_v22 }
 0x56a   : > { %v2575_v62 = vpop.f32.mrf.mxu1 }
 0x56b   : > { %v3134_v42 = vpop.eup %3133  ;;  %v2576_v53 = vadd.f32 %v4421_v13, %v2575_v62 }
 0x56c   : > { %2617 = vst.msk [vmem:[%s4428_s19 + $0x40] sm:$0xff] %vm513_vm0, %v3134_v42 }
 0x56d   : > { %3135 = vtanh.f32 %v2576_v53 }
 0x572   : > { %v2578_v41 = vpop.f32.mrf.mxu1 }
 0x573   : > { %v3136_v0 = vpop.eup %3135  ;;  %v2579_v2 = vadd.f32 %v4421_v13, %v2578_v41 }
 0x574   : > { %2618 = vst.msk [vmem:[%s4428_s19 + $0x48] sm:$0xff] %vm513_vm0, %v3136_v0 }
 0x575   : > { %3137 = vtanh.f32 %v2579_v2 }
 0x57a   : > { %v2580_v7 = vpop.f32.mrf.mxu1 }
 0x57b   : > { %v3138_v43 = vpop.eup %3137  ;;  %v2581_v11 = vadd.f32 %v4421_v13, %v2580_v7 }
 0x57c   : > { %2619 = vst.msk [vmem:[%s4428_s19 + $0x50] sm:$0xff] %vm513_vm0, %v3138_v43 }
 0x57d   : > { %3139 = vtanh.f32 %v2581_v11 }
 0x582   : > { %v2583_v54 = vpop.f32.mrf.mxu1 }
 0x583   : > { %v3140_v14 = vpop.eup %3139  ;;  %v2584_v50 = vadd.f32 %v4421_v13, %v2583_v54 }
 0x584   : > { %2620 = vst.msk [vmem:[%s4428_s19 + $0x58] sm:$0xff] %vm513_vm0, %v3140_v14 }
 0x585   : > { %3141 = vtanh.f32 %v2584_v50 }
 0x58a   : > { %v2585_v26 = vpop.f32.mrf.mxu1 }
 0x58b   : > { %v3142_v10 = vpop.eup %3141  ;;  %v2586_v61 = vadd.f32 %v4421_v13, %v2585_v26 }
 0x58c   : > { %2621 = vst.msk [vmem:[%s4428_s19 + $0x60] sm:$0xff] %vm513_vm0, %v3142_v10 }
 0x58d   : > { %3143 = vtanh.f32 %v2586_v61 }
 0x592   : > { %v2588_v8 = vpop.f32.mrf.mxu1 }
 0x593   : > { %v3144_v56 = vpop.eup %3143  ;;  %v2589_v5 = vadd.f32 %v4421_v13, %v2588_v8 }
 0x594   : > { %2622 = vst.msk [vmem:[%s4428_s19 + $0x68] sm:$0xff] %vm513_vm0, %v3144_v56 }
 0x595   : > { %3145 = vtanh.f32 %v2589_v5 }
 0x59a   : > { %v2590_v44 = vpop.f32.mrf.mxu1 }
 0x59b   : > { %v3146_v31 = vpop.eup %3145  ;;  %v2591_v37 = vadd.f32 %v4421_v13, %v2590_v44 }
 0x59c   : > { %2623 = vst.msk [vmem:[%s4428_s19 + $0x70] sm:$0xff] %vm513_vm0, %v3146_v31 }
 0x59d   : > { %3147 = vtanh.f32 %v2591_v37 }
 0x5a3   : > { %v3148_v21 = vpop.eup %3147 }
 0x5a4   : > { %2624 = vst.msk [vmem:[%s4428_s19 + $0x78] sm:$0xff] %vm513_vm0, %v3148_v21 }
 0x5a5 PF: > { %s23_s25 = sadd.s32 1, %s3155_s25  }
 0x5a6   : > { %p20_p4 = scmp.ge.s32.totalorder %s23_s25, 6  }
 0x5a8   :  { %22 = sbr.rel (!%p20_p4) target bundleno = 1 (0x1), region = 108 }

</bundles_post_ra>
